<compile_context>
chip_gen: v7x
topology: tpu7x:2x2x1
jax: 0.10.0
libtpu: 0.0.40
codegen_flags: <defaults>
</compile_context>

<pallas_src>
import functools

import jax
import jax.numpy as jnp
from jax.experimental import pallas as pl
from jax.experimental.pallas import tpu as pltpu


# ----------------------------------------------------------------------------
# Pallas kernel
# ----------------------------------------------------------------------------
def _lstm_decoder_kernel(
    h0i_ref,      # [B, H]  f32       layer-0 initial hidden = mean(hidden_states, 1)
    h1i_ref,      # [B, H]  f32       layer-1 initial hidden = (gt + sum(hs,1)) / (T+1)
    ci_ref,       # [B, H]  f32       initial cell state (both layers) = mean(cell_states, 1)
    p_ref,        # [B, I_pad] f32    first input frame, zero-padded to 128 lanes
    w0_ref,       # [I_pad+H, 4H] bf16  cell-0 fused weights [W_ih ; W_hh]
    b0_ref,       # [1, 4H] f32       cell-0 bias (b_ih + b_hh)
    b1_ref,       # [1, 4H] f32       cell-1 bias
    bout_ref,     # [1, I_pad] f32    output bias (zero-padded lanes)
    w1_hbm_ref,   # [2H, 4H] bf16     cell-1 fused weights (HBM, manual DMA)
    wout_hbm_ref, # [H, I_pad] f32    output projection (HBM, manual DMA)
    out_ref,      # [S, B, I_pad] f32 output, frame-major
    w1_vmem,      # scratch VMEM [2H, 4H] bf16
    wout_vmem,    # scratch VMEM [H, I_pad] f32
    dma_sem,      # DMA semaphores (2,)
):
    S, B, I_pad = out_ref.shape
    H = h0i_ref.shape[-1]

    # Kick off background copies for the weights that are not needed until
    # after frame-0 cell-0 (w1) / cell-1 (wout).  Everything else was
    # auto-copied into VMEM before the body ran.
    w1_copy = pltpu.make_async_copy(w1_hbm_ref, w1_vmem, dma_sem.at[0])
    wout_copy = pltpu.make_async_copy(wout_hbm_ref, wout_vmem, dma_sem.at[1])
    w1_copy.start()
    wout_copy.start()

    w0 = w0_ref[...]                              # bf16, resident

    # Hoisted bias broadcasts (JAX does not CSE broadcast_in_dim).
    b0 = jnp.broadcast_to(b0_ref[...], (B, 4 * H))
    b1 = jnp.broadcast_to(b1_ref[...], (B, 4 * H))
    bout = jnp.broadcast_to(bout_ref[...], (B, I_pad))

    h0 = h0i_ref[...]
    h1 = h1i_ref[...]
    c0 = ci_ref[...]
    c1 = ci_ref[...]
    x = p_ref[...]                                # pad lanes are exactly zero

    def sigmoid(v):
        # Exact: sigmoid(v) = 0.5 * (1 + tanh(v / 2)) — single EUP op, no divide.
        return 0.5 * jnp.tanh(0.5 * v) + 0.5

    def lstm_cell(xh, c, w, b):
        # One fused gate matmul per cell: [B, 2H] x [2H, 4H], bf16 operands,
        # f32 accumulation (K = 256 exactly fills the v6e/v7x MXU).
        gates = jnp.dot(xh.astype(w.dtype), w,
                        preferred_element_type=jnp.float32) + b      # [B, 4H] f32
        i_g = sigmoid(gates[:, 0 * H:1 * H])       # torch gate order: i, f, g, o
        f_g = sigmoid(gates[:, 1 * H:2 * H])
        g_g = jnp.tanh(gates[:, 2 * H:3 * H])
        o_g = sigmoid(gates[:, 3 * H:4 * H])
        c_new = f_g * c + i_g * g_g
        h_new = o_g * jnp.tanh(c_new)
        return h_new, c_new

    w1 = None
    wout = None
    # S is small and static: full unroll -> static-index stores; LLO overlaps
    # the EUP/VPU tail of step t with the MXU feed of step t+1.
    for frame in range(S):
        # Both concat halves are exactly 128 lanes (one f32 vreg) wide ->
        # register-level concat, no VMEM relayout.
        h0, c0 = lstm_cell(jnp.concatenate([x, h0], axis=-1), c0, w0, b0)
        if frame == 0:
            w1_copy.wait()                        # hide w1 DMA behind cell-0
            w1 = w1_vmem[...]
        h1, c1 = lstm_cell(jnp.concatenate([h0, h1], axis=-1), c1, w1, b1)
        if frame == 0:
            wout_copy.wait()                      # hide wout DMA behind cell-1
            wout = wout_vmem[...]
        # Residual "input_first" path kept in f32.  Pad lanes of x stay exactly
        # zero because wout pad columns and bout pad lanes are exactly zero.
        x = jnp.dot(h1, wout, preferred_element_type=jnp.float32) + bout + x
        out_ref[frame] = x


# ----------------------------------------------------------------------------
# One-time parameter preparation (done at parameter-load time, NOT per call)
# ----------------------------------------------------------------------------
def prepare_decoder_params(params):
    """Pad / fuse / bf16-cast the decoder weights once."""
    I, fourH = params["wih0"].shape
    H = fourH // 4
    assert I <= 128, "kernel assumes input_size <= 128 (single 128-lane pad)"
    assert H % 128 == 0, "hidden dim must be lane-aligned for the gate slices"
    I_pad = ((I + 127) // 128) * 128
    pad_i = I_pad - I

    wih0 = jnp.pad(params["wih0"], ((0, pad_i), (0, 0)))                 # [I_pad, 4H]
    return {
        # Fused (x@Wih + h@Whh == [x,h] @ [Wih;Whh]) gate weights, bf16.
        "w0": jnp.concatenate([wih0, params["whh0"]], axis=0).astype(jnp.bfloat16),
        "w1": jnp.concatenate([params["wih1"], params["whh1"]], axis=0).astype(jnp.bfloat16),
        "b0": params["b0"].astype(jnp.float32),
        "b1": params["b1"].astype(jnp.float32),
        # Output projection / residual path stays f32; pad columns are zero.
        "wout": jnp.pad(params["wout"], ((0, 0), (0, pad_i))).astype(jnp.float32),
        "bout": jnp.pad(params["bout"], ((0, 0), (0, pad_i))).astype(jnp.float32),
    }


# ----------------------------------------------------------------------------
# Wrapper
# ----------------------------------------------------------------------------
@functools.partial(jax.jit, static_argnames=("seq_length_out",))
def lstm_decoder_pallas(hidden_states, cell_states, global_t_state, p, prepared,
                        *, seq_length_out):
    B, T, H = hidden_states.shape
    I = p.shape[-1]
    S = seq_length_out
    I_pad = prepared["wout"].shape[1]
    assert prepared["b0"].shape[-1] == 4 * H and I <= I_pad

    # One-time init-state reductions, hoisted out of the kernel (fused by XLA).
    c_init = jnp.mean(cell_states, axis=1)                                 # [B, H]
    h0_init = jnp.mean(hidden_states, axis=1)                              # [B, H]
    h1_init = (global_t_state + jnp.sum(hidden_states, axis=1)) / jnp.float32(T + 1)
    p0 = jnp.pad(p[:, 0, :], ((0, 0), (0, I_pad - I)))                     # [B, I_pad]

    vmem = pl.BlockSpec(memory_space=pltpu.MemorySpace.VMEM)
    hbm = pl.BlockSpec(memory_space=pl.ANY)

    out = pl.pallas_call(
        _lstm_decoder_kernel,
        out_shape=jax.ShapeDtypeStruct((S, B, I_pad), jnp.float32),
        in_specs=[vmem, vmem, vmem, vmem,        # h0_init, h1_init, c_init, p0
                  vmem, vmem, vmem, vmem,        # w0, b0, b1, bout
                  hbm, hbm],                     # w1, wout  (manual DMA)
        out_specs=vmem,
        scratch_shapes=[
            pltpu.VMEM(prepared["w1"].shape, prepared["w1"].dtype),
            pltpu.VMEM(prepared["wout"].shape, prepared["wout"].dtype),
            pltpu.SemaphoreType.DMA((2,)),
        ],
    )(h0_init, h1_init, c_init, p0,
      prepared["w0"], prepared["b0"], prepared["b1"], prepared["bout"],
      prepared["w1"], prepared["wout"])

    # [S, B, I_pad] -> [B, S, I]  (drop pad lanes, match PyTorch layout)
    return jnp.transpose(out[:, :, :I], (1, 0, 2))


# ----------------------------------------------------------------------------
# Pure-JAX reference (mirrors the PyTorch forward; gate_dtype selects numerics)
# ----------------------------------------------------------------------------
def lstm_decoder_reference(hidden_states, cell_states, global_t_state, p, params,
                           *, seq_length_out, gate_dtype=jnp.float32):
    def sigmoid(v):
        return 0.5 * jnp.tanh(0.5 * v) + 0.5

    def cell(x, h, c, wih, whh, b):
        gates = (jnp.dot(x.astype(gate_dtype), wih.astype(gate_dtype),
                         preferred_element_type=jnp.float32)
                 + jnp.dot(h.astype(gate_dtype), whh.astype(gate_dtype),
                           preferred_element_type=jnp.float32) + b)
        i_g, f_g, g_g, o_g = jnp.split(gates, 4, axis=-1)
        i_g = sigmoid(i_g)
        f_g = sigmoid(f_g)
        g_g = jnp.tanh(g_g)
        o_g = sigmoid(o_g)
        c_new = f_g * c + i_g * g_g
        return o_g * jnp.tanh(c_new), c_new

    c_init = cell_states.mean(axis=1)
    h0 = hidden_states.mean(axis=1)
    h1 = jnp.concatenate([global_t_state[:, None, :], hidden_states], axis=1).mean(axis=1)
    c0 = c_init
    c1 = c_init

    outs = []
    for frame in range(seq_length_out):
        x = p[:, 0, :] if frame == 0 else outs[-1]
        h0, c0 = cell(x, h0, c0, params["wih0"], params["whh0"], params["b0"])
        h1, c1 = cell(h0, h1, c1, params["wih1"], params["whh1"], params["b1"])
        outs.append(jnp.dot(h1, params["wout"]) + params["bout"] + x)
    return jnp.stack(outs, axis=1)


# ----------------------------------------------------------------------------
# Main
# ----------------------------------------------------------------------------
if __name__ == "__main__":
    # Synthetic config (mirrors ST_HRN config fields):
    #   input_size=64, bone_dim=8 -> nbones=8, hidden_size=16
    #   hidden_dim = nbones * hidden_size = 128
    #   input_window_size=8 (so T = 7), output_window_size=8, decoder_recurrent_steps=2
    B = 8
    input_size = 64
    bone_dim = 8
    nbones = input_size // bone_dim          # 8
    hidden_size = 16
    H = nbones * hidden_size                 # 128
    T = 7                                    # input_window_size - 1
    S = 8                                    # output_window_size

    key = jax.random.PRNGKey(0)
    keys = jax.random.split(key, 16)

    def u(k, shape, scale):
        return jax.random.uniform(k, shape, jnp.float32, -scale, scale)

    # Deterministic parameter init (shapes follow nn.LSTMCell / weights_out,
    # weights stored transposed vs torch for feature-last matmuls).
    lstm_scale = 1.0 / jnp.sqrt(jnp.float32(H))
    params = {
        # cell 0: LSTMCell(input_size, H)
        "wih0": u(keys[0], (input_size, 4 * H), lstm_scale),
        "whh0": u(keys[1], (H, 4 * H), lstm_scale),
        "b0":   u(keys[2], (1, 4 * H), lstm_scale) + u(keys[3], (1, 4 * H), lstm_scale),
        # cell 1: LSTMCell(H, H)
        "wih1": u(keys[4], (H, 4 * H), lstm_scale),
        "whh1": u(keys[5], (H, 4 * H), lstm_scale),
        "b1":   u(keys[6], (1, 4 * H), lstm_scale) + u(keys[7], (1, 4 * H), lstm_scale),
        # output projection: weights_out [H, input_size], bias_out [input_size]
        "wout": u(keys[8], (H, input_size), 0.04),
        "bout": u(keys[9], (1, input_size), 0.04),
    }

    hidden_states = jax.random.normal(keys[10], (B, T, H), jnp.float32)
    cell_states = jax.random.normal(keys[11], (B, T, H), jnp.float32)
    global_t_state = jax.random.normal(keys[12], (B, H), jnp.float32)
    # NOTE: docstring says p has nbones*hidden_size features, but the code
    # requires p[:, 0, :] to have input_size features; we follow the code.
    p = jax.random.normal(keys[13], (B, 1, input_size), jnp.float32)

    # One-time weight prep (pad / fuse / bf16 cast) — NOT inside the jitted call.
    prepared = prepare_decoder_params(params)

    out = lstm_decoder_pallas(hidden_states, cell_states, global_t_state, p,
                              prepared, seq_length_out=S)
    out = jax.block_until_ready(out)
    assert out.shape == (B, S, input_size), out.shape

    # (a) Tight check vs a reference using the same numerics as the kernel
    #     (bf16 gate matmuls, f32 accumulation / output path).
    ref_bf16 = lstm_decoder_reference(hidden_states, cell_states, global_t_state,
                                      p, params, seq_length_out=S,
                                      gate_dtype=jnp.bfloat16)
    ref_bf16 = jax.block_until_ready(ref_bf16)
    if not jnp.allclose(out, ref_bf16, atol=2e-3, rtol=2e-3):
        max_err = float(jnp.max(jnp.abs(out - ref_bf16)))
        raise AssertionError(f"mismatch vs bf16-gate reference, max abs err = {max_err}")

    # (b) Sanity bound vs the full-f32 (PyTorch-semantics) reference: the bf16
    #     gate quantization accumulated over the 8-frame residual recurrence
    #     must stay small.
    ref_f32 = lstm_decoder_reference(hidden_states, cell_states, global_t_state,
                                     p, params, seq_length_out=S)
    ref_f32 = jax.block_until_ready(ref_f32)
    if not jnp.allclose(out, ref_f32, atol=5e-2, rtol=5e-2):
        max_err = float(jnp.max(jnp.abs(out - ref_f32)))
        raise AssertionError(f"bf16 gate quantization too large, max abs err = {max_err}")

    print("KERNEL_OK")
</pallas_src>

<mosaic_0001>
module attributes {stable_mosaic.version = 11 : i64} {
  func.func @_lstm_decoder_kernel(%arg0: memref<8x128xf32, #tpu.memory_space<vmem>>, %arg1: memref<8x128xf32, #tpu.memory_space<vmem>>, %arg2: memref<8x128xf32, #tpu.memory_space<vmem>>, %arg3: memref<8x128xf32, #tpu.memory_space<vmem>>, %arg4: memref<256x512xbf16, #tpu.memory_space<vmem>>, %arg5: memref<1x512xf32, #tpu.memory_space<vmem>>, %arg6: memref<1x512xf32, #tpu.memory_space<vmem>>, %arg7: memref<1x128xf32, #tpu.memory_space<vmem>>, %arg8: memref<256x512xbf16, #tpu.memory_space<any>>, %arg9: memref<128x128xf32, #tpu.memory_space<any>>, %arg10: memref<8x8x128xf32, #tpu.memory_space<vmem>>, %arg11: memref<256x512xbf16, #tpu.memory_space<vmem>>, %arg12: memref<128x128xf32, #tpu.memory_space<vmem>>, %arg13: memref<2x!tpu.dma_semaphore, #tpu.memory_space<semaphore_mem>>) attributes {dimension_semantics = [], scalar_prefetch = 0 : i64, scratch_operands = 3 : i64, tpu.core_type = #tpu.core_type<tc>} {
    %c0_i32 = arith.constant 0 : i32
    %0 = tpu.memref_slice %arg13[%c0_i32] : memref<2x!tpu.dma_semaphore, #tpu.memory_space<semaphore_mem>> -> memref<1x!tpu.dma_semaphore, #tpu.memory_space<semaphore_mem>>
    %1 = tpu.memref_squeeze %0 : memref<1x!tpu.dma_semaphore, #tpu.memory_space<semaphore_mem>> -> memref<!tpu.dma_semaphore, #tpu.memory_space<semaphore_mem>>
    tpu.enqueue_dma source(%arg8 : memref<256x512xbf16, #tpu.memory_space<any>>) target(%arg11 : memref<256x512xbf16, #tpu.memory_space<vmem>>) target_semaphore(%1 : memref<!tpu.dma_semaphore, #tpu.memory_space<semaphore_mem>>)
    %c1_i32 = arith.constant 1 : i32
    %2 = tpu.memref_slice %arg13[%c1_i32] : memref<2x!tpu.dma_semaphore, #tpu.memory_space<semaphore_mem>> -> memref<1x!tpu.dma_semaphore, #tpu.memory_space<semaphore_mem>>
    %3 = tpu.memref_squeeze %2 : memref<1x!tpu.dma_semaphore, #tpu.memory_space<semaphore_mem>> -> memref<!tpu.dma_semaphore, #tpu.memory_space<semaphore_mem>>
    tpu.enqueue_dma source(%arg9 : memref<128x128xf32, #tpu.memory_space<any>>) target(%arg12 : memref<128x128xf32, #tpu.memory_space<vmem>>) target_semaphore(%3 : memref<!tpu.dma_semaphore, #tpu.memory_space<semaphore_mem>>)
    %c0 = arith.constant 0 : index
    %c0_0 = arith.constant 0 : index
    %4 = vector.load %arg4[%c0, %c0_0] : memref<256x512xbf16, #tpu.memory_space<vmem>>, vector<256x512xbf16>
    %c0_1 = arith.constant 0 : index
    %c0_2 = arith.constant 0 : index
    %5 = vector.load %arg5[%c0_1, %c0_2] : memref<1x512xf32, #tpu.memory_space<vmem>>, vector<1x512xf32>
    %6 = vector.shape_cast %5 : vector<1x512xf32> to vector<1x512xf32>
    %7 = vector.broadcast %6 : vector<1x512xf32> to vector<8x512xf32>
    %c0_3 = arith.constant 0 : index
    %c0_4 = arith.constant 0 : index
    %8 = vector.load %arg6[%c0_3, %c0_4] : memref<1x512xf32, #tpu.memory_space<vmem>>, vector<1x512xf32>
    %9 = vector.shape_cast %8 : vector<1x512xf32> to vector<1x512xf32>
    %10 = vector.broadcast %9 : vector<1x512xf32> to vector<8x512xf32>
    %c0_5 = arith.constant 0 : index
    %c0_6 = arith.constant 0 : index
    %11 = vector.load %arg7[%c0_5, %c0_6] : memref<1x128xf32, #tpu.memory_space<vmem>>, vector<1x128xf32>
    %12 = vector.shape_cast %11 : vector<1x128xf32> to vector<1x128xf32>
    %13 = vector.broadcast %12 : vector<1x128xf32> to vector<8x128xf32>
    %c0_7 = arith.constant 0 : index
    %c0_8 = arith.constant 0 : index
    %14 = vector.load %arg0[%c0_7, %c0_8] : memref<8x128xf32, #tpu.memory_space<vmem>>, vector<8x128xf32>
    %c0_9 = arith.constant 0 : index
    %c0_10 = arith.constant 0 : index
    %15 = vector.load %arg1[%c0_9, %c0_10] : memref<8x128xf32, #tpu.memory_space<vmem>>, vector<8x128xf32>
    %c0_11 = arith.constant 0 : index
    %c0_12 = arith.constant 0 : index
    %16 = vector.load %arg2[%c0_11, %c0_12] : memref<8x128xf32, #tpu.memory_space<vmem>>, vector<8x128xf32>
    %c0_13 = arith.constant 0 : index
    %c0_14 = arith.constant 0 : index
    %17 = vector.load %arg2[%c0_13, %c0_14] : memref<8x128xf32, #tpu.memory_space<vmem>>, vector<8x128xf32>
    %c0_15 = arith.constant 0 : index
    %c0_16 = arith.constant 0 : index
    %18 = vector.load %arg3[%c0_15, %c0_16] : memref<8x128xf32, #tpu.memory_space<vmem>>, vector<8x128xf32>
    %19 = tpu.concatenate %18, %14 in 1 : vector<8x128xf32>, vector<8x128xf32> -> vector<8x256xf32>
    %20 = arith.truncf %19 : vector<8x256xf32> to vector<8x256xbf16>
    %cst = arith.constant dense<0.000000e+00> : vector<8x512xf32>
    %21 = tpu.matmul %20, %4, %cst {dimension_numbers = #tpu.dot_dimension_numbers<[1], [0], [0], [1], [0, 0, 1, 1], [], []>} : vector<8x256xbf16>, vector<256x512xbf16>, vector<8x512xf32> -> vector<8x512xf32>
    %22 = arith.addf %21, %7 : vector<8x512xf32>
    %23 = vector.extract_strided_slice %22 {offsets = [0, 0], sizes = [8, 128], strides = [1, 1]} : vector<8x512xf32> to vector<8x128xf32>
    %cst_17 = arith.constant 5.000000e-01 : f32
    %24 = vector.broadcast %cst_17 : f32 to vector<8x128xf32>
    %25 = arith.mulf %24, %23 : vector<8x128xf32>
    %26 = math.tanh %25 : vector<8x128xf32>
    %cst_18 = arith.constant 5.000000e-01 : f32
    %27 = vector.broadcast %cst_18 : f32 to vector<8x128xf32>
    %28 = arith.mulf %27, %26 : vector<8x128xf32>
    %cst_19 = arith.constant 5.000000e-01 : f32
    %29 = vector.broadcast %cst_19 : f32 to vector<8x128xf32>
    %30 = arith.addf %28, %29 : vector<8x128xf32>
    %31 = vector.extract_strided_slice %22 {offsets = [0, 128], sizes = [8, 128], strides = [1, 1]} : vector<8x512xf32> to vector<8x128xf32>
    %cst_20 = arith.constant 5.000000e-01 : f32
    %32 = vector.broadcast %cst_20 : f32 to vector<8x128xf32>
    %33 = arith.mulf %32, %31 : vector<8x128xf32>
    %34 = math.tanh %33 : vector<8x128xf32>
    %cst_21 = arith.constant 5.000000e-01 : f32
    %35 = vector.broadcast %cst_21 : f32 to vector<8x128xf32>
    %36 = arith.mulf %35, %34 : vector<8x128xf32>
    %cst_22 = arith.constant 5.000000e-01 : f32
    %37 = vector.broadcast %cst_22 : f32 to vector<8x128xf32>
    %38 = arith.addf %36, %37 : vector<8x128xf32>
    %39 = vector.extract_strided_slice %22 {offsets = [0, 256], sizes = [8, 128], strides = [1, 1]} : vector<8x512xf32> to vector<8x128xf32>
    %40 = math.tanh %39 : vector<8x128xf32>
    %41 = vector.extract_strided_slice %22 {offsets = [0, 384], sizes = [8, 128], strides = [1, 1]} : vector<8x512xf32> to vector<8x128xf32>
    %cst_23 = arith.constant 5.000000e-01 : f32
    %42 = vector.broadcast %cst_23 : f32 to vector<8x128xf32>
    %43 = arith.mulf %42, %41 : vector<8x128xf32>
    %44 = math.tanh %43 : vector<8x128xf32>
    %cst_24 = arith.constant 5.000000e-01 : f32
    %45 = vector.broadcast %cst_24 : f32 to vector<8x128xf32>
    %46 = arith.mulf %45, %44 : vector<8x128xf32>
    %cst_25 = arith.constant 5.000000e-01 : f32
    %47 = vector.broadcast %cst_25 : f32 to vector<8x128xf32>
    %48 = arith.addf %46, %47 : vector<8x128xf32>
    %49 = arith.mulf %38, %16 : vector<8x128xf32>
    %50 = arith.mulf %30, %40 : vector<8x128xf32>
    %51 = arith.addf %49, %50 : vector<8x128xf32>
    %52 = math.tanh %51 : vector<8x128xf32>
    %53 = arith.mulf %48, %52 : vector<8x128xf32>
    %c0_i32_26 = arith.constant 0 : i32
    %54 = tpu.memref_slice %arg13[%c0_i32_26] : memref<2x!tpu.dma_semaphore, #tpu.memory_space<semaphore_mem>> -> memref<1x!tpu.dma_semaphore, #tpu.memory_space<semaphore_mem>>
    %55 = tpu.memref_squeeze %54 : memref<1x!tpu.dma_semaphore, #tpu.memory_space<semaphore_mem>> -> memref<!tpu.dma_semaphore, #tpu.memory_space<semaphore_mem>>
    tpu.wait_dma2 semaphore(%55 : memref<!tpu.dma_semaphore, #tpu.memory_space<semaphore_mem>>) src(%arg8 : memref<256x512xbf16, #tpu.memory_space<any>>) dst(%arg11 : memref<256x512xbf16, #tpu.memory_space<vmem>>)
    %c0_27 = arith.constant 0 : index
    %c0_28 = arith.constant 0 : index
    %56 = vector.load %arg11[%c0_27, %c0_28] : memref<256x512xbf16, #tpu.memory_space<vmem>>, vector<256x512xbf16>
    %57 = tpu.concatenate %53, %15 in 1 : vector<8x128xf32>, vector<8x128xf32> -> vector<8x256xf32>
    %58 = arith.truncf %57 : vector<8x256xf32> to vector<8x256xbf16>
    %cst_29 = arith.constant dense<0.000000e+00> : vector<8x512xf32>
    %59 = tpu.matmul %58, %56, %cst_29 {dimension_numbers = #tpu.dot_dimension_numbers<[1], [0], [0], [1], [0, 0, 1, 1], [], []>} : vector<8x256xbf16>, vector<256x512xbf16>, vector<8x512xf32> -> vector<8x512xf32>
    %60 = arith.addf %59, %10 : vector<8x512xf32>
    %61 = vector.extract_strided_slice %60 {offsets = [0, 0], sizes = [8, 128], strides = [1, 1]} : vector<8x512xf32> to vector<8x128xf32>
    %cst_30 = arith.constant 5.000000e-01 : f32
    %62 = vector.broadcast %cst_30 : f32 to vector<8x128xf32>
    %63 = arith.mulf %62, %61 : vector<8x128xf32>
    %64 = math.tanh %63 : vector<8x128xf32>
    %cst_31 = arith.constant 5.000000e-01 : f32
    %65 = vector.broadcast %cst_31 : f32 to vector<8x128xf32>
    %66 = arith.mulf %65, %64 : vector<8x128xf32>
    %cst_32 = arith.constant 5.000000e-01 : f32
    %67 = vector.broadcast %cst_32 : f32 to vector<8x128xf32>
    %68 = arith.addf %66, %67 : vector<8x128xf32>
    %69 = vector.extract_strided_slice %60 {offsets = [0, 128], sizes = [8, 128], strides = [1, 1]} : vector<8x512xf32> to vector<8x128xf32>
    %cst_33 = arith.constant 5.000000e-01 : f32
    %70 = vector.broadcast %cst_33 : f32 to vector<8x128xf32>
    %71 = arith.mulf %70, %69 : vector<8x128xf32>
    %72 = math.tanh %71 : vector<8x128xf32>
    %cst_34 = arith.constant 5.000000e-01 : f32
    %73 = vector.broadcast %cst_34 : f32 to vector<8x128xf32>
    %74 = arith.mulf %73, %72 : vector<8x128xf32>
    %cst_35 = arith.constant 5.000000e-01 : f32
    %75 = vector.broadcast %cst_35 : f32 to vector<8x128xf32>
    %76 = arith.addf %74, %75 : vector<8x128xf32>
    %77 = vector.extract_strided_slice %60 {offsets = [0, 256], sizes = [8, 128], strides = [1, 1]} : vector<8x512xf32> to vector<8x128xf32>
    %78 = math.tanh %77 : vector<8x128xf32>
    %79 = vector.extract_strided_slice %60 {offsets = [0, 384], sizes = [8, 128], strides = [1, 1]} : vector<8x512xf32> to vector<8x128xf32>
    %cst_36 = arith.constant 5.000000e-01 : f32
    %80 = vector.broadcast %cst_36 : f32 to vector<8x128xf32>
    %81 = arith.mulf %80, %79 : vector<8x128xf32>
    %82 = math.tanh %81 : vector<8x128xf32>
    %cst_37 = arith.constant 5.000000e-01 : f32
    %83 = vector.broadcast %cst_37 : f32 to vector<8x128xf32>
    %84 = arith.mulf %83, %82 : vector<8x128xf32>
    %cst_38 = arith.constant 5.000000e-01 : f32
    %85 = vector.broadcast %cst_38 : f32 to vector<8x128xf32>
    %86 = arith.addf %84, %85 : vector<8x128xf32>
    %87 = arith.mulf %76, %17 : vector<8x128xf32>
    %88 = arith.mulf %68, %78 : vector<8x128xf32>
    %89 = arith.addf %87, %88 : vector<8x128xf32>
    %90 = math.tanh %89 : vector<8x128xf32>
    %91 = arith.mulf %86, %90 : vector<8x128xf32>
    %c1_i32_39 = arith.constant 1 : i32
    %92 = tpu.memref_slice %arg13[%c1_i32_39] : memref<2x!tpu.dma_semaphore, #tpu.memory_space<semaphore_mem>> -> memref<1x!tpu.dma_semaphore, #tpu.memory_space<semaphore_mem>>
    %93 = tpu.memref_squeeze %92 : memref<1x!tpu.dma_semaphore, #tpu.memory_space<semaphore_mem>> -> memref<!tpu.dma_semaphore, #tpu.memory_space<semaphore_mem>>
    tpu.wait_dma2 semaphore(%93 : memref<!tpu.dma_semaphore, #tpu.memory_space<semaphore_mem>>) src(%arg9 : memref<128x128xf32, #tpu.memory_space<any>>) dst(%arg12 : memref<128x128xf32, #tpu.memory_space<vmem>>)
    %c0_40 = arith.constant 0 : index
    %c0_41 = arith.constant 0 : index
    %94 = vector.load %arg12[%c0_40, %c0_41] : memref<128x128xf32, #tpu.memory_space<vmem>>, vector<128x128xf32>
    %cst_42 = arith.constant dense<0.000000e+00> : vector<8x128xf32>
    %95 = tpu.matmul %91, %94, %cst_42 {dimension_numbers = #tpu.dot_dimension_numbers<[1], [0], [0], [1], [0, 0, 1, 1], [], []>} : vector<8x128xf32>, vector<128x128xf32>, vector<8x128xf32> -> vector<8x128xf32>
    %96 = arith.addf %95, %13 : vector<8x128xf32>
    %97 = arith.addf %96, %18 : vector<8x128xf32>
    %c0_43 = arith.constant 0 : index
    %c0_44 = arith.constant 0 : index
    %c0_45 = arith.constant 0 : index
    %98 = vector.load %arg10[%c0_43, %c0_44, %c0_45] : memref<8x8x128xf32, #tpu.memory_space<vmem>>, vector<1x8x128xf32>
    %99 = vector.shape_cast %98 : vector<1x8x128xf32> to vector<8x128xf32>
    %100 = vector.shape_cast %97 : vector<8x128xf32> to vector<1x8x128xf32>
    tpu.vector_store %arg10[%c0_43, %c0_44, %c0_45], %100 {strides = array<i32>} : memref<8x8x128xf32, #tpu.memory_space<vmem>>, vector<1x8x128xf32>,
    %101 = tpu.concatenate %97, %53 in 1 : vector<8x128xf32>, vector<8x128xf32> -> vector<8x256xf32>
    %102 = arith.truncf %101 : vector<8x256xf32> to vector<8x256xbf16>
    %cst_46 = arith.constant dense<0.000000e+00> : vector<8x512xf32>
    %103 = tpu.matmul %102, %4, %cst_46 {dimension_numbers = #tpu.dot_dimension_numbers<[1], [0], [0], [1], [0, 0, 1, 1], [], []>} : vector<8x256xbf16>, vector<256x512xbf16>, vector<8x512xf32> -> vector<8x512xf32>
    %104 = arith.addf %103, %7 : vector<8x512xf32>
    %105 = vector.extract_strided_slice %104 {offsets = [0, 0], sizes = [8, 128], strides = [1, 1]} : vector<8x512xf32> to vector<8x128xf32>
    %cst_47 = arith.constant 5.000000e-01 : f32
    %106 = vector.broadcast %cst_47 : f32 to vector<8x128xf32>
    %107 = arith.mulf %106, %105 : vector<8x128xf32>
    %108 = math.tanh %107 : vector<8x128xf32>
    %cst_48 = arith.constant 5.000000e-01 : f32
    %109 = vector.broadcast %cst_48 : f32 to vector<8x128xf32>
    %110 = arith.mulf %109, %108 : vector<8x128xf32>
    %cst_49 = arith.constant 5.000000e-01 : f32
    %111 = vector.broadcast %cst_49 : f32 to vector<8x128xf32>
    %112 = arith.addf %110, %111 : vector<8x128xf32>
    %113 = vector.extract_strided_slice %104 {offsets = [0, 128], sizes = [8, 128], strides = [1, 1]} : vector<8x512xf32> to vector<8x128xf32>
    %cst_50 = arith.constant 5.000000e-01 : f32
    %114 = vector.broadcast %cst_50 : f32 to vector<8x128xf32>
    %115 = arith.mulf %114, %113 : vector<8x128xf32>
    %116 = math.tanh %115 : vector<8x128xf32>
    %cst_51 = arith.constant 5.000000e-01 : f32
    %117 = vector.broadcast %cst_51 : f32 to vector<8x128xf32>
    %118 = arith.mulf %117, %116 : vector<8x128xf32>
    %cst_52 = arith.constant 5.000000e-01 : f32
    %119 = vector.broadcast %cst_52 : f32 to vector<8x128xf32>
    %120 = arith.addf %118, %119 : vector<8x128xf32>
    %121 = vector.extract_strided_slice %104 {offsets = [0, 256], sizes = [8, 128], strides = [1, 1]} : vector<8x512xf32> to vector<8x128xf32>
    %122 = math.tanh %121 : vector<8x128xf32>
    %123 = vector.extract_strided_slice %104 {offsets = [0, 384], sizes = [8, 128], strides = [1, 1]} : vector<8x512xf32> to vector<8x128xf32>
    %cst_53 = arith.constant 5.000000e-01 : f32
    %124 = vector.broadcast %cst_53 : f32 to vector<8x128xf32>
    %125 = arith.mulf %124, %123 : vector<8x128xf32>
    %126 = math.tanh %125 : vector<8x128xf32>
    %cst_54 = arith.constant 5.000000e-01 : f32
    %127 = vector.broadcast %cst_54 : f32 to vector<8x128xf32>
    %128 = arith.mulf %127, %126 : vector<8x128xf32>
    %cst_55 = arith.constant 5.000000e-01 : f32
    %129 = vector.broadcast %cst_55 : f32 to vector<8x128xf32>
    %130 = arith.addf %128, %129 : vector<8x128xf32>
    %131 = arith.mulf %120, %51 : vector<8x128xf32>
    %132 = arith.mulf %112, %122 : vector<8x128xf32>
    %133 = arith.addf %131, %132 : vector<8x128xf32>
    %134 = math.tanh %133 : vector<8x128xf32>
    %135 = arith.mulf %130, %134 : vector<8x128xf32>
    %136 = tpu.concatenate %135, %91 in 1 : vector<8x128xf32>, vector<8x128xf32> -> vector<8x256xf32>
    %137 = arith.truncf %136 : vector<8x256xf32> to vector<8x256xbf16>
    %cst_56 = arith.constant dense<0.000000e+00> : vector<8x512xf32>
    %138 = tpu.matmul %137, %56, %cst_56 {dimension_numbers = #tpu.dot_dimension_numbers<[1], [0], [0], [1], [0, 0, 1, 1], [], []>} : vector<8x256xbf16>, vector<256x512xbf16>, vector<8x512xf32> -> vector<8x512xf32>
    %139 = arith.addf %138, %10 : vector<8x512xf32>
    %140 = vector.extract_strided_slice %139 {offsets = [0, 0], sizes = [8, 128], strides = [1, 1]} : vector<8x512xf32> to vector<8x128xf32>
    %cst_57 = arith.constant 5.000000e-01 : f32
    %141 = vector.broadcast %cst_57 : f32 to vector<8x128xf32>
    %142 = arith.mulf %141, %140 : vector<8x128xf32>
    %143 = math.tanh %142 : vector<8x128xf32>
    %cst_58 = arith.constant 5.000000e-01 : f32
    %144 = vector.broadcast %cst_58 : f32 to vector<8x128xf32>
    %145 = arith.mulf %144, %143 : vector<8x128xf32>
    %cst_59 = arith.constant 5.000000e-01 : f32
    %146 = vector.broadcast %cst_59 : f32 to vector<8x128xf32>
    %147 = arith.addf %145, %146 : vector<8x128xf32>
    %148 = vector.extract_strided_slice %139 {offsets = [0, 128], sizes = [8, 128], strides = [1, 1]} : vector<8x512xf32> to vector<8x128xf32>
    %cst_60 = arith.constant 5.000000e-01 : f32
    %149 = vector.broadcast %cst_60 : f32 to vector<8x128xf32>
    %150 = arith.mulf %149, %148 : vector<8x128xf32>
    %151 = math.tanh %150 : vector<8x128xf32>
    %cst_61 = arith.constant 5.000000e-01 : f32
    %152 = vector.broadcast %cst_61 : f32 to vector<8x128xf32>
    %153 = arith.mulf %152, %151 : vector<8x128xf32>
    %cst_62 = arith.constant 5.000000e-01 : f32
    %154 = vector.broadcast %cst_62 : f32 to vector<8x128xf32>
    %155 = arith.addf %153, %154 : vector<8x128xf32>
    %156 = vector.extract_strided_slice %139 {offsets = [0, 256], sizes = [8, 128], strides = [1, 1]} : vector<8x512xf32> to vector<8x128xf32>
    %157 = math.tanh %156 : vector<8x128xf32>
    %158 = vector.extract_strided_slice %139 {offsets = [0, 384], sizes = [8, 128], strides = [1, 1]} : vector<8x512xf32> to vector<8x128xf32>
    %cst_63 = arith.constant 5.000000e-01 : f32
    %159 = vector.broadcast %cst_63 : f32 to vector<8x128xf32>
    %160 = arith.mulf %159, %158 : vector<8x128xf32>
    %161 = math.tanh %160 : vector<8x128xf32>
    %cst_64 = arith.constant 5.000000e-01 : f32
    %162 = vector.broadcast %cst_64 : f32 to vector<8x128xf32>
    %163 = arith.mulf %162, %161 : vector<8x128xf32>
    %cst_65 = arith.constant 5.000000e-01 : f32
    %164 = vector.broadcast %cst_65 : f32 to vector<8x128xf32>
    %165 = arith.addf %163, %164 : vector<8x128xf32>
    %166 = arith.mulf %155, %89 : vector<8x128xf32>
    %167 = arith.mulf %147, %157 : vector<8x128xf32>
    %168 = arith.addf %166, %167 : vector<8x128xf32>
    %169 = math.tanh %168 : vector<8x128xf32>
    %170 = arith.mulf %165, %169 : vector<8x128xf32>
    %cst_66 = arith.constant dense<0.000000e+00> : vector<8x128xf32>
    %171 = tpu.matmul %170, %94, %cst_66 {dimension_numbers = #tpu.dot_dimension_numbers<[1], [0], [0], [1], [0, 0, 1, 1], [], []>} : vector<8x128xf32>, vector<128x128xf32>, vector<8x128xf32> -> vector<8x128xf32>
    %172 = arith.addf %171, %13 : vector<8x128xf32>
    %173 = arith.addf %172, %97 : vector<8x128xf32>
    %c1 = arith.constant 1 : index
    %c0_67 = arith.constant 0 : index
    %c0_68 = arith.constant 0 : index
    %174 = vector.load %arg10[%c1, %c0_67, %c0_68] : memref<8x8x128xf32, #tpu.memory_space<vmem>>, vector<1x8x128xf32>
    %175 = vector.shape_cast %174 : vector<1x8x128xf32> to vector<8x128xf32>
    %176 = vector.shape_cast %173 : vector<8x128xf32> to vector<1x8x128xf32>
    tpu.vector_store %arg10[%c1, %c0_67, %c0_68], %176 {strides = array<i32>} : memref<8x8x128xf32, #tpu.memory_space<vmem>>, vector<1x8x128xf32>,
    %177 = tpu.concatenate %173, %135 in 1 : vector<8x128xf32>, vector<8x128xf32> -> vector<8x256xf32>
    %178 = arith.truncf %177 : vector<8x256xf32> to vector<8x256xbf16>
    %cst_69 = arith.constant dense<0.000000e+00> : vector<8x512xf32>
    %179 = tpu.matmul %178, %4, %cst_69 {dimension_numbers = #tpu.dot_dimension_numbers<[1], [0], [0], [1], [0, 0, 1, 1], [], []>} : vector<8x256xbf16>, vector<256x512xbf16>, vector<8x512xf32> -> vector<8x512xf32>
    %180 = arith.addf %179, %7 : vector<8x512xf32>
    %181 = vector.extract_strided_slice %180 {offsets = [0, 0], sizes = [8, 128], strides = [1, 1]} : vector<8x512xf32> to vector<8x128xf32>
    %cst_70 = arith.constant 5.000000e-01 : f32
    %182 = vector.broadcast %cst_70 : f32 to vector<8x128xf32>
    %183 = arith.mulf %182, %181 : vector<8x128xf32>
    %184 = math.tanh %183 : vector<8x128xf32>
    %cst_71 = arith.constant 5.000000e-01 : f32
    %185 = vector.broadcast %cst_71 : f32 to vector<8x128xf32>
    %186 = arith.mulf %185, %184 : vector<8x128xf32>
    %cst_72 = arith.constant 5.000000e-01 : f32
    %187 = vector.broadcast %cst_72 : f32 to vector<8x128xf32>
    %188 = arith.addf %186, %187 : vector<8x128xf32>
    %189 = vector.extract_strided_slice %180 {offsets = [0, 128], sizes = [8, 128], strides = [1, 1]} : vector<8x512xf32> to vector<8x128xf32>
    %cst_73 = arith.constant 5.000000e-01 : f32
    %190 = vector.broadcast %cst_73 : f32 to vector<8x128xf32>
    %191 = arith.mulf %190, %189 : vector<8x128xf32>
    %192 = math.tanh %191 : vector<8x128xf32>
    %cst_74 = arith.constant 5.000000e-01 : f32
    %193 = vector.broadcast %cst_74 : f32 to vector<8x128xf32>
    %194 = arith.mulf %193, %192 : vector<8x128xf32>
    %cst_75 = arith.constant 5.000000e-01 : f32
    %195 = vector.broadcast %cst_75 : f32 to vector<8x128xf32>
    %196 = arith.addf %194, %195 : vector<8x128xf32>
    %197 = vector.extract_strided_slice %180 {offsets = [0, 256], sizes = [8, 128], strides = [1, 1]} : vector<8x512xf32> to vector<8x128xf32>
    %198 = math.tanh %197 : vector<8x128xf32>
    %199 = vector.extract_strided_slice %180 {offsets = [0, 384], sizes = [8, 128], strides = [1, 1]} : vector<8x512xf32> to vector<8x128xf32>
    %cst_76 = arith.constant 5.000000e-01 : f32
    %200 = vector.broadcast %cst_76 : f32 to vector<8x128xf32>
    %201 = arith.mulf %200, %199 : vector<8x128xf32>
    %202 = math.tanh %201 : vector<8x128xf32>
    %cst_77 = arith.constant 5.000000e-01 : f32
    %203 = vector.broadcast %cst_77 : f32 to vector<8x128xf32>
    %204 = arith.mulf %203, %202 : vector<8x128xf32>
    %cst_78 = arith.constant 5.000000e-01 : f32
    %205 = vector.broadcast %cst_78 : f32 to vector<8x128xf32>
    %206 = arith.addf %204, %205 : vector<8x128xf32>
    %207 = arith.mulf %196, %133 : vector<8x128xf32>
    %208 = arith.mulf %188, %198 : vector<8x128xf32>
    %209 = arith.addf %207, %208 : vector<8x128xf32>
    %210 = math.tanh %209 : vector<8x128xf32>
    %211 = arith.mulf %206, %210 : vector<8x128xf32>
    %212 = tpu.concatenate %211, %170 in 1 : vector<8x128xf32>, vector<8x128xf32> -> vector<8x256xf32>
    %213 = arith.truncf %212 : vector<8x256xf32> to vector<8x256xbf16>
    %cst_79 = arith.constant dense<0.000000e+00> : vector<8x512xf32>
    %214 = tpu.matmul %213, %56, %cst_79 {dimension_numbers = #tpu.dot_dimension_numbers<[1], [0], [0], [1], [0, 0, 1, 1], [], []>} : vector<8x256xbf16>, vector<256x512xbf16>, vector<8x512xf32> -> vector<8x512xf32>
    %215 = arith.addf %214, %10 : vector<8x512xf32>
    %216 = vector.extract_strided_slice %215 {offsets = [0, 0], sizes = [8, 128], strides = [1, 1]} : vector<8x512xf32> to vector<8x128xf32>
    %cst_80 = arith.constant 5.000000e-01 : f32
    %217 = vector.broadcast %cst_80 : f32 to vector<8x128xf32>
    %218 = arith.mulf %217, %216 : vector<8x128xf32>
    %219 = math.tanh %218 : vector<8x128xf32>
    %cst_81 = arith.constant 5.000000e-01 : f32
    %220 = vector.broadcast %cst_81 : f32 to vector<8x128xf32>
    %221 = arith.mulf %220, %219 : vector<8x128xf32>
    %cst_82 = arith.constant 5.000000e-01 : f32
    %222 = vector.broadcast %cst_82 : f32 to vector<8x128xf32>
    %223 = arith.addf %221, %222 : vector<8x128xf32>
    %224 = vector.extract_strided_slice %215 {offsets = [0, 128], sizes = [8, 128], strides = [1, 1]} : vector<8x512xf32> to vector<8x128xf32>
    %cst_83 = arith.constant 5.000000e-01 : f32
    %225 = vector.broadcast %cst_83 : f32 to vector<8x128xf32>
    %226 = arith.mulf %225, %224 : vector<8x128xf32>
    %227 = math.tanh %226 : vector<8x128xf32>
    %cst_84 = arith.constant 5.000000e-01 : f32
    %228 = vector.broadcast %cst_84 : f32 to vector<8x128xf32>
    %229 = arith.mulf %228, %227 : vector<8x128xf32>
    %cst_85 = arith.constant 5.000000e-01 : f32
    %230 = vector.broadcast %cst_85 : f32 to vector<8x128xf32>
    %231 = arith.addf %229, %230 : vector<8x128xf32>
    %232 = vector.extract_strided_slice %215 {offsets = [0, 256], sizes = [8, 128], strides = [1, 1]} : vector<8x512xf32> to vector<8x128xf32>
    %233 = math.tanh %232 : vector<8x128xf32>
    %234 = vector.extract_strided_slice %215 {offsets = [0, 384], sizes = [8, 128], strides = [1, 1]} : vector<8x512xf32> to vector<8x128xf32>
    %cst_86 = arith.constant 5.000000e-01 : f32
    %235 = vector.broadcast %cst_86 : f32 to vector<8x128xf32>
    %236 = arith.mulf %235, %234 : vector<8x128xf32>
    %237 = math.tanh %236 : vector<8x128xf32>
    %cst_87 = arith.constant 5.000000e-01 : f32
    %238 = vector.broadcast %cst_87 : f32 to vector<8x128xf32>
    %239 = arith.mulf %238, %237 : vector<8x128xf32>
    %cst_88 = arith.constant 5.000000e-01 : f32
    %240 = vector.broadcast %cst_88 : f32 to vector<8x128xf32>
    %241 = arith.addf %239, %240 : vector<8x128xf32>
    %242 = arith.mulf %231, %168 : vector<8x128xf32>
    %243 = arith.mulf %223, %233 : vector<8x128xf32>
    %244 = arith.addf %242, %243 : vector<8x128xf32>
    %245 = math.tanh %244 : vector<8x128xf32>
    %246 = arith.mulf %241, %245 : vector<8x128xf32>
    %cst_89 = arith.constant dense<0.000000e+00> : vector<8x128xf32>
    %247 = tpu.matmul %246, %94, %cst_89 {dimension_numbers = #tpu.dot_dimension_numbers<[1], [0], [0], [1], [0, 0, 1, 1], [], []>} : vector<8x128xf32>, vector<128x128xf32>, vector<8x128xf32> -> vector<8x128xf32>
    %248 = arith.addf %247, %13 : vector<8x128xf32>
    %249 = arith.addf %248, %173 : vector<8x128xf32>
    %c2 = arith.constant 2 : index
    %c0_90 = arith.constant 0 : index
    %c0_91 = arith.constant 0 : index
    %250 = vector.load %arg10[%c2, %c0_90, %c0_91] : memref<8x8x128xf32, #tpu.memory_space<vmem>>, vector<1x8x128xf32>
    %251 = vector.shape_cast %250 : vector<1x8x128xf32> to vector<8x128xf32>
    %252 = vector.shape_cast %249 : vector<8x128xf32> to vector<1x8x128xf32>
    tpu.vector_store %arg10[%c2, %c0_90, %c0_91], %252 {strides = array<i32>} : memref<8x8x128xf32, #tpu.memory_space<vmem>>, vector<1x8x128xf32>,
    %253 = tpu.concatenate %249, %211 in 1 : vector<8x128xf32>, vector<8x128xf32> -> vector<8x256xf32>
    %254 = arith.truncf %253 : vector<8x256xf32> to vector<8x256xbf16>
    %cst_92 = arith.constant dense<0.000000e+00> : vector<8x512xf32>
    %255 = tpu.matmul %254, %4, %cst_92 {dimension_numbers = #tpu.dot_dimension_numbers<[1], [0], [0], [1], [0, 0, 1, 1], [], []>} : vector<8x256xbf16>, vector<256x512xbf16>, vector<8x512xf32> -> vector<8x512xf32>
    %256 = arith.addf %255, %7 : vector<8x512xf32>
    %257 = vector.extract_strided_slice %256 {offsets = [0, 0], sizes = [8, 128], strides = [1, 1]} : vector<8x512xf32> to vector<8x128xf32>
    %cst_93 = arith.constant 5.000000e-01 : f32
    %258 = vector.broadcast %cst_93 : f32 to vector<8x128xf32>
    %259 = arith.mulf %258, %257 : vector<8x128xf32>
    %260 = math.tanh %259 : vector<8x128xf32>
    %cst_94 = arith.constant 5.000000e-01 : f32
    %261 = vector.broadcast %cst_94 : f32 to vector<8x128xf32>
    %262 = arith.mulf %261, %260 : vector<8x128xf32>
    %cst_95 = arith.constant 5.000000e-01 : f32
    %263 = vector.broadcast %cst_95 : f32 to vector<8x128xf32>
    %264 = arith.addf %262, %263 : vector<8x128xf32>
    %265 = vector.extract_strided_slice %256 {offsets = [0, 128], sizes = [8, 128], strides = [1, 1]} : vector<8x512xf32> to vector<8x128xf32>
    %cst_96 = arith.constant 5.000000e-01 : f32
    %266 = vector.broadcast %cst_96 : f32 to vector<8x128xf32>
    %267 = arith.mulf %266, %265 : vector<8x128xf32>
    %268 = math.tanh %267 : vector<8x128xf32>
    %cst_97 = arith.constant 5.000000e-01 : f32
    %269 = vector.broadcast %cst_97 : f32 to vector<8x128xf32>
    %270 = arith.mulf %269, %268 : vector<8x128xf32>
    %cst_98 = arith.constant 5.000000e-01 : f32
    %271 = vector.broadcast %cst_98 : f32 to vector<8x128xf32>
    %272 = arith.addf %270, %271 : vector<8x128xf32>
    %273 = vector.extract_strided_slice %256 {offsets = [0, 256], sizes = [8, 128], strides = [1, 1]} : vector<8x512xf32> to vector<8x128xf32>
    %274 = math.tanh %273 : vector<8x128xf32>
    %275 = vector.extract_strided_slice %256 {offsets = [0, 384], sizes = [8, 128], strides = [1, 1]} : vector<8x512xf32> to vector<8x128xf32>
    %cst_99 = arith.constant 5.000000e-01 : f32
    %276 = vector.broadcast %cst_99 : f32 to vector<8x128xf32>
    %277 = arith.mulf %276, %275 : vector<8x128xf32>
    %278 = math.tanh %277 : vector<8x128xf32>
    %cst_100 = arith.constant 5.000000e-01 : f32
    %279 = vector.broadcast %cst_100 : f32 to vector<8x128xf32>
    %280 = arith.mulf %279, %278 : vector<8x128xf32>
    %cst_101 = arith.constant 5.000000e-01 : f32
    %281 = vector.broadcast %cst_101 : f32 to vector<8x128xf32>
    %282 = arith.addf %280, %281 : vector<8x128xf32>
    %283 = arith.mulf %272, %209 : vector<8x128xf32>
    %284 = arith.mulf %264, %274 : vector<8x128xf32>
    %285 = arith.addf %283, %284 : vector<8x128xf32>
    %286 = math.tanh %285 : vector<8x128xf32>
    %287 = arith.mulf %282, %286 : vector<8x128xf32>
    %288 = tpu.concatenate %287, %246 in 1 : vector<8x128xf32>, vector<8x128xf32> -> vector<8x256xf32>
    %289 = arith.truncf %288 : vector<8x256xf32> to vector<8x256xbf16>
    %cst_102 = arith.constant dense<0.000000e+00> : vector<8x512xf32>
    %290 = tpu.matmul %289, %56, %cst_102 {dimension_numbers = #tpu.dot_dimension_numbers<[1], [0], [0], [1], [0, 0, 1, 1], [], []>} : vector<8x256xbf16>, vector<256x512xbf16>, vector<8x512xf32> -> vector<8x512xf32>
    %291 = arith.addf %290, %10 : vector<8x512xf32>
    %292 = vector.extract_strided_slice %291 {offsets = [0, 0], sizes = [8, 128], strides = [1, 1]} : vector<8x512xf32> to vector<8x128xf32>
    %cst_103 = arith.constant 5.000000e-01 : f32
    %293 = vector.broadcast %cst_103 : f32 to vector<8x128xf32>
    %294 = arith.mulf %293, %292 : vector<8x128xf32>
    %295 = math.tanh %294 : vector<8x128xf32>
    %cst_104 = arith.constant 5.000000e-01 : f32
    %296 = vector.broadcast %cst_104 : f32 to vector<8x128xf32>
    %297 = arith.mulf %296, %295 : vector<8x128xf32>
    %cst_105 = arith.constant 5.000000e-01 : f32
    %298 = vector.broadcast %cst_105 : f32 to vector<8x128xf32>
    %299 = arith.addf %297, %298 : vector<8x128xf32>
    %300 = vector.extract_strided_slice %291 {offsets = [0, 128], sizes = [8, 128], strides = [1, 1]} : vector<8x512xf32> to vector<8x128xf32>
    %cst_106 = arith.constant 5.000000e-01 : f32
    %301 = vector.broadcast %cst_106 : f32 to vector<8x128xf32>
    %302 = arith.mulf %301, %300 : vector<8x128xf32>
    %303 = math.tanh %302 : vector<8x128xf32>
    %cst_107 = arith.constant 5.000000e-01 : f32
    %304 = vector.broadcast %cst_107 : f32 to vector<8x128xf32>
    %305 = arith.mulf %304, %303 : vector<8x128xf32>
    %cst_108 = arith.constant 5.000000e-01 : f32
    %306 = vector.broadcast %cst_108 : f32 to vector<8x128xf32>
    %307 = arith.addf %305, %306 : vector<8x128xf32>
    %308 = vector.extract_strided_slice %291 {offsets = [0, 256], sizes = [8, 128], strides = [1, 1]} : vector<8x512xf32> to vector<8x128xf32>
    %309 = math.tanh %308 : vector<8x128xf32>
    %310 = vector.extract_strided_slice %291 {offsets = [0, 384], sizes = [8, 128], strides = [1, 1]} : vector<8x512xf32> to vector<8x128xf32>
    %cst_109 = arith.constant 5.000000e-01 : f32
    %311 = vector.broadcast %cst_109 : f32 to vector<8x128xf32>
    %312 = arith.mulf %311, %310 : vector<8x128xf32>
    %313 = math.tanh %312 : vector<8x128xf32>
    %cst_110 = arith.constant 5.000000e-01 : f32
    %314 = vector.broadcast %cst_110 : f32 to vector<8x128xf32>
    %315 = arith.mulf %314, %313 : vector<8x128xf32>
    %cst_111 = arith.constant 5.000000e-01 : f32
    %316 = vector.broadcast %cst_111 : f32 to vector<8x128xf32>
    %317 = arith.addf %315, %316 : vector<8x128xf32>
    %318 = arith.mulf %307, %244 : vector<8x128xf32>
    %319 = arith.mulf %299, %309 : vector<8x128xf32>
    %320 = arith.addf %318, %319 : vector<8x128xf32>
    %321 = math.tanh %320 : vector<8x128xf32>
    %322 = arith.mulf %317, %321 : vector<8x128xf32>
    %cst_112 = arith.constant dense<0.000000e+00> : vector<8x128xf32>
    %323 = tpu.matmul %322, %94, %cst_112 {dimension_numbers = #tpu.dot_dimension_numbers<[1], [0], [0], [1], [0, 0, 1, 1], [], []>} : vector<8x128xf32>, vector<128x128xf32>, vector<8x128xf32> -> vector<8x128xf32>
    %324 = arith.addf %323, %13 : vector<8x128xf32>
    %325 = arith.addf %324, %249 : vector<8x128xf32>
    %c3 = arith.constant 3 : index
    %c0_113 = arith.constant 0 : index
    %c0_114 = arith.constant 0 : index
    %326 = vector.load %arg10[%c3, %c0_113, %c0_114] : memref<8x8x128xf32, #tpu.memory_space<vmem>>, vector<1x8x128xf32>
    %327 = vector.shape_cast %326 : vector<1x8x128xf32> to vector<8x128xf32>
    %328 = vector.shape_cast %325 : vector<8x128xf32> to vector<1x8x128xf32>
    tpu.vector_store %arg10[%c3, %c0_113, %c0_114], %328 {strides = array<i32>} : memref<8x8x128xf32, #tpu.memory_space<vmem>>, vector<1x8x128xf32>,
    %329 = tpu.concatenate %325, %287 in 1 : vector<8x128xf32>, vector<8x128xf32> -> vector<8x256xf32>
    %330 = arith.truncf %329 : vector<8x256xf32> to vector<8x256xbf16>
    %cst_115 = arith.constant dense<0.000000e+00> : vector<8x512xf32>
    %331 = tpu.matmul %330, %4, %cst_115 {dimension_numbers = #tpu.dot_dimension_numbers<[1], [0], [0], [1], [0, 0, 1, 1], [], []>} : vector<8x256xbf16>, vector<256x512xbf16>, vector<8x512xf32> -> vector<8x512xf32>
    %332 = arith.addf %331, %7 : vector<8x512xf32>
    %333 = vector.extract_strided_slice %332 {offsets = [0, 0], sizes = [8, 128], strides = [1, 1]} : vector<8x512xf32> to vector<8x128xf32>
    %cst_116 = arith.constant 5.000000e-01 : f32
    %334 = vector.broadcast %cst_116 : f32 to vector<8x128xf32>
    %335 = arith.mulf %334, %333 : vector<8x128xf32>
    %336 = math.tanh %335 : vector<8x128xf32>
    %cst_117 = arith.constant 5.000000e-01 : f32
    %337 = vector.broadcast %cst_117 : f32 to vector<8x128xf32>
    %338 = arith.mulf %337, %336 : vector<8x128xf32>
    %cst_118 = arith.constant 5.000000e-01 : f32
    %339 = vector.broadcast %cst_118 : f32 to vector<8x128xf32>
    %340 = arith.addf %338, %339 : vector<8x128xf32>
    %341 = vector.extract_strided_slice %332 {offsets = [0, 128], sizes = [8, 128], strides = [1, 1]} : vector<8x512xf32> to vector<8x128xf32>
    %cst_119 = arith.constant 5.000000e-01 : f32
    %342 = vector.broadcast %cst_119 : f32 to vector<8x128xf32>
    %343 = arith.mulf %342, %341 : vector<8x128xf32>
    %344 = math.tanh %343 : vector<8x128xf32>
    %cst_120 = arith.constant 5.000000e-01 : f32
    %345 = vector.broadcast %cst_120 : f32 to vector<8x128xf32>
    %346 = arith.mulf %345, %344 : vector<8x128xf32>
    %cst_121 = arith.constant 5.000000e-01 : f32
    %347 = vector.broadcast %cst_121 : f32 to vector<8x128xf32>
    %348 = arith.addf %346, %347 : vector<8x128xf32>
    %349 = vector.extract_strided_slice %332 {offsets = [0, 256], sizes = [8, 128], strides = [1, 1]} : vector<8x512xf32> to vector<8x128xf32>
    %350 = math.tanh %349 : vector<8x128xf32>
    %351 = vector.extract_strided_slice %332 {offsets = [0, 384], sizes = [8, 128], strides = [1, 1]} : vector<8x512xf32> to vector<8x128xf32>
    %cst_122 = arith.constant 5.000000e-01 : f32
    %352 = vector.broadcast %cst_122 : f32 to vector<8x128xf32>
    %353 = arith.mulf %352, %351 : vector<8x128xf32>
    %354 = math.tanh %353 : vector<8x128xf32>
    %cst_123 = arith.constant 5.000000e-01 : f32
    %355 = vector.broadcast %cst_123 : f32 to vector<8x128xf32>
    %356 = arith.mulf %355, %354 : vector<8x128xf32>
    %cst_124 = arith.constant 5.000000e-01 : f32
    %357 = vector.broadcast %cst_124 : f32 to vector<8x128xf32>
    %358 = arith.addf %356, %357 : vector<8x128xf32>
    %359 = arith.mulf %348, %285 : vector<8x128xf32>
    %360 = arith.mulf %340, %350 : vector<8x128xf32>
    %361 = arith.addf %359, %360 : vector<8x128xf32>
    %362 = math.tanh %361 : vector<8x128xf32>
    %363 = arith.mulf %358, %362 : vector<8x128xf32>
    %364 = tpu.concatenate %363, %322 in 1 : vector<8x128xf32>, vector<8x128xf32> -> vector<8x256xf32>
    %365 = arith.truncf %364 : vector<8x256xf32> to vector<8x256xbf16>
    %cst_125 = arith.constant dense<0.000000e+00> : vector<8x512xf32>
    %366 = tpu.matmul %365, %56, %cst_125 {dimension_numbers = #tpu.dot_dimension_numbers<[1], [0], [0], [1], [0, 0, 1, 1], [], []>} : vector<8x256xbf16>, vector<256x512xbf16>, vector<8x512xf32> -> vector<8x512xf32>
    %367 = arith.addf %366, %10 : vector<8x512xf32>
    %368 = vector.extract_strided_slice %367 {offsets = [0, 0], sizes = [8, 128], strides = [1, 1]} : vector<8x512xf32> to vector<8x128xf32>
    %cst_126 = arith.constant 5.000000e-01 : f32
    %369 = vector.broadcast %cst_126 : f32 to vector<8x128xf32>
    %370 = arith.mulf %369, %368 : vector<8x128xf32>
    %371 = math.tanh %370 : vector<8x128xf32>
    %cst_127 = arith.constant 5.000000e-01 : f32
    %372 = vector.broadcast %cst_127 : f32 to vector<8x128xf32>
    %373 = arith.mulf %372, %371 : vector<8x128xf32>
    %cst_128 = arith.constant 5.000000e-01 : f32
    %374 = vector.broadcast %cst_128 : f32 to vector<8x128xf32>
    %375 = arith.addf %373, %374 : vector<8x128xf32>
    %376 = vector.extract_strided_slice %367 {offsets = [0, 128], sizes = [8, 128], strides = [1, 1]} : vector<8x512xf32> to vector<8x128xf32>
    %cst_129 = arith.constant 5.000000e-01 : f32
    %377 = vector.broadcast %cst_129 : f32 to vector<8x128xf32>
    %378 = arith.mulf %377, %376 : vector<8x128xf32>
    %379 = math.tanh %378 : vector<8x128xf32>
    %cst_130 = arith.constant 5.000000e-01 : f32
    %380 = vector.broadcast %cst_130 : f32 to vector<8x128xf32>
    %381 = arith.mulf %380, %379 : vector<8x128xf32>
    %cst_131 = arith.constant 5.000000e-01 : f32
    %382 = vector.broadcast %cst_131 : f32 to vector<8x128xf32>
    %383 = arith.addf %381, %382 : vector<8x128xf32>
    %384 = vector.extract_strided_slice %367 {offsets = [0, 256], sizes = [8, 128], strides = [1, 1]} : vector<8x512xf32> to vector<8x128xf32>
    %385 = math.tanh %384 : vector<8x128xf32>
    %386 = vector.extract_strided_slice %367 {offsets = [0, 384], sizes = [8, 128], strides = [1, 1]} : vector<8x512xf32> to vector<8x128xf32>
    %cst_132 = arith.constant 5.000000e-01 : f32
    %387 = vector.broadcast %cst_132 : f32 to vector<8x128xf32>
    %388 = arith.mulf %387, %386 : vector<8x128xf32>
    %389 = math.tanh %388 : vector<8x128xf32>
    %cst_133 = arith.constant 5.000000e-01 : f32
    %390 = vector.broadcast %cst_133 : f32 to vector<8x128xf32>
    %391 = arith.mulf %390, %389 : vector<8x128xf32>
    %cst_134 = arith.constant 5.000000e-01 : f32
    %392 = vector.broadcast %cst_134 : f32 to vector<8x128xf32>
    %393 = arith.addf %391, %392 : vector<8x128xf32>
    %394 = arith.mulf %383, %320 : vector<8x128xf32>
    %395 = arith.mulf %375, %385 : vector<8x128xf32>
    %396 = arith.addf %394, %395 : vector<8x128xf32>
    %397 = math.tanh %396 : vector<8x128xf32>
    %398 = arith.mulf %393, %397 : vector<8x128xf32>
    %cst_135 = arith.constant dense<0.000000e+00> : vector<8x128xf32>
    %399 = tpu.matmul %398, %94, %cst_135 {dimension_numbers = #tpu.dot_dimension_numbers<[1], [0], [0], [1], [0, 0, 1, 1], [], []>} : vector<8x128xf32>, vector<128x128xf32>, vector<8x128xf32> -> vector<8x128xf32>
    %400 = arith.addf %399, %13 : vector<8x128xf32>
    %401 = arith.addf %400, %325 : vector<8x128xf32>
    %c4 = arith.constant 4 : index
    %c0_136 = arith.constant 0 : index
    %c0_137 = arith.constant 0 : index
    %402 = vector.load %arg10[%c4, %c0_136, %c0_137] : memref<8x8x128xf32, #tpu.memory_space<vmem>>, vector<1x8x128xf32>
    %403 = vector.shape_cast %402 : vector<1x8x128xf32> to vector<8x128xf32>
    %404 = vector.shape_cast %401 : vector<8x128xf32> to vector<1x8x128xf32>
    tpu.vector_store %arg10[%c4, %c0_136, %c0_137], %404 {strides = array<i32>} : memref<8x8x128xf32, #tpu.memory_space<vmem>>, vector<1x8x128xf32>,
    %405 = tpu.concatenate %401, %363 in 1 : vector<8x128xf32>, vector<8x128xf32> -> vector<8x256xf32>
    %406 = arith.truncf %405 : vector<8x256xf32> to vector<8x256xbf16>
    %cst_138 = arith.constant dense<0.000000e+00> : vector<8x512xf32>
    %407 = tpu.matmul %406, %4, %cst_138 {dimension_numbers = #tpu.dot_dimension_numbers<[1], [0], [0], [1], [0, 0, 1, 1], [], []>} : vector<8x256xbf16>, vector<256x512xbf16>, vector<8x512xf32> -> vector<8x512xf32>
    %408 = arith.addf %407, %7 : vector<8x512xf32>
    %409 = vector.extract_strided_slice %408 {offsets = [0, 0], sizes = [8, 128], strides = [1, 1]} : vector<8x512xf32> to vector<8x128xf32>
    %cst_139 = arith.constant 5.000000e-01 : f32
    %410 = vector.broadcast %cst_139 : f32 to vector<8x128xf32>
    %411 = arith.mulf %410, %409 : vector<8x128xf32>
    %412 = math.tanh %411 : vector<8x128xf32>
    %cst_140 = arith.constant 5.000000e-01 : f32
    %413 = vector.broadcast %cst_140 : f32 to vector<8x128xf32>
    %414 = arith.mulf %413, %412 : vector<8x128xf32>
    %cst_141 = arith.constant 5.000000e-01 : f32
    %415 = vector.broadcast %cst_141 : f32 to vector<8x128xf32>
    %416 = arith.addf %414, %415 : vector<8x128xf32>
    %417 = vector.extract_strided_slice %408 {offsets = [0, 128], sizes = [8, 128], strides = [1, 1]} : vector<8x512xf32> to vector<8x128xf32>
    %cst_142 = arith.constant 5.000000e-01 : f32
    %418 = vector.broadcast %cst_142 : f32 to vector<8x128xf32>
    %419 = arith.mulf %418, %417 : vector<8x128xf32>
    %420 = math.tanh %419 : vector<8x128xf32>
    %cst_143 = arith.constant 5.000000e-01 : f32
    %421 = vector.broadcast %cst_143 : f32 to vector<8x128xf32>
    %422 = arith.mulf %421, %420 : vector<8x128xf32>
    %cst_144 = arith.constant 5.000000e-01 : f32
    %423 = vector.broadcast %cst_144 : f32 to vector<8x128xf32>
    %424 = arith.addf %422, %423 : vector<8x128xf32>
    %425 = vector.extract_strided_slice %408 {offsets = [0, 256], sizes = [8, 128], strides = [1, 1]} : vector<8x512xf32> to vector<8x128xf32>
    %426 = math.tanh %425 : vector<8x128xf32>
    %427 = vector.extract_strided_slice %408 {offsets = [0, 384], sizes = [8, 128], strides = [1, 1]} : vector<8x512xf32> to vector<8x128xf32>
    %cst_145 = arith.constant 5.000000e-01 : f32
    %428 = vector.broadcast %cst_145 : f32 to vector<8x128xf32>
    %429 = arith.mulf %428, %427 : vector<8x128xf32>
    %430 = math.tanh %429 : vector<8x128xf32>
    %cst_146 = arith.constant 5.000000e-01 : f32
    %431 = vector.broadcast %cst_146 : f32 to vector<8x128xf32>
    %432 = arith.mulf %431, %430 : vector<8x128xf32>
    %cst_147 = arith.constant 5.000000e-01 : f32
    %433 = vector.broadcast %cst_147 : f32 to vector<8x128xf32>
    %434 = arith.addf %432, %433 : vector<8x128xf32>
    %435 = arith.mulf %424, %361 : vector<8x128xf32>
    %436 = arith.mulf %416, %426 : vector<8x128xf32>
    %437 = arith.addf %435, %436 : vector<8x128xf32>
    %438 = math.tanh %437 : vector<8x128xf32>
    %439 = arith.mulf %434, %438 : vector<8x128xf32>
    %440 = tpu.concatenate %439, %398 in 1 : vector<8x128xf32>, vector<8x128xf32> -> vector<8x256xf32>
    %441 = arith.truncf %440 : vector<8x256xf32> to vector<8x256xbf16>
    %cst_148 = arith.constant dense<0.000000e+00> : vector<8x512xf32>
    %442 = tpu.matmul %441, %56, %cst_148 {dimension_numbers = #tpu.dot_dimension_numbers<[1], [0], [0], [1], [0, 0, 1, 1], [], []>} : vector<8x256xbf16>, vector<256x512xbf16>, vector<8x512xf32> -> vector<8x512xf32>
    %443 = arith.addf %442, %10 : vector<8x512xf32>
    %444 = vector.extract_strided_slice %443 {offsets = [0, 0], sizes = [8, 128], strides = [1, 1]} : vector<8x512xf32> to vector<8x128xf32>
    %cst_149 = arith.constant 5.000000e-01 : f32
    %445 = vector.broadcast %cst_149 : f32 to vector<8x128xf32>
    %446 = arith.mulf %445, %444 : vector<8x128xf32>
    %447 = math.tanh %446 : vector<8x128xf32>
    %cst_150 = arith.constant 5.000000e-01 : f32
    %448 = vector.broadcast %cst_150 : f32 to vector<8x128xf32>
    %449 = arith.mulf %448, %447 : vector<8x128xf32>
    %cst_151 = arith.constant 5.000000e-01 : f32
    %450 = vector.broadcast %cst_151 : f32 to vector<8x128xf32>
    %451 = arith.addf %449, %450 : vector<8x128xf32>
    %452 = vector.extract_strided_slice %443 {offsets = [0, 128], sizes = [8, 128], strides = [1, 1]} : vector<8x512xf32> to vector<8x128xf32>
    %cst_152 = arith.constant 5.000000e-01 : f32
    %453 = vector.broadcast %cst_152 : f32 to vector<8x128xf32>
    %454 = arith.mulf %453, %452 : vector<8x128xf32>
    %455 = math.tanh %454 : vector<8x128xf32>
    %cst_153 = arith.constant 5.000000e-01 : f32
    %456 = vector.broadcast %cst_153 : f32 to vector<8x128xf32>
    %457 = arith.mulf %456, %455 : vector<8x128xf32>
    %cst_154 = arith.constant 5.000000e-01 : f32
    %458 = vector.broadcast %cst_154 : f32 to vector<8x128xf32>
    %459 = arith.addf %457, %458 : vector<8x128xf32>
    %460 = vector.extract_strided_slice %443 {offsets = [0, 256], sizes = [8, 128], strides = [1, 1]} : vector<8x512xf32> to vector<8x128xf32>
    %461 = math.tanh %460 : vector<8x128xf32>
    %462 = vector.extract_strided_slice %443 {offsets = [0, 384], sizes = [8, 128], strides = [1, 1]} : vector<8x512xf32> to vector<8x128xf32>
    %cst_155 = arith.constant 5.000000e-01 : f32
    %463 = vector.broadcast %cst_155 : f32 to vector<8x128xf32>
    %464 = arith.mulf %463, %462 : vector<8x128xf32>
    %465 = math.tanh %464 : vector<8x128xf32>
    %cst_156 = arith.constant 5.000000e-01 : f32
    %466 = vector.broadcast %cst_156 : f32 to vector<8x128xf32>
    %467 = arith.mulf %466, %465 : vector<8x128xf32>
    %cst_157 = arith.constant 5.000000e-01 : f32
    %468 = vector.broadcast %cst_157 : f32 to vector<8x128xf32>
    %469 = arith.addf %467, %468 : vector<8x128xf32>
    %470 = arith.mulf %459, %396 : vector<8x128xf32>
    %471 = arith.mulf %451, %461 : vector<8x128xf32>
    %472 = arith.addf %470, %471 : vector<8x128xf32>
    %473 = math.tanh %472 : vector<8x128xf32>
    %474 = arith.mulf %469, %473 : vector<8x128xf32>
    %cst_158 = arith.constant dense<0.000000e+00> : vector<8x128xf32>
    %475 = tpu.matmul %474, %94, %cst_158 {dimension_numbers = #tpu.dot_dimension_numbers<[1], [0], [0], [1], [0, 0, 1, 1], [], []>} : vector<8x128xf32>, vector<128x128xf32>, vector<8x128xf32> -> vector<8x128xf32>
    %476 = arith.addf %475, %13 : vector<8x128xf32>
    %477 = arith.addf %476, %401 : vector<8x128xf32>
    %c5 = arith.constant 5 : index
    %c0_159 = arith.constant 0 : index
    %c0_160 = arith.constant 0 : index
    %478 = vector.load %arg10[%c5, %c0_159, %c0_160] : memref<8x8x128xf32, #tpu.memory_space<vmem>>, vector<1x8x128xf32>
    %479 = vector.shape_cast %478 : vector<1x8x128xf32> to vector<8x128xf32>
    %480 = vector.shape_cast %477 : vector<8x128xf32> to vector<1x8x128xf32>
    tpu.vector_store %arg10[%c5, %c0_159, %c0_160], %480 {strides = array<i32>} : memref<8x8x128xf32, #tpu.memory_space<vmem>>, vector<1x8x128xf32>,
    %481 = tpu.concatenate %477, %439 in 1 : vector<8x128xf32>, vector<8x128xf32> -> vector<8x256xf32>
    %482 = arith.truncf %481 : vector<8x256xf32> to vector<8x256xbf16>
    %cst_161 = arith.constant dense<0.000000e+00> : vector<8x512xf32>
    %483 = tpu.matmul %482, %4, %cst_161 {dimension_numbers = #tpu.dot_dimension_numbers<[1], [0], [0], [1], [0, 0, 1, 1], [], []>} : vector<8x256xbf16>, vector<256x512xbf16>, vector<8x512xf32> -> vector<8x512xf32>
    %484 = arith.addf %483, %7 : vector<8x512xf32>
    %485 = vector.extract_strided_slice %484 {offsets = [0, 0], sizes = [8, 128], strides = [1, 1]} : vector<8x512xf32> to vector<8x128xf32>
    %cst_162 = arith.constant 5.000000e-01 : f32
    %486 = vector.broadcast %cst_162 : f32 to vector<8x128xf32>
    %487 = arith.mulf %486, %485 : vector<8x128xf32>
    %488 = math.tanh %487 : vector<8x128xf32>
    %cst_163 = arith.constant 5.000000e-01 : f32
    %489 = vector.broadcast %cst_163 : f32 to vector<8x128xf32>
    %490 = arith.mulf %489, %488 : vector<8x128xf32>
    %cst_164 = arith.constant 5.000000e-01 : f32
    %491 = vector.broadcast %cst_164 : f32 to vector<8x128xf32>
    %492 = arith.addf %490, %491 : vector<8x128xf32>
    %493 = vector.extract_strided_slice %484 {offsets = [0, 128], sizes = [8, 128], strides = [1, 1]} : vector<8x512xf32> to vector<8x128xf32>
    %cst_165 = arith.constant 5.000000e-01 : f32
    %494 = vector.broadcast %cst_165 : f32 to vector<8x128xf32>
    %495 = arith.mulf %494, %493 : vector<8x128xf32>
    %496 = math.tanh %495 : vector<8x128xf32>
    %cst_166 = arith.constant 5.000000e-01 : f32
    %497 = vector.broadcast %cst_166 : f32 to vector<8x128xf32>
    %498 = arith.mulf %497, %496 : vector<8x128xf32>
    %cst_167 = arith.constant 5.000000e-01 : f32
    %499 = vector.broadcast %cst_167 : f32 to vector<8x128xf32>
    %500 = arith.addf %498, %499 : vector<8x128xf32>
    %501 = vector.extract_strided_slice %484 {offsets = [0, 256], sizes = [8, 128], strides = [1, 1]} : vector<8x512xf32> to vector<8x128xf32>
    %502 = math.tanh %501 : vector<8x128xf32>
    %503 = vector.extract_strided_slice %484 {offsets = [0, 384], sizes = [8, 128], strides = [1, 1]} : vector<8x512xf32> to vector<8x128xf32>
    %cst_168 = arith.constant 5.000000e-01 : f32
    %504 = vector.broadcast %cst_168 : f32 to vector<8x128xf32>
    %505 = arith.mulf %504, %503 : vector<8x128xf32>
    %506 = math.tanh %505 : vector<8x128xf32>
    %cst_169 = arith.constant 5.000000e-01 : f32
    %507 = vector.broadcast %cst_169 : f32 to vector<8x128xf32>
    %508 = arith.mulf %507, %506 : vector<8x128xf32>
    %cst_170 = arith.constant 5.000000e-01 : f32
    %509 = vector.broadcast %cst_170 : f32 to vector<8x128xf32>
    %510 = arith.addf %508, %509 : vector<8x128xf32>
    %511 = arith.mulf %500, %437 : vector<8x128xf32>
    %512 = arith.mulf %492, %502 : vector<8x128xf32>
    %513 = arith.addf %511, %512 : vector<8x128xf32>
    %514 = math.tanh %513 : vector<8x128xf32>
    %515 = arith.mulf %510, %514 : vector<8x128xf32>
    %516 = tpu.concatenate %515, %474 in 1 : vector<8x128xf32>, vector<8x128xf32> -> vector<8x256xf32>
    %517 = arith.truncf %516 : vector<8x256xf32> to vector<8x256xbf16>
    %cst_171 = arith.constant dense<0.000000e+00> : vector<8x512xf32>
    %518 = tpu.matmul %517, %56, %cst_171 {dimension_numbers = #tpu.dot_dimension_numbers<[1], [0], [0], [1], [0, 0, 1, 1], [], []>} : vector<8x256xbf16>, vector<256x512xbf16>, vector<8x512xf32> -> vector<8x512xf32>
    %519 = arith.addf %518, %10 : vector<8x512xf32>
    %520 = vector.extract_strided_slice %519 {offsets = [0, 0], sizes = [8, 128], strides = [1, 1]} : vector<8x512xf32> to vector<8x128xf32>
    %cst_172 = arith.constant 5.000000e-01 : f32
    %521 = vector.broadcast %cst_172 : f32 to vector<8x128xf32>
    %522 = arith.mulf %521, %520 : vector<8x128xf32>
    %523 = math.tanh %522 : vector<8x128xf32>
    %cst_173 = arith.constant 5.000000e-01 : f32
    %524 = vector.broadcast %cst_173 : f32 to vector<8x128xf32>
    %525 = arith.mulf %524, %523 : vector<8x128xf32>
    %cst_174 = arith.constant 5.000000e-01 : f32
    %526 = vector.broadcast %cst_174 : f32 to vector<8x128xf32>
    %527 = arith.addf %525, %526 : vector<8x128xf32>
    %528 = vector.extract_strided_slice %519 {offsets = [0, 128], sizes = [8, 128], strides = [1, 1]} : vector<8x512xf32> to vector<8x128xf32>
    %cst_175 = arith.constant 5.000000e-01 : f32
    %529 = vector.broadcast %cst_175 : f32 to vector<8x128xf32>
    %530 = arith.mulf %529, %528 : vector<8x128xf32>
    %531 = math.tanh %530 : vector<8x128xf32>
    %cst_176 = arith.constant 5.000000e-01 : f32
    %532 = vector.broadcast %cst_176 : f32 to vector<8x128xf32>
    %533 = arith.mulf %532, %531 : vector<8x128xf32>
    %cst_177 = arith.constant 5.000000e-01 : f32
    %534 = vector.broadcast %cst_177 : f32 to vector<8x128xf32>
    %535 = arith.addf %533, %534 : vector<8x128xf32>
    %536 = vector.extract_strided_slice %519 {offsets = [0, 256], sizes = [8, 128], strides = [1, 1]} : vector<8x512xf32> to vector<8x128xf32>
    %537 = math.tanh %536 : vector<8x128xf32>
    %538 = vector.extract_strided_slice %519 {offsets = [0, 384], sizes = [8, 128], strides = [1, 1]} : vector<8x512xf32> to vector<8x128xf32>
    %cst_178 = arith.constant 5.000000e-01 : f32
    %539 = vector.broadcast %cst_178 : f32 to vector<8x128xf32>
    %540 = arith.mulf %539, %538 : vector<8x128xf32>
    %541 = math.tanh %540 : vector<8x128xf32>
    %cst_179 = arith.constant 5.000000e-01 : f32
    %542 = vector.broadcast %cst_179 : f32 to vector<8x128xf32>
    %543 = arith.mulf %542, %541 : vector<8x128xf32>
    %cst_180 = arith.constant 5.000000e-01 : f32
    %544 = vector.broadcast %cst_180 : f32 to vector<8x128xf32>
    %545 = arith.addf %543, %544 : vector<8x128xf32>
    %546 = arith.mulf %535, %472 : vector<8x128xf32>
    %547 = arith.mulf %527, %537 : vector<8x128xf32>
    %548 = arith.addf %546, %547 : vector<8x128xf32>
    %549 = math.tanh %548 : vector<8x128xf32>
    %550 = arith.mulf %545, %549 : vector<8x128xf32>
    %cst_181 = arith.constant dense<0.000000e+00> : vector<8x128xf32>
    %551 = tpu.matmul %550, %94, %cst_181 {dimension_numbers = #tpu.dot_dimension_numbers<[1], [0], [0], [1], [0, 0, 1, 1], [], []>} : vector<8x128xf32>, vector<128x128xf32>, vector<8x128xf32> -> vector<8x128xf32>
    %552 = arith.addf %551, %13 : vector<8x128xf32>
    %553 = arith.addf %552, %477 : vector<8x128xf32>
    %c6 = arith.constant 6 : index
    %c0_182 = arith.constant 0 : index
    %c0_183 = arith.constant 0 : index
    %554 = vector.load %arg10[%c6, %c0_182, %c0_183] : memref<8x8x128xf32, #tpu.memory_space<vmem>>, vector<1x8x128xf32>
    %555 = vector.shape_cast %554 : vector<1x8x128xf32> to vector<8x128xf32>
    %556 = vector.shape_cast %553 : vector<8x128xf32> to vector<1x8x128xf32>
    tpu.vector_store %arg10[%c6, %c0_182, %c0_183], %556 {strides = array<i32>} : memref<8x8x128xf32, #tpu.memory_space<vmem>>, vector<1x8x128xf32>,
    %557 = tpu.concatenate %553, %515 in 1 : vector<8x128xf32>, vector<8x128xf32> -> vector<8x256xf32>
    %558 = arith.truncf %557 : vector<8x256xf32> to vector<8x256xbf16>
    %cst_184 = arith.constant dense<0.000000e+00> : vector<8x512xf32>
    %559 = tpu.matmul %558, %4, %cst_184 {dimension_numbers = #tpu.dot_dimension_numbers<[1], [0], [0], [1], [0, 0, 1, 1], [], []>} : vector<8x256xbf16>, vector<256x512xbf16>, vector<8x512xf32> -> vector<8x512xf32>
    %560 = arith.addf %559, %7 : vector<8x512xf32>
    %561 = vector.extract_strided_slice %560 {offsets = [0, 0], sizes = [8, 128], strides = [1, 1]} : vector<8x512xf32> to vector<8x128xf32>
    %cst_185 = arith.constant 5.000000e-01 : f32
    %562 = vector.broadcast %cst_185 : f32 to vector<8x128xf32>
    %563 = arith.mulf %562, %561 : vector<8x128xf32>
    %564 = math.tanh %563 : vector<8x128xf32>
    %cst_186 = arith.constant 5.000000e-01 : f32
    %565 = vector.broadcast %cst_186 : f32 to vector<8x128xf32>
    %566 = arith.mulf %565, %564 : vector<8x128xf32>
    %cst_187 = arith.constant 5.000000e-01 : f32
    %567 = vector.broadcast %cst_187 : f32 to vector<8x128xf32>
    %568 = arith.addf %566, %567 : vector<8x128xf32>
    %569 = vector.extract_strided_slice %560 {offsets = [0, 128], sizes = [8, 128], strides = [1, 1]} : vector<8x512xf32> to vector<8x128xf32>
    %cst_188 = arith.constant 5.000000e-01 : f32
    %570 = vector.broadcast %cst_188 : f32 to vector<8x128xf32>
    %571 = arith.mulf %570, %569 : vector<8x128xf32>
    %572 = math.tanh %571 : vector<8x128xf32>
    %cst_189 = arith.constant 5.000000e-01 : f32
    %573 = vector.broadcast %cst_189 : f32 to vector<8x128xf32>
    %574 = arith.mulf %573, %572 : vector<8x128xf32>
    %cst_190 = arith.constant 5.000000e-01 : f32
    %575 = vector.broadcast %cst_190 : f32 to vector<8x128xf32>
    %576 = arith.addf %574, %575 : vector<8x128xf32>
    %577 = vector.extract_strided_slice %560 {offsets = [0, 256], sizes = [8, 128], strides = [1, 1]} : vector<8x512xf32> to vector<8x128xf32>
    %578 = math.tanh %577 : vector<8x128xf32>
    %579 = vector.extract_strided_slice %560 {offsets = [0, 384], sizes = [8, 128], strides = [1, 1]} : vector<8x512xf32> to vector<8x128xf32>
    %cst_191 = arith.constant 5.000000e-01 : f32
    %580 = vector.broadcast %cst_191 : f32 to vector<8x128xf32>
    %581 = arith.mulf %580, %579 : vector<8x128xf32>
    %582 = math.tanh %581 : vector<8x128xf32>
    %cst_192 = arith.constant 5.000000e-01 : f32
    %583 = vector.broadcast %cst_192 : f32 to vector<8x128xf32>
    %584 = arith.mulf %583, %582 : vector<8x128xf32>
    %cst_193 = arith.constant 5.000000e-01 : f32
    %585 = vector.broadcast %cst_193 : f32 to vector<8x128xf32>
    %586 = arith.addf %584, %585 : vector<8x128xf32>
    %587 = arith.mulf %576, %513 : vector<8x128xf32>
    %588 = arith.mulf %568, %578 : vector<8x128xf32>
    %589 = arith.addf %587, %588 : vector<8x128xf32>
    %590 = math.tanh %589 : vector<8x128xf32>
    %591 = arith.mulf %586, %590 : vector<8x128xf32>
    %592 = tpu.concatenate %591, %550 in 1 : vector<8x128xf32>, vector<8x128xf32> -> vector<8x256xf32>
    %593 = arith.truncf %592 : vector<8x256xf32> to vector<8x256xbf16>
    %cst_194 = arith.constant dense<0.000000e+00> : vector<8x512xf32>
    %594 = tpu.matmul %593, %56, %cst_194 {dimension_numbers = #tpu.dot_dimension_numbers<[1], [0], [0], [1], [0, 0, 1, 1], [], []>} : vector<8x256xbf16>, vector<256x512xbf16>, vector<8x512xf32> -> vector<8x512xf32>
    %595 = arith.addf %594, %10 : vector<8x512xf32>
    %596 = vector.extract_strided_slice %595 {offsets = [0, 0], sizes = [8, 128], strides = [1, 1]} : vector<8x512xf32> to vector<8x128xf32>
    %cst_195 = arith.constant 5.000000e-01 : f32
    %597 = vector.broadcast %cst_195 : f32 to vector<8x128xf32>
    %598 = arith.mulf %597, %596 : vector<8x128xf32>
    %599 = math.tanh %598 : vector<8x128xf32>
    %cst_196 = arith.constant 5.000000e-01 : f32
    %600 = vector.broadcast %cst_196 : f32 to vector<8x128xf32>
    %601 = arith.mulf %600, %599 : vector<8x128xf32>
    %cst_197 = arith.constant 5.000000e-01 : f32
    %602 = vector.broadcast %cst_197 : f32 to vector<8x128xf32>
    %603 = arith.addf %601, %602 : vector<8x128xf32>
    %604 = vector.extract_strided_slice %595 {offsets = [0, 128], sizes = [8, 128], strides = [1, 1]} : vector<8x512xf32> to vector<8x128xf32>
    %cst_198 = arith.constant 5.000000e-01 : f32
    %605 = vector.broadcast %cst_198 : f32 to vector<8x128xf32>
    %606 = arith.mulf %605, %604 : vector<8x128xf32>
    %607 = math.tanh %606 : vector<8x128xf32>
    %cst_199 = arith.constant 5.000000e-01 : f32
    %608 = vector.broadcast %cst_199 : f32 to vector<8x128xf32>
    %609 = arith.mulf %608, %607 : vector<8x128xf32>
    %cst_200 = arith.constant 5.000000e-01 : f32
    %610 = vector.broadcast %cst_200 : f32 to vector<8x128xf32>
    %611 = arith.addf %609, %610 : vector<8x128xf32>
    %612 = vector.extract_strided_slice %595 {offsets = [0, 256], sizes = [8, 128], strides = [1, 1]} : vector<8x512xf32> to vector<8x128xf32>
    %613 = math.tanh %612 : vector<8x128xf32>
    %614 = vector.extract_strided_slice %595 {offsets = [0, 384], sizes = [8, 128], strides = [1, 1]} : vector<8x512xf32> to vector<8x128xf32>
    %cst_201 = arith.constant 5.000000e-01 : f32
    %615 = vector.broadcast %cst_201 : f32 to vector<8x128xf32>
    %616 = arith.mulf %615, %614 : vector<8x128xf32>
    %617 = math.tanh %616 : vector<8x128xf32>
    %cst_202 = arith.constant 5.000000e-01 : f32
    %618 = vector.broadcast %cst_202 : f32 to vector<8x128xf32>
    %619 = arith.mulf %618, %617 : vector<8x128xf32>
    %cst_203 = arith.constant 5.000000e-01 : f32
    %620 = vector.broadcast %cst_203 : f32 to vector<8x128xf32>
    %621 = arith.addf %619, %620 : vector<8x128xf32>
    %622 = arith.mulf %611, %548 : vector<8x128xf32>
    %623 = arith.mulf %603, %613 : vector<8x128xf32>
    %624 = arith.addf %622, %623 : vector<8x128xf32>
    %625 = math.tanh %624 : vector<8x128xf32>
    %626 = arith.mulf %621, %625 : vector<8x128xf32>
    %cst_204 = arith.constant dense<0.000000e+00> : vector<8x128xf32>
    %627 = tpu.matmul %626, %94, %cst_204 {dimension_numbers = #tpu.dot_dimension_numbers<[1], [0], [0], [1], [0, 0, 1, 1], [], []>} : vector<8x128xf32>, vector<128x128xf32>, vector<8x128xf32> -> vector<8x128xf32>
    %628 = arith.addf %627, %13 : vector<8x128xf32>
    %629 = arith.addf %628, %553 : vector<8x128xf32>
    %c7 = arith.constant 7 : index
    %c0_205 = arith.constant 0 : index
    %c0_206 = arith.constant 0 : index
    %630 = vector.load %arg10[%c7, %c0_205, %c0_206] : memref<8x8x128xf32, #tpu.memory_space<vmem>>, vector<1x8x128xf32>
    %631 = vector.shape_cast %630 : vector<1x8x128xf32> to vector<8x128xf32>
    %632 = vector.shape_cast %629 : vector<8x128xf32> to vector<1x8x128xf32>
    tpu.vector_store %arg10[%c7, %c0_205, %c0_206], %632 {strides = array<i32>} : memref<8x8x128xf32, #tpu.memory_space<vmem>>, vector<1x8x128xf32>,
    return
  }
}

</mosaic_0001>

<bundles_post_ra>
// kernel: lstm_decoder_pallas.1
= control target key start
LH: loop header
LB: loop body
LE: loop exit
PB: predicated region body
PF: predicated region fallthrough
CT: control target
= control target key end

     0   :  { %15 = vsyncpa [#allocation6], 0  ;;  %s3895_s13 = smov [#allocation5]   ;;  %s5818_s0 = inlined_call_operand.vmem [shape: f32[8,128], index: 0, kind: input, shape index: {}]   ;;  %s5819_s1 = inlined_call_operand.vmem [shape: f32[8,128], index: 1, kind: input, shape index: {}]   ;;  %s5820_s2 = inlined_call_operand.vmem [shape: f32[8,128], index: 2, kind: input, shape index: {}]   ;;  %s5821_s3 = inlined_call_operand.vmem [shape: f32[8,128], index: 3, kind: input, shape index: {}]   ;;  %s5822_s4 = inlined_call_operand.hbm [shape: bf16[256,512], index: 4, kind: input, shape index: {}]   ;;  %s5823_s5 = inlined_call_operand.vmem [shape: f32[1,512], index: 5, kind: input, shape index: {}]   ;;  %s5824_s6 = inlined_call_operand.vmem [shape: f32[1,512], index: 6, kind: input, shape index: {}]   ;;  %s5825_s7 = inlined_call_operand.vmem [shape: f32[1,128], index: 7, kind: input, shape index: {}]   ;;  %s5826_s8 = inlined_call_operand.hbm [shape: bf16[256,512], index: 8, kind: input, shape index: {}]   ;;  %s5827_s9 = inlined_call_operand.vmem [shape: f32[128,128], index: 9, kind: input, shape index: {}]   ;;  %s5828_s10 = inlined_call_operand.vmem [shape: f32[8,8,128], index: 10, kind: output, shape index: {}]  }
   0x1   :  { %s29_s14 = sshll.u32 %s3895_s13, 4  ;;  %s3867_s17 = scalar_lea.hbm %s5822_s4, 8192  ;;  %s30_s14 = int_to_ptr.vmem [resolvable:$true] %s29_s14 }
   0x2   :  { %p3868_p0 = scmp.ne.s32.totalorder %s5822_s4, %s3867_s17  ;;  %p3871_p1 = scmp.lt.u32.totalorder %s3867_s17, %s5822_s4 }
   0x4   :  { %p3873_p2 = pnand %p3871_p1, %p3868_p0 }
   0x6   :  { %3876 = shalt.err (!%p3873_p2)
}
   0x7   :  { %s3877_s22 = scalar_lea.vmem %s30_s14, 8192  ;;  %p3882_p4 = scmp.lt.s32.totalorder %s30_s14, %s30_s14 }
   0x8   :  { %p3878_p3 = scmp.ne.s32.totalorder %s30_s14, %s3877_s22  ;;  %p3883_p5 = scmp.lt.s32.totalorder %s3877_s22, %s3877_s22 }
   0xa   :  { %p3884_p6 = por %p3883_p5, %p3882_p4 }
   0xc   :  { %p3885_p7 = pnand %p3884_p6, %p3878_p3 }
   0xe   :  { %3888 = shalt.err (!%p3885_p7)
}
   0xf   :  { %s3896_s23 = smov 256   ;;  %s3897_s24 = smov 16  }
  0x10   :  { %35 = dma.hbm_to_vmem [thread:$0]  %s5822_s4, 8192, %s30_s14, [#allocation6], %s3896_s23, %s3896_s23, %s3897_s24  }
  0x11   :  { %3889 = dma.done.wait [#allocation6], 8192  }
  0x12   :  { %3890 = vsyncadd [#allocation6], 4294959104  ;;  %s49_s27 = sld [smem:[#allocation0]]   ;;  %s3898_s28 = smov 512  }
  0x13   :  { %61 = sst [smem:[#allocation8]] %s3898_s28  ;;  %s3899_s29 = smov 4  }
  0x14   :  { %63 = sst [smem:[#allocation8 + $0x1]] %s3898_s28  ;;  %s3900_s30 = smov 64  }
  0x15   :  { %65 = sst [smem:[#allocation8 + $0x2]] %s3899_s29  ;;  %s3901_s11 = smov 128  }
  0x16   :  { %67 = sst [smem:[#allocation8 + $0x3]] %s3900_s30  ;;  %s3902_s12 = smov 2  }
  0x17   :  { %69 = sst [smem:[#allocation8 + $0x4]] %s3901_s11  ;;  %s3903_s13 = smov [#allocation2]  }
  0x18   :  { %71 = sst [smem:[#allocation8 + $0x5]] %s3902_s12  ;;  %s57_s15 = sshll.u32 %s3903_s13, 4  ;;  %s58_s15 = int_to_ptr.vmem [resolvable:$true] %s57_s15 }
  0x19   :  { %s2913_s16 = sshll.u32 %s49_s27, 26  ;;  %73 = sst [smem:[#allocation8 + $0x6]] %s3896_s23 }
  0x1a   :  { %s2914_s17 = sadd.s32 134217728, %s2913_s16  ;;  %75 = sst [smem:[#allocation8 + $0x7]] %s3900_s30 }
  0x1b   :  { %77 = sst [smem:[#allocation8 + $0x8]] %s3899_s29  ;;  %s3904_s4 = smov [#allocation4]  }
  0x1c   :  { %s3905_s14 = smov [#allocation7]  }
  0x1d   :  { %79 = dma.general %s5826_s8, 8192, %s58_s15, %s3904_s4, %s3905_s14, [#allocation8], %s2914_s17, 0  }
  0x1e   :  { %v3982_v0 = vld [vmem:[%s5827_s9] sm:$0xff]  ;;  %v3987_v1 = vld [vmem:[%s5827_s9 + $0x8] sm:$0xff]  ;;  %v3992_v2 = vld [vmem:[%s5827_s9 + $0x10] sm:$0xff] }
  0x1f   :  { %v3997_v3 = vld [vmem:[%s5827_s9 + $0x18] sm:$0xff]  ;;  %v4002_v4 = vld [vmem:[%s5827_s9 + $0x20] sm:$0xff]  ;;  %v4007_v5 = vld [vmem:[%s5827_s9 + $0x28] sm:$0xff] }
  0x20   :  { %v4012_v6 = vld [vmem:[%s5827_s9 + $0x30] sm:$0xff]  ;;  %v4017_v7 = vld [vmem:[%s5827_s9 + $0x38] sm:$0xff]  ;;  %v4022_v8 = vld [vmem:[%s5827_s9 + $0x40] sm:$0xff] }
  0x21   :  { %v4027_v9 = vld [vmem:[%s5827_s9 + $0x48] sm:$0xff]  ;;  %v4032_v10 = vld [vmem:[%s5827_s9 + $0x50] sm:$0xff]  ;;  %v4037_v11 = vld [vmem:[%s5827_s9 + $0x58] sm:$0xff] }
  0x22   :  { %v4042_v12 = vld [vmem:[%s5827_s9 + $0x60] sm:$0xff]  ;;  %v4047_v13 = vld [vmem:[%s5827_s9 + $0x68] sm:$0xff]  ;;  %v4052_v14 = vld [vmem:[%s5827_s9 + $0x70] sm:$0xff] }
  0x23   :  { %v4057_v15 = vld [vmem:[%s5827_s9 + $0x78] sm:$0xff] }
  0x24   :  { %152 = vsyncadd [#allocation4 + $0x1], 2048  ;;  %v4062_v16 = vld [vmem:[%s5825_s7] ss:$0 sm:$0xff]  ;;  %v4069_v18 = vld [vmem:[#allocation5 + $0x4] ss:$16 sps:$4 sm:$0xff]   ;;  %v219_v55 = vlaneseq }
  0x25   :  { %6083 = vst [vmem:[#allocation13_spill] sm:$0xff] %v4062_v16  ;;  %v4067_v17 = vld [vmem:[%s5819_s1] sm:$0xff]  ;;  %6084 = vst [vmem:[#allocation14_spill] sm:$0xff] %v4069_v18  ;;  %594 = vmatprep.subr.bf16.mxu0 %v4069_v18  ;;  %v4077_v21 = vld [vmem:[#allocation5 + $0xc] ss:$16 sps:$4 sm:$0xff]  }
  0x26   :  { %v4071_v19 = vld [vmem:[#allocation5] ss:$16 sps:$4 sm:$0xff]   ;;  %v4074_v20 = vld [vmem:[#allocation5 + $0x24] ss:$16 sps:$4 sm:$0xff]   ;;  %v4081_v23 = vld [vmem:[#allocation5 + $0x8] ss:$16 sps:$4 sm:$0xff]   ;;  %635 = vmatprep.subr.bf16.mxu1 %v4077_v21 }
  0x27   :  { %595 = vmatpush1.bf16.msra.mxu0 %v4071_v19  ;;  %v4079_v22 = vld [vmem:[#allocation5 + $0x20] ss:$16 sps:$4 sm:$0xff]   ;;  %6085 = vst [vmem:[#allocation15_spill] sm:$0xff] %v4081_v23  ;;  %v4084_v24 = vld [vmem:[#allocation5 + $0x44] ss:$16 sps:$4 sm:$0xff]   ;;  %636 = vmatpush1.bf16.msra.mxu1 %v4081_v23  ;;  %v4190_v61 = vshrl.u32 %v219_v55, 7 }
  0x28   :  { %596 = vmatprep.subr.bf16.mxu0 %v4074_v20  ;;  %v4087_v25 = vld [vmem:[#allocation5 + $0x2c] ss:$16 sps:$4 sm:$0xff]   ;;  %v4090_v26 = vld [vmem:[#allocation5 + $0x28] ss:$16 sps:$4 sm:$0xff]   ;;  %v4094_v27 = vld [vmem:[#allocation5 + $0x40] ss:$16 sps:$4 sm:$0xff]  }
  0x29   :  { %6086 = vst [vmem:[#allocation16_spill] sm:$0xff] %v4087_v25  ;;  %6087 = vst [vmem:[#allocation17_spill] sm:$0xff] %v4090_v26  ;;  %637 = vmatprep.subr.bf16.mxu1 %v4087_v25  ;;  %v4097_v28 = vld [vmem:[#allocation5 + $0x64] ss:$16 sps:$4 sm:$0xff]   ;;  %v4099_v29 = vld [vmem:[#allocation5 + $0x4c] ss:$16 sps:$4 sm:$0xff]  }
  0x2a   :  { %6088 = vst [vmem:[#allocation18_spill] sm:$0xff] %v4099_v29  ;;  %v4102_v30 = vld [vmem:[#allocation5 + $0x48] ss:$16 sps:$4 sm:$0xff]   ;;  %v4106_v31 = vld [vmem:[#allocation5 + $0x60] ss:$16 sps:$4 sm:$0xff]  }
  0x2b   :  { %597 = vmatpush1.bf16.msra.mxu0 %v4079_v22  ;;  %638 = vmatpush1.bf16.msra.mxu1 %v4090_v26  ;;  %6089 = vst [vmem:[#allocation19_spill] sm:$0xff] %v4102_v30  ;;  %v4108_v32 = vld [vmem:[#allocation5 + $0x6c] ss:$16 sps:$4 sm:$0xff]   ;;  %v4111_v33 = vld [vmem:[#allocation5 + $0x84] ss:$16 sps:$4 sm:$0xff]  }
  0x2c   :  { %598 = vmatprep.subr.bf16.mxu0 %v4084_v24  ;;  %639 = vmatprep.subr.bf16.mxu1 %v4099_v29  ;;  %6090 = vst [vmem:[#allocation20_spill] sm:$0xff] %v4108_v32  ;;  %v4114_v34 = vld [vmem:[#allocation5 + $0x80] ss:$16 sps:$4 sm:$0xff]   ;;  %v4116_v35 = vld [vmem:[#allocation5 + $0x68] ss:$16 sps:$4 sm:$0xff]  }
  0x2d   :  { %6091 = vst [vmem:[#allocation21_spill] sm:$0xff] %v4116_v35  ;;  %v4120_v36 = vld [vmem:[#allocation5 + $0x8c] ss:$16 sps:$4 sm:$0xff]   ;;  %v4123_v37 = vld [vmem:[#allocation5 + $0xa4] ss:$16 sps:$4 sm:$0xff]  }
  0x2e   :  { %6092 = vst [vmem:[#allocation22_spill] sm:$0xff] %v4120_v36  ;;  %v4126_v38 = vld [vmem:[#allocation5 + $0x88] ss:$16 sps:$4 sm:$0xff]   ;;  %v4130_v39 = vld [vmem:[#allocation5 + $0xa0] ss:$16 sps:$4 sm:$0xff]  }
  0x2f   :  { %599 = vmatpush1.bf16.msra.mxu0 %v4094_v27  ;;  %640 = vmatpush1.bf16.msra.mxu1 %v4102_v30  ;;  %6093 = vst [vmem:[#allocation23_spill] sm:$0xff] %v4126_v38  ;;  %v4132_v40 = vld [vmem:[#allocation5 + $0xac] ss:$16 sps:$4 sm:$0xff]   ;;  %v4135_v41 = vld [vmem:[#allocation5 + $0xc4] ss:$16 sps:$4 sm:$0xff]  }
  0x30   :  { %600 = vmatprep.subr.bf16.mxu0 %v4097_v28  ;;  %641 = vmatprep.subr.bf16.mxu1 %v4108_v32  ;;  %6094 = vst [vmem:[#allocation24_spill] sm:$0xff] %v4132_v40  ;;  %v4138_v42 = vld [vmem:[#allocation5 + $0xc0] ss:$16 sps:$4 sm:$0xff]   ;;  %v4140_v43 = vld [vmem:[#allocation5 + $0xa8] ss:$16 sps:$4 sm:$0xff]  }
  0x31   :  { %6095 = vst [vmem:[#allocation25_spill] sm:$0xff] %v4140_v43  ;;  %v4144_v44 = vld [vmem:[#allocation5 + $0xcc] ss:$16 sps:$4 sm:$0xff]   ;;  %v4147_v45 = vld [vmem:[#allocation5 + $0xe4] ss:$16 sps:$4 sm:$0xff]  }
  0x32   :  { %6096 = vst [vmem:[#allocation26_spill] sm:$0xff] %v4144_v44  ;;  %v4150_v46 = vld [vmem:[#allocation5 + $0xc8] ss:$16 sps:$4 sm:$0xff]   ;;  %v4154_v47 = vld [vmem:[#allocation5 + $0xe0] ss:$16 sps:$4 sm:$0xff]  }
  0x33   :  { %601 = vmatpush1.bf16.msra.mxu0 %v4106_v31  ;;  %642 = vmatpush1.bf16.msra.mxu1 %v4116_v35  ;;  %6097 = vst [vmem:[#allocation27_spill] sm:$0xff] %v4150_v46  ;;  %v4156_v48 = vld [vmem:[#allocation5 + $0xec] ss:$16 sps:$4 sm:$0xff]   ;;  %v4159_v49 = vld [vmem:[#allocation5 + $0x104] ss:$16 sps:$4 sm:$0xff]  }
  0x34   :  { %602 = vmatprep.subr.bf16.mxu0 %v4111_v33  ;;  %643 = vmatprep.subr.bf16.mxu1 %v4120_v36  ;;  %6098 = vst [vmem:[#allocation28_spill] sm:$0xff] %v4156_v48  ;;  %v4162_v50 = vld [vmem:[#allocation5 + $0x100] ss:$16 sps:$4 sm:$0xff]   ;;  %v4164_v51 = vld [vmem:[#allocation5 + $0xe8] ss:$16 sps:$4 sm:$0xff]  }
  0x35   :  { %6099 = vst [vmem:[#allocation29_spill] sm:$0xff] %v4164_v51  ;;  %v4168_v52 = vld [vmem:[#allocation5 + $0x10c] ss:$16 sps:$4 sm:$0xff]   ;;  %v4171_v53 = vld [vmem:[#allocation5 + $0x124] ss:$16 sps:$4 sm:$0xff]  }
  0x36   :  { %6100 = vst [vmem:[#allocation30_spill] sm:$0xff] %v4168_v52  ;;  %v4174_v54 = vld [vmem:[#allocation5 + $0x108] ss:$16 sps:$4 sm:$0xff]   ;;  %v4178_v56 = vld [vmem:[#allocation5 + $0x120] ss:$16 sps:$4 sm:$0xff]  }
  0x37   :  { %603 = vmatpush1.bf16.msra.mxu0 %v4114_v34  ;;  %644 = vmatpush1.bf16.msra.mxu1 %v4126_v38  ;;  %6101 = vst [vmem:[#allocation31_spill] sm:$0xff] %v4174_v54  ;;  %6102 = vst [vmem:[#allocation32_spill] sm:$0xff] %v4178_v56  ;;  %v4180_v57 = vld [vmem:[#allocation5 + $0x12c] ss:$16 sps:$4 sm:$0xff]   ;;  %v4183_v58 = vld [vmem:[#allocation5 + $0x144] ss:$16 sps:$4 sm:$0xff]  }
  0x38   :  { %604 = vmatprep.subr.bf16.mxu0 %v4123_v37  ;;  %645 = vmatprep.subr.bf16.mxu1 %v4132_v40  ;;  %6103 = vst [vmem:[#allocation33_spill] sm:$0xff] %v4180_v57  ;;  %6104 = vst [vmem:[#allocation34_spill] sm:$0xff] %v4183_v58  ;;  %v4186_v59 = vld [vmem:[#allocation5 + $0x140] ss:$16 sps:$4 sm:$0xff]   ;;  %v4188_v60 = vld [vmem:[#allocation5 + $0x128] ss:$16 sps:$4 sm:$0xff]  }
  0x39   :  { %6105 = vst [vmem:[#allocation35_spill] sm:$0xff] %v4186_v59  ;;  %6106 = vst [vmem:[#allocation36_spill] sm:$0xff] %v4188_v60  ;;  %v4194_v62 = vld [vmem:[#allocation5 + $0x14c] ss:$16 sps:$4 sm:$0xff]   ;;  %v4197_v63 = vld [vmem:[#allocation5 + $0x164] ss:$16 sps:$4 sm:$0xff]  }
  0x3a   :  { %6107 = vst [vmem:[#allocation37_spill] sm:$0xff] %v4194_v62  ;;  %6108 = vst [vmem:[#allocation38_spill] sm:$0xff] %v4197_v63  ;;  %v268_v16 = vld [vmem:[%s5818_s0] sm:$0xff]  ;;  %v4233_v40 = vld [vmem:[#allocation5 + $0x188] ss:$16 sps:$4 sm:$0xff]  }
  0x3b   :  { %605 = vmatpush1.bf16.msra.mxu0 %v4130_v39  ;;  %646 = vmatpush1.bf16.msra.mxu1 %v4140_v43  ;;  %v273_v55 = vpack.c.bf16 %v268_v16, %v268_v16  ;;  %v4230_v43 = vld [vmem:[#allocation5 + $0x1a4] ss:$16 sps:$4 sm:$0xff]   ;;  %6118 = vst [vmem:[#allocation48_spill] sm:$0xff] %v4233_v40  ;;  %v4245_v38 = vld [vmem:[#allocation5 + $0x1a8] ss:$16 sps:$4 sm:$0xff]  }
  0x3c   :  { %606 = vmatprep.subr.bf16.mxu0 %v4135_v41  ;;  %647 = vmatprep.subr.bf16.mxu1 %v4144_v44  ;;  %v4227_v44 = vld [vmem:[#allocation5 + $0x18c] ss:$16 sps:$4 sm:$0xff]   ;;  %6117 = vst [vmem:[#allocation47_spill] sm:$0xff] %v4230_v43  ;;  %6122 = vst [vmem:[#allocation52_spill] sm:$0xff] %v4245_v38 }
  0x3d   :  { %626 = vmatprep.mubr.bf16.mxu0 %v273_v55  ;;  %667 = vmatprep.mubr.bf16.mxu1 %v273_v55  ;;  %6116 = vst [vmem:[#allocation46_spill] sm:$0xff] %v4227_v44  ;;  %v4237_v55 = vld [vmem:[#allocation5 + $0x1a0] ss:$16 sps:$4 sm:$0xff]  }
  0x3e   :  { %6119 = vst [vmem:[#allocation49_spill] sm:$0xff] %v4237_v55 }
  0x3f   :  { %607 = vmatpush1.bf16.msra.mxu0 %v4138_v42  ;;  %648 = vmatpush1.bf16.msra.mxu1 %v4150_v46  ;;  %v4221_v46 = vld [vmem:[#allocation5 + $0x168] ss:$16 sps:$4 sm:$0xff]  }
  0x40   :  { %608 = vmatprep.subr.bf16.mxu0 %v4147_v45  ;;  %649 = vmatprep.subr.bf16.mxu1 %v4156_v48  ;;  %v239_v48 = vld [vmem:[%s5824_s6] sm:$0xf]  ;;  %6114 = vst [vmem:[#allocation44_spill] sm:$0xff] %v4221_v46 }
  0x43   :  { %609 = vmatpush1.bf16.msra.mxu0 %v4154_v47  ;;  %650 = vmatpush1.bf16.msra.mxu1 %v4164_v51  ;;  %v4210_v51 = vld [vmem:[#allocation5 + $0x16c] ss:$16 sps:$4 sm:$0xff]  }
  0x44   :  { %610 = vmatprep.subr.bf16.mxu0 %v4159_v49  ;;  %651 = vmatprep.subr.bf16.mxu1 %v4168_v52  ;;  %v221_v52 = vsub.s32 0, %v4190_v61  ;;  %6111 = vst [vmem:[#allocation41_spill] sm:$0xff] %v4210_v51 }
  0x46   :  { %v4218_v16 = vrot.slane %v239_v48, %v221_v52 }
  0x47   :  { %611 = vmatpush1.bf16.msra.mxu0 %v4162_v50  ;;  %652 = vmatpush1.bf16.msra.mxu1 %v4174_v54  ;;  %v4203_v54 = vld [vmem:[#allocation5 + $0x148] ss:$16 sps:$4 sm:$0xff]  }
  0x48   :  { %612 = vmatprep.subr.bf16.mxu0 %v4171_v53  ;;  %653 = vmatprep.subr.bf16.mxu1 %v4180_v57  ;;  %6109 = vst [vmem:[#allocation39_spill] sm:$0xff] %v4203_v54  ;;  %v4208_v57 = vld [vmem:[#allocation5 + $0x160] ss:$16 sps:$4 sm:$0xff]   ;;  %6113 = vst [vmem:[#allocation43_spill] sm:$0xff] %v4218_v16 }
  0x49   :  { %6110 = vst [vmem:[#allocation40_spill] sm:$0xff] %v4208_v57 }
  0x4b   :  { %613 = vmatpush1.bf16.msra.mxu0 %v4178_v56  ;;  %654 = vmatpush1.bf16.msra.mxu1 %v4188_v60  ;;  %v4216_v60 = vld [vmem:[#allocation5 + $0x184] ss:$16 sps:$4 sm:$0xff]  }
  0x4c   :  { %614 = vmatprep.subr.bf16.mxu0 %v4183_v58  ;;  %655 = vmatprep.subr.bf16.mxu1 %v4194_v62  ;;  %6112 = vst [vmem:[#allocation42_spill] sm:$0xff] %v4216_v60  ;;  %v4225_v62 = vld [vmem:[#allocation5 + $0x180] ss:$16 sps:$4 sm:$0xff]  }
  0x4d   :  { %6115 = vst [vmem:[#allocation45_spill] sm:$0xff] %v4225_v62 }
  0x4f   :  { %615 = vmatpush1.bf16.msra.mxu0 %v4186_v59  ;;  %656 = vmatpush1.bf16.msra.mxu1 %v4203_v54  ;;  %v4239_v54 = vld [vmem:[#allocation5 + $0x1ac] ss:$16 sps:$4 sm:$0xff]  }
  0x50   :  { %616 = vmatprep.subr.bf16.mxu0 %v4197_v63  ;;  %657 = vmatprep.subr.bf16.mxu1 %v4210_v51  ;;  %6120 = vst [vmem:[#allocation50_spill] sm:$0xff] %v4239_v54  ;;  %v4242_v51 = vld [vmem:[#allocation5 + $0x1c4] ss:$16 sps:$4 sm:$0xff]  }
  0x51   :  { %6121 = vst [vmem:[#allocation51_spill] sm:$0xff] %v4242_v51 }
  0x53   :  { %617 = vmatpush1.bf16.msra.mxu0 %v4208_v57  ;;  %658 = vmatpush1.bf16.msra.mxu1 %v4221_v46  ;;  %v4249_v46 = vld [vmem:[#allocation5 + $0x1c0] ss:$16 sps:$4 sm:$0xff]  }
  0x54   :  { %618 = vmatprep.subr.bf16.mxu0 %v4216_v60  ;;  %659 = vmatprep.subr.bf16.mxu1 %v4227_v44  ;;  %6123 = vst [vmem:[#allocation53_spill] sm:$0xff] %v4249_v46  ;;  %v4254_v44 = vld [vmem:[#allocation5 + $0x1e4] ss:$16 sps:$4 sm:$0xff]  }
  0x55   :  { %6125 = vst [vmem:[#allocation55_spill] sm:$0xff] %v4254_v44 }
  0x57   :  { %619 = vmatpush1.bf16.msra.mxu0 %v4225_v62  ;;  %660 = vmatpush1.bf16.msra.mxu1 %v4233_v40  ;;  %v4251_v62 = vld [vmem:[#allocation5 + $0x1cc] ss:$16 sps:$4 sm:$0xff]   ;;  %v4261_v40 = vld [vmem:[#allocation5 + $0x1e0] ss:$16 sps:$4 sm:$0xff]  }
  0x58   :  { %620 = vmatprep.subr.bf16.mxu0 %v4230_v43  ;;  %661 = vmatprep.subr.bf16.mxu1 %v4239_v54  ;;  %6124 = vst [vmem:[#allocation54_spill] sm:$0xff] %v4251_v62  ;;  %v4257_v43 = vld [vmem:[#allocation5 + $0x1c8] ss:$16 sps:$4 sm:$0xff]   ;;  %6127 = vst [vmem:[#allocation57_spill] sm:$0xff] %v4261_v40  ;;  %v4266_v54 = vld [vmem:[%s5821_s3] sm:$0xff] }
  0x59   :  { %6126 = vst [vmem:[#allocation56_spill] sm:$0xff] %v4257_v43  ;;  %6128 = vst [vmem:[#allocation58_spill] sm:$0xff] %v4266_v54 }
  0x5b   :  { %621 = vmatpush1.bf16.msra.mxu0 %v4237_v55  ;;  %662 = vmatpush1.bf16.msra.mxu1 %v4245_v38  ;;  %v4268_v55 = vld [vmem:[#allocation5 + $0x1ec] ss:$16 sps:$4 sm:$0xff]   ;;  %v272_v38 = vpack.c.bf16 %v4266_v54, %v4266_v54  ;;  %v233_v54 = vsub.s32 3, %v4190_v61 }
  0x5c   :  { %622 = vmatprep.subr.bf16.mxu0 %v4242_v51  ;;  %663 = vmatprep.subr.bf16.mxu1 %v4251_v62  ;;  %6129 = vst [vmem:[#allocation59_spill] sm:$0xff] %v4268_v55  ;;  %v4274_v51 = vld [vmem:[#allocation5 + $0x1e8] ss:$16 sps:$4 sm:$0xff]   ;;  %v225_v62 = vsub.s32 1, %v4190_v61 }
  0x5d   :  { %6130 = vst [vmem:[#allocation60_spill] sm:$0xff] %v4274_v51  ;;  %v4286_v60 = vrot.slane %v239_v48, %v233_v54 }
  0x5f   :  { %623 = vmatpush1.bf16.msra.mxu0 %v4249_v46  ;;  %664 = vmatpush1.bf16.msra.mxu1 %v4257_v43  ;;  %v4280_v46 = vrot.slane %v239_v48, %v225_v62  ;;  %6132 = vst [vmem:[#allocation62_spill] sm:$0xff] %v4286_v60 }
  0x60   :  { %624 = vmatprep.subr.bf16.mxu0 %v4254_v44  ;;  %665 = vmatprep.subr.bf16.mxu1 %v4268_v55  ;;  %v229_v44 = vsub.s32 2, %v4190_v61  ;;  %v217_v55 = vld [vmem:[%s5823_s5] sm:$0xf] }
  0x62   :  { %v4283_v43 = vrot.slane %v239_v48, %v229_v44  ;;  %v4295_v36 = vrot.slane %v217_v55, %v229_v44 }
  0x63   :  { %625 = vmatpush1.bf16.msra.mxu0 %v4261_v40  ;;  %666 = vmatpush1.bf16.msra.mxu1 %v4274_v51  ;;  %v4291_v40 = vrot.slane %v217_v55, %v221_v52  ;;  %v4293_v51 = vrot.slane %v217_v55, %v225_v62  ;;  %v4300_v52 = vrot.slane %v217_v55, %v233_v54 }
  0x64   :  { %6131 = vst [vmem:[#allocation61_spill] sm:$0xff] %v4283_v43  ;;  %6135 = vst [vmem:[#allocation65_spill] sm:$0xff] %v4295_v36 }
  0x65   :  { %6133 = vst [vmem:[#allocation63_spill] sm:$0xff] %v4291_v40  ;;  %6134 = vst [vmem:[#allocation64_spill] sm:$0xff] %v4293_v51 }
  0x66   :  { %627 = vmatmul.mubr.bf16.vlgmr.msra.gmra.mrb[0].mxu0 %v272_v38  ;;  %668 = vmatmul.mubr.bf16.vlgmr.msra.gmra.mrb[0].mxu1 %v272_v38  ;;  %6136 = vst [vmem:[#allocation66_spill] sm:$0xff] %v4300_v52 }
 0x139   :  { %v628_v38 = vpop.f32.mrb[0].mxu0  ;;  %v669_v59 = vpop.f32.mrb[0].mxu1 }
 0x13a   :  { %v629_v57 = vadd.f32 %v628_v38, %v4291_v40  ;;  %v630_v35 = vpop.f32.mrb[1].mxu0  ;;  %v670_v58 = vadd.f32 %v669_v59, %v4295_v36  ;;  %v671_v29 = vpop.f32.mrb[1].mxu1  ;;  %v4306_v59 = vld [vmem:[%s5820_s2] sm:$0xff] }
 0x13b   :  { %v631_v63 = vadd.f32 %v630_v35, %v4293_v51  ;;  %v632_v32 = vpop.f32.mrb[2].mxu0  ;;  %v673_v62 = vpop.f32.mrb[2].mxu1  ;;  %v672_v38 = vadd.f32 %v671_v29, %v4300_v52 }
 0x13c   :  { %v676_v61 = vmul.f32 0.5, %v629_v57  ;;  %v633_v48 = vpop.f32.mrb[3].mxu0  ;;  %v674_v44 = vpop.f32.mrb[3].mxu1 }
 0x13d   :  { %v680_v30 = vmul.f32 0.5, %v631_v63  ;;  %v685_v40 = vmul.f32 0.5, %v672_v38 }
 0x13e   :  { %3707 = vtanh.f32 %v676_v61 }
 0x13f   :  { %3709 = vtanh.f32 %v680_v30 }
 0x140   :  { %3711 = vtanh.f32 %v670_v58 }
 0x141   :  { %3713 = vtanh.f32 %v685_v40 }
 0x148   :  { %v3708_v56 = vpop.eup %3707 }
 0x149   :  { %v3710_v35 = vpop.eup %3709  ;;  %v678_v32 = vmul.f32 0.5, %v3708_v56 }
 0x14a   :  { %v3712_v57 = vpop.eup %3711  ;;  %v682_v48 = vmul.f32 0.5, %v3710_v35 }
 0x14b   :  { %v679_v63 = vadd.f32 0.5, %v678_v32  ;;  %v3714_v29 = vpop.eup %3713 }
 0x14c   :  { %v683_v54 = vadd.f32 0.5, %v682_v48  ;;  %v687_v61 = vmul.f32 0.5, %v3714_v29 }
 0x14d   :  { %v690_v55 = vmul.f32 %v3712_v57, %v679_v63 }
 0x14e   :  { %v689_v30 = vmul.f32 %v683_v54, %v4306_v59  ;;  %v688_v56 = vadd.f32 0.5, %v687_v61 }
 0x150   :  { %v4309_v58 = vadd.f32 %v690_v55, %v689_v30 }
 0x152   :  { %6137 = vst [vmem:[#allocation67_spill] sm:$0xff] %v4309_v58  ;;  %3715 = vtanh.f32 %v4309_v58 }
 0x15c   :  { %v3716_v62 = vpop.eup %3715 }
 0x15d   :  { %v4312_v44 = vmul.f32 %v3716_v62, %v688_v56 }
 0x15e   :  { %3891 = dma.done.wait [#allocation4], 8192 }
 0x15f   :  { %3892 = vsyncadd [#allocation4], 4294959104  ;;  %v763_v40 = vpack.c.bf16 %v4067_v17, %v4067_v17  ;;  %v4316_v38 = vld [vmem:[#allocation2 + $0x8] sm:$0xff]  ;;  %v4318_v35 = vld [vmem:[#allocation2] sm:$0xff] }
 0x160   :  { %6138 = vst [vmem:[#allocation68_spill] sm:$0xff] %v4316_v38  ;;  %6139 = vst [vmem:[#allocation69_spill] sm:$0xff] %v4318_v35  ;;  %v4320_v32 = vld [vmem:[#allocation2 + $0x28] sm:$0xff]  ;;  %764 = vmatprep.subr.bf16.mxu0 %v4316_v38  ;;  %v4323_v57 = vld [vmem:[#allocation2 + $0x18] sm:$0xff] }
 0x161   :  { %796 = vmatprep.mubr.bf16.mxu0 %v763_v40  ;;  %837 = vmatprep.mubr.bf16.mxu1 %v763_v40  ;;  %6140 = vst [vmem:[#allocation70_spill] sm:$0xff] %v4320_v32  ;;  %6141 = vst [vmem:[#allocation71_spill] sm:$0xff] %v4323_v57  ;;  %v4325_v48 = vld [vmem:[#allocation2 + $0x10] sm:$0xff]  ;;  %v4329_v63 = vld [vmem:[#allocation2 + $0x38] sm:$0xff] }
 0x162   :  { %6142 = vst [vmem:[#allocation72_spill] sm:$0xff] %v4325_v48  ;;  %765 = vmatpush1.bf16.msra.mxu0 %v4318_v35  ;;  %805 = vmatprep.subr.bf16.mxu1 %v4323_v57  ;;  %6143 = vst [vmem:[#allocation73_spill] sm:$0xff] %v4329_v63  ;;  %v4332_v17 = vld [vmem:[#allocation2 + $0x20] sm:$0xff]  ;;  %v4335_v54 = vld [vmem:[#allocation2 + $0x48] sm:$0xff] }
 0x163   :  { %766 = vmatprep.subr.bf16.mxu0 %v4320_v32  ;;  %6144 = vst [vmem:[#allocation74_spill] sm:$0xff] %v4332_v17  ;;  %806 = vmatpush1.bf16.msra.mxu1 %v4325_v48  ;;  %6145 = vst [vmem:[#allocation75_spill] sm:$0xff] %v4335_v54  ;;  %v4338_v55 = vld [vmem:[#allocation2 + $0x30] sm:$0xff]  ;;  %v4340_v30 = vld [vmem:[#allocation2 + $0x58] sm:$0xff] }
 0x164   :  { %807 = vmatprep.subr.bf16.mxu1 %v4329_v63  ;;  %6146 = vst [vmem:[#allocation76_spill] sm:$0xff] %v4338_v55  ;;  %6147 = vst [vmem:[#allocation77_spill] sm:$0xff] %v4340_v30  ;;  %v4344_v29 = vld [vmem:[#allocation2 + $0x40] sm:$0xff]  ;;  %v4347_v61 = vld [vmem:[#allocation2 + $0x68] sm:$0xff] }
 0x165   :  { %6148 = vst [vmem:[#allocation78_spill] sm:$0xff] %v4344_v29  ;;  %6149 = vst [vmem:[#allocation79_spill] sm:$0xff] %v4347_v61  ;;  %v4350_v56 = vld [vmem:[#allocation2 + $0x50] sm:$0xff]  ;;  %v4352_v62 = vld [vmem:[#allocation2 + $0x78] sm:$0xff] }
 0x166   :  { %767 = vmatpush1.bf16.msra.mxu0 %v4332_v17  ;;  %6150 = vst [vmem:[#allocation80_spill] sm:$0xff] %v4350_v56  ;;  %6151 = vst [vmem:[#allocation81_spill] sm:$0xff] %v4352_v62  ;;  %v4356_v40 = vld [vmem:[#allocation2 + $0x60] sm:$0xff]  ;;  %v4359_v58 = vld [vmem:[#allocation2 + $0x88] sm:$0xff] }
 0x167   :  { %768 = vmatprep.subr.bf16.mxu0 %v4335_v54  ;;  %808 = vmatpush1.bf16.msra.mxu1 %v4338_v55  ;;  %6152 = vst [vmem:[#allocation82_spill] sm:$0xff] %v4356_v40  ;;  %6153 = vst [vmem:[#allocation83_spill] sm:$0xff] %v4359_v58  ;;  %v4362_v52 = vld [vmem:[#allocation2 + $0x70] sm:$0xff]  ;;  %v4364_v36 = vld [vmem:[#allocation2 + $0x98] sm:$0xff] }
 0x168   :  { %809 = vmatprep.subr.bf16.mxu1 %v4340_v30  ;;  %6154 = vst [vmem:[#allocation84_spill] sm:$0xff] %v4362_v52  ;;  %6155 = vst [vmem:[#allocation85_spill] sm:$0xff] %v4364_v36  ;;  %v4368_v51 = vld [vmem:[#allocation2 + $0x80] sm:$0xff] }
 0x169   :  { %6156 = vst [vmem:[#allocation86_spill] sm:$0xff] %v4368_v51 }
 0x16a   :  { %769 = vmatpush1.bf16.msra.mxu0 %v4344_v29  ;;  %v4376_v29 = vld [vmem:[#allocation2 + $0xb8] sm:$0xff] }
 0x16b   :  { %770 = vmatprep.subr.bf16.mxu0 %v4347_v61  ;;  %810 = vmatpush1.bf16.msra.mxu1 %v4350_v56  ;;  %v4371_v61 = vld [vmem:[#allocation2 + $0xa8] sm:$0xff]  ;;  %v4374_v56 = vld [vmem:[#allocation2 + $0x90] sm:$0xff]  ;;  %6159 = vst [vmem:[#allocation89_spill] sm:$0xff] %v4376_v29 }
 0x16c   :  { %811 = vmatprep.subr.bf16.mxu1 %v4352_v62  ;;  %6157 = vst [vmem:[#allocation87_spill] sm:$0xff] %v4371_v61  ;;  %6158 = vst [vmem:[#allocation88_spill] sm:$0xff] %v4374_v56  ;;  %v4380_v62 = vld [vmem:[#allocation2 + $0xa0] sm:$0xff] }
 0x16d   :  { %6160 = vst [vmem:[#allocation90_spill] sm:$0xff] %v4380_v62 }
 0x16e   :  { %771 = vmatpush1.bf16.msra.mxu0 %v4356_v40  ;;  %v4388_v40 = vld [vmem:[#allocation2 + $0xd8] sm:$0xff] }
 0x16f   :  { %772 = vmatprep.subr.bf16.mxu0 %v4359_v58  ;;  %812 = vmatpush1.bf16.msra.mxu1 %v4362_v52  ;;  %v4383_v58 = vld [vmem:[#allocation2 + $0xc8] sm:$0xff]  ;;  %v4386_v52 = vld [vmem:[#allocation2 + $0xb0] sm:$0xff]  ;;  %6163 = vst [vmem:[#allocation93_spill] sm:$0xff] %v4388_v40 }
 0x170   :  { %813 = vmatprep.subr.bf16.mxu1 %v4364_v36  ;;  %6161 = vst [vmem:[#allocation91_spill] sm:$0xff] %v4383_v58  ;;  %6162 = vst [vmem:[#allocation92_spill] sm:$0xff] %v4386_v52  ;;  %v4392_v36 = vld [vmem:[#allocation2 + $0xc0] sm:$0xff] }
 0x171   :  { %6164 = vst [vmem:[#allocation94_spill] sm:$0xff] %v4392_v36 }
 0x172   :  { %773 = vmatpush1.bf16.msra.mxu0 %v4368_v51  ;;  %v4400_v51 = vld [vmem:[#allocation2 + $0xf8] sm:$0xff] }
 0x173   :  { %774 = vmatprep.subr.bf16.mxu0 %v4371_v61  ;;  %814 = vmatpush1.bf16.msra.mxu1 %v4374_v56  ;;  %v4395_v61 = vld [vmem:[#allocation2 + $0xe8] sm:$0xff]  ;;  %v4398_v56 = vld [vmem:[#allocation2 + $0xd0] sm:$0xff]  ;;  %6167 = vst [vmem:[#allocation97_spill] sm:$0xff] %v4400_v51 }
 0x174   :  { %815 = vmatprep.subr.bf16.mxu1 %v4376_v29  ;;  %6165 = vst [vmem:[#allocation95_spill] sm:$0xff] %v4395_v61  ;;  %6166 = vst [vmem:[#allocation96_spill] sm:$0xff] %v4398_v56  ;;  %v4404_v29 = vld [vmem:[#allocation2 + $0xe0] sm:$0xff] }
 0x175   :  { %6168 = vst [vmem:[#allocation98_spill] sm:$0xff] %v4404_v29 }
 0x176   :  { %775 = vmatpush1.bf16.msra.mxu0 %v4380_v62  ;;  %v4412_v62 = vld [vmem:[#allocation2 + $0x118] sm:$0xff] }
 0x177   :  { %776 = vmatprep.subr.bf16.mxu0 %v4383_v58  ;;  %816 = vmatpush1.bf16.msra.mxu1 %v4386_v52  ;;  %v4407_v58 = vld [vmem:[#allocation2 + $0x108] sm:$0xff]  ;;  %v4410_v52 = vld [vmem:[#allocation2 + $0xf0] sm:$0xff]  ;;  %6171 = vst [vmem:[#allocation101_spill] sm:$0xff] %v4412_v62 }
 0x178   :  { %817 = vmatprep.subr.bf16.mxu1 %v4388_v40  ;;  %6169 = vst [vmem:[#allocation99_spill] sm:$0xff] %v4407_v58  ;;  %6170 = vst [vmem:[#allocation100_spill] sm:$0xff] %v4410_v52  ;;  %v4416_v40 = vld [vmem:[#allocation2 + $0x100] sm:$0xff] }
 0x179   :  { %6172 = vst [vmem:[#allocation102_spill] sm:$0xff] %v4416_v40 }
 0x17a   :  { %777 = vmatpush1.bf16.msra.mxu0 %v4392_v36  ;;  %v4424_v36 = vld [vmem:[#allocation2 + $0x138] sm:$0xff] }
 0x17b   :  { %778 = vmatprep.subr.bf16.mxu0 %v4395_v61  ;;  %818 = vmatpush1.bf16.msra.mxu1 %v4398_v56  ;;  %v4419_v61 = vld [vmem:[#allocation2 + $0x128] sm:$0xff]  ;;  %v4422_v56 = vld [vmem:[#allocation2 + $0x110] sm:$0xff]  ;;  %6175 = vst [vmem:[#allocation105_spill] sm:$0xff] %v4424_v36 }
 0x17c   :  { %819 = vmatprep.subr.bf16.mxu1 %v4400_v51  ;;  %6173 = vst [vmem:[#allocation103_spill] sm:$0xff] %v4419_v61  ;;  %6174 = vst [vmem:[#allocation104_spill] sm:$0xff] %v4422_v56  ;;  %v4428_v51 = vld [vmem:[#allocation2 + $0x120] sm:$0xff] }
 0x17d   :  { %6176 = vst [vmem:[#allocation106_spill] sm:$0xff] %v4428_v51 }
 0x17e   :  { %779 = vmatpush1.bf16.msra.mxu0 %v4404_v29  ;;  %v4436_v29 = vld [vmem:[#allocation2 + $0x158] sm:$0xff] }
 0x17f   :  { %780 = vmatprep.subr.bf16.mxu0 %v4407_v58  ;;  %820 = vmatpush1.bf16.msra.mxu1 %v4410_v52  ;;  %v4431_v58 = vld [vmem:[#allocation2 + $0x148] sm:$0xff]  ;;  %v4434_v52 = vld [vmem:[#allocation2 + $0x130] sm:$0xff]  ;;  %6179 = vst [vmem:[#allocation109_spill] sm:$0xff] %v4436_v29 }
 0x180   :  { %821 = vmatprep.subr.bf16.mxu1 %v4412_v62  ;;  %6177 = vst [vmem:[#allocation107_spill] sm:$0xff] %v4431_v58  ;;  %6178 = vst [vmem:[#allocation108_spill] sm:$0xff] %v4434_v52  ;;  %v4440_v62 = vld [vmem:[#allocation2 + $0x140] sm:$0xff] }
 0x181   :  { %6180 = vst [vmem:[#allocation110_spill] sm:$0xff] %v4440_v62 }
 0x182   :  { %781 = vmatpush1.bf16.msra.mxu0 %v4416_v40  ;;  %v4448_v40 = vld [vmem:[#allocation2 + $0x178] sm:$0xff] }
 0x183   :  { %782 = vmatprep.subr.bf16.mxu0 %v4419_v61  ;;  %822 = vmatpush1.bf16.msra.mxu1 %v4422_v56  ;;  %v4443_v61 = vld [vmem:[#allocation2 + $0x168] sm:$0xff]  ;;  %v4446_v56 = vld [vmem:[#allocation2 + $0x150] sm:$0xff]  ;;  %6183 = vst [vmem:[#allocation113_spill] sm:$0xff] %v4448_v40 }
 0x184   :  { %823 = vmatprep.subr.bf16.mxu1 %v4424_v36  ;;  %6181 = vst [vmem:[#allocation111_spill] sm:$0xff] %v4443_v61  ;;  %6182 = vst [vmem:[#allocation112_spill] sm:$0xff] %v4446_v56  ;;  %v4452_v36 = vld [vmem:[#allocation2 + $0x160] sm:$0xff] }
 0x185   :  { %6184 = vst [vmem:[#allocation114_spill] sm:$0xff] %v4452_v36 }
 0x186   :  { %783 = vmatpush1.bf16.msra.mxu0 %v4428_v51  ;;  %v4460_v51 = vld [vmem:[#allocation2 + $0x198] sm:$0xff] }
 0x187   :  { %784 = vmatprep.subr.bf16.mxu0 %v4431_v58  ;;  %824 = vmatpush1.bf16.msra.mxu1 %v4434_v52  ;;  %v4455_v58 = vld [vmem:[#allocation2 + $0x188] sm:$0xff]  ;;  %v4458_v52 = vld [vmem:[#allocation2 + $0x170] sm:$0xff]  ;;  %6187 = vst [vmem:[#allocation117_spill] sm:$0xff] %v4460_v51 }
 0x188   :  { %825 = vmatprep.subr.bf16.mxu1 %v4436_v29  ;;  %6185 = vst [vmem:[#allocation115_spill] sm:$0xff] %v4455_v58  ;;  %6186 = vst [vmem:[#allocation116_spill] sm:$0xff] %v4458_v52  ;;  %v4464_v29 = vld [vmem:[#allocation2 + $0x180] sm:$0xff] }
 0x189   :  { %6188 = vst [vmem:[#allocation118_spill] sm:$0xff] %v4464_v29 }
 0x18a   :  { %785 = vmatpush1.bf16.msra.mxu0 %v4440_v62  ;;  %v4472_v62 = vld [vmem:[#allocation2 + $0x1b8] sm:$0xff] }
 0x18b   :  { %786 = vmatprep.subr.bf16.mxu0 %v4443_v61  ;;  %826 = vmatpush1.bf16.msra.mxu1 %v4446_v56  ;;  %v4467_v61 = vld [vmem:[#allocation2 + $0x1a8] sm:$0xff]  ;;  %v4470_v56 = vld [vmem:[#allocation2 + $0x190] sm:$0xff]  ;;  %6191 = vst [vmem:[#allocation121_spill] sm:$0xff] %v4472_v62 }
 0x18c   :  { %827 = vmatprep.subr.bf16.mxu1 %v4448_v40  ;;  %6189 = vst [vmem:[#allocation119_spill] sm:$0xff] %v4467_v61  ;;  %6190 = vst [vmem:[#allocation120_spill] sm:$0xff] %v4470_v56  ;;  %v4476_v40 = vld [vmem:[#allocation2 + $0x1a0] sm:$0xff] }
 0x18d   :  { %6192 = vst [vmem:[#allocation122_spill] sm:$0xff] %v4476_v40 }
 0x18e   :  { %787 = vmatpush1.bf16.msra.mxu0 %v4452_v36  ;;  %v4484_v36 = vld [vmem:[#allocation2 + $0x1d8] sm:$0xff] }
 0x18f   :  { %788 = vmatprep.subr.bf16.mxu0 %v4455_v58  ;;  %828 = vmatpush1.bf16.msra.mxu1 %v4458_v52  ;;  %v4479_v58 = vld [vmem:[#allocation2 + $0x1c8] sm:$0xff]  ;;  %v4482_v52 = vld [vmem:[#allocation2 + $0x1b0] sm:$0xff]  ;;  %6195 = vst [vmem:[#allocation125_spill] sm:$0xff] %v4484_v36 }
 0x190   :  { %829 = vmatprep.subr.bf16.mxu1 %v4460_v51  ;;  %6193 = vst [vmem:[#allocation123_spill] sm:$0xff] %v4479_v58  ;;  %6194 = vst [vmem:[#allocation124_spill] sm:$0xff] %v4482_v52  ;;  %v4488_v51 = vld [vmem:[#allocation2 + $0x1c0] sm:$0xff] }
 0x191   :  { %6196 = vst [vmem:[#allocation126_spill] sm:$0xff] %v4488_v51 }
 0x192   :  { %789 = vmatpush1.bf16.msra.mxu0 %v4464_v29  ;;  %v4496_v29 = vld [vmem:[#allocation2 + $0x1f8] sm:$0xff] }
 0x193   :  { %790 = vmatprep.subr.bf16.mxu0 %v4467_v61  ;;  %830 = vmatpush1.bf16.msra.mxu1 %v4470_v56  ;;  %v4491_v61 = vld [vmem:[#allocation2 + $0x1e8] sm:$0xff]  ;;  %v4494_v56 = vld [vmem:[#allocation2 + $0x1d0] sm:$0xff]  ;;  %6199 = vst [vmem:[#allocation129_spill] sm:$0xff] %v4496_v29 }
 0x194   :  { %831 = vmatprep.subr.bf16.mxu1 %v4472_v62  ;;  %6197 = vst [vmem:[#allocation127_spill] sm:$0xff] %v4491_v61  ;;  %6198 = vst [vmem:[#allocation128_spill] sm:$0xff] %v4494_v56  ;;  %v4500_v62 = vld [vmem:[#allocation2 + $0x1e0] sm:$0xff] }
 0x195   :  { %6200 = vst [vmem:[#allocation130_spill] sm:$0xff] %v4500_v62 }
 0x196   :  { %791 = vmatpush1.bf16.msra.mxu0 %v4476_v40 }
 0x197   :  { %792 = vmatprep.subr.bf16.mxu0 %v4479_v58  ;;  %832 = vmatpush1.bf16.msra.mxu1 %v4482_v52  ;;  %v4504_v58 = vld [vmem:[#allocation2 + $0x1f0] sm:$0xff]  ;;  %v4508_v52 = vpack.c.bf16 %v4312_v44, %v4312_v44 }
 0x198   :  { %833 = vmatprep.subr.bf16.mxu1 %v4484_v36  ;;  %6201 = vst [vmem:[#allocation131_spill] sm:$0xff] %v4504_v58 }
 0x19a   :  { %793 = vmatpush1.bf16.msra.mxu0 %v4488_v51 }
 0x19b   :  { %794 = vmatprep.subr.bf16.mxu0 %v4491_v61  ;;  %834 = vmatpush1.bf16.msra.mxu1 %v4494_v56 }
 0x19c   :  { %835 = vmatprep.subr.bf16.mxu1 %v4496_v29 }
 0x19e   :  { %795 = vmatpush1.bf16.msra.mxu0 %v4500_v62 }
 0x19f   :  { %836 = vmatpush1.bf16.msra.mxu1 %v4504_v58 }
 0x1a0   :  { %956 = vmatprep.subr.bf16.mxu1 %v4069_v18 }
 0x1a1   :  { %797 = vmatmul.mubr.bf16.vlgmr.msra.gmra.mrb[4].mxu0 %v4508_v52 }
 0x1a2   :  { %838 = vmatmul.mubr.bf16.vlgmr.msra.gmra.mrb[4].mxu1 %v4508_v52 }
 0x274   :  { %v798_v61 = vpop.f32.mrb[4].mxu0 }
 0x275   :  { %v799_v51 = vadd.f32 %v798_v61, %v4218_v16  ;;  %v800_v56 = vpop.f32.mrb[5].mxu0  ;;  %v839_v36 = vpop.f32.mrb[4].mxu1 }
 0x276   :  { %v801_v29 = vadd.f32 %v800_v56, %v4280_v46  ;;  %v802_v40 = vpop.f32.mrb[6].mxu0  ;;  %v841_v30 = vpop.f32.mrb[5].mxu1  ;;  %v840_v55 = vadd.f32 %v839_v36, %v4283_v43 }
 0x277   :  { %v846_v54 = vmul.f32 0.5, %v799_v51  ;;  %v803_v44 = vpop.f32.mrb[7].mxu0  ;;  %v843_v62 = vpop.f32.mrb[6].mxu1  ;;  %v842_v63 = vadd.f32 %v841_v30, %v4286_v60  ;;  %v4526_v30 = vpack.c.bf16 %v3987_v1, %v3982_v0 }
 0x278   :  { %v850_v17 = vmul.f32 0.5, %v801_v29  ;;  %v844_v58 = vpop.f32.mrb[7].mxu1 }
 0x279   :  { %3717 = vtanh.f32 %v846_v54  ;;  %v855_v32 = vmul.f32 0.5, %v842_v63 }
 0x27a   :  { %3719 = vtanh.f32 %v850_v17 }
 0x27b   :  { %3721 = vtanh.f32 %v840_v55 }
 0x27c   :  { %3723 = vtanh.f32 %v855_v32 }
 0x283   :  { %v3718_v61 = vpop.eup %3717 }
 0x284   :  { %v3720_v16 = vpop.eup %3719  ;;  %v848_v48 = vmul.f32 0.5, %v3718_v61 }
 0x285   :  { %v3722_v35 = vpop.eup %3721  ;;  %v852_v56 = vmul.f32 0.5, %v3720_v16 }
 0x286   :  { %v849_v40 = vadd.f32 0.5, %v848_v48  ;;  %v3724_v58 = vpop.eup %3723 }
 0x287   :  { %v853_v51 = vadd.f32 0.5, %v852_v56  ;;  %v857_v17 = vmul.f32 0.5, %v3724_v58 }
 0x288   :  { %v860_v44 = vmul.f32 %v3722_v35, %v849_v40 }
 0x289   :  { %v859_v36 = vmul.f32 %v853_v51, %v4306_v59  ;;  %v858_v54 = vadd.f32 0.5, %v857_v17 }
 0x28b   :  { %v4519_v62 = vadd.f32 %v860_v44, %v859_v36 }
 0x28d   :  { %6202 = vst [vmem:[#allocation132_spill] sm:$0xff] %v4519_v62  ;;  %3725 = vtanh.f32 %v4519_v62 }
 0x297   :  { %v3726_v55 = vpop.eup %3725 }
 0x298   :  { %v4522_v63 = vmul.f32 %v3726_v55, %v858_v54 }
 0x299   :  { %3893 = dma.done.wait [#allocation4 + $0x1], 2048 }
 0x29a   :  { %3894 = vsyncadd [#allocation4 + $0x1], 4294965248  ;;  %988 = vmatprep.mubr.bf16.mxu1 %v4508_v52  ;;  %v6050_v16 = vmov 0.0|0.0   ;;  %v4534_v59 = vpack.c.bf16 %v3997_v3, %v3992_v2  ;;  %957 = vmatpush1.bf16.msra.mxu1 %v4071_v19  ;;  %vm3907_vm0 = vmmov 0   ;;  %v6048_v0 = vmov 0.0   ;;  %v6213_v35 = vld [vmem:[#allocation42_spill] sm:$0xff] }
 0x29b   :  { %3405 = vmatprep.subr.bf16.mxu0 %v6050_v16  ;;  %3157 = vmatprep.mubr.msk.f32.mxu0 %vm3907_vm0, %v6048_v0  ;;  %v4544_v1 = vpack.c.bf16 %v4007_v5, %v4002_v4  ;;  %v4552_v2 = vpack.c.bf16 %v4017_v7, %v4012_v6  ;;  %v4560_v3 = vpack.c.bf16 %v4027_v9, %v4022_v8  ;;  %v6203_v7 = vld [vmem:[#allocation32_spill] sm:$0xff]  ;;  %v6204_v8 = vld [vmem:[#allocation18_spill] sm:$0xff]  ;;  %v6214_v32 = vld [vmem:[#allocation23_spill] sm:$0xff] }
 0x29c   :  { %3407 = vmatpush3.bf16.msra.mxu0 %v4526_v30  ;;  %958 = vmatprep.subr.bf16.mxu1 %v4074_v20  ;;  %v4568_v4 = vpack.c.bf16 %v4037_v11, %v4032_v10  ;;  %v4576_v5 = vpack.c.bf16 %v4047_v13, %v4042_v12  ;;  %v4584_v6 = vpack.c.bf16 %v4057_v15, %v4052_v14  ;;  %v6205_v9 = vld [vmem:[#allocation34_spill] sm:$0xff]  ;;  %v6206_v10 = vld [vmem:[#allocation19_spill] sm:$0xff]  ;;  %v6208_v12 = vld [vmem:[#allocation20_spill] sm:$0xff] }
 0x29d   :  { %3408 = vmatprep.subr.bf16.mxu0 %v6050_v16  ;;  %v6207_v11 = vld [vmem:[#allocation35_spill] sm:$0xff]  ;;  %v6209_v13 = vld [vmem:[#allocation38_spill] sm:$0xff]  ;;  %v6210_v14 = vld [vmem:[#allocation21_spill] sm:$0xff] }
 0x29e   :  { %959 = vmatpush1.bf16.msra.mxu1 %v4079_v22  ;;  %v6211_v15 = vld [vmem:[#allocation40_spill] sm:$0xff]  ;;  %v6215_v48 = vld [vmem:[#allocation45_spill] sm:$0xff]  ;;  %v6217_v61 = vld [vmem:[#allocation47_spill] sm:$0xff] }
 0x29f   :  { %960 = vmatprep.subr.bf16.mxu1 %v4084_v24  ;;  %v6216_v29 = vld [vmem:[#allocation24_spill] sm:$0xff]  ;;  %v6218_v56 = vld [vmem:[#allocation25_spill] sm:$0xff]  ;;  %v6220_v51 = vld [vmem:[#allocation26_spill] sm:$0xff] }
 0x2a0   :  { %3410 = vmatpush3.bf16.msra.mxu0 %v4534_v59  ;;  %v6219_v40 = vld [vmem:[#allocation49_spill] sm:$0xff]  ;;  %v6221_v44 = vld [vmem:[#allocation51_spill] sm:$0xff]  ;;  %v6224_v17 = vld [vmem:[#allocation28_spill] sm:$0xff] }
 0x2a1   :  { %3411 = vmatprep.subr.bf16.mxu0 %v6050_v16  ;;  %v6222_v36 = vld [vmem:[#allocation27_spill] sm:$0xff]  ;;  %v6223_v58 = vld [vmem:[#allocation53_spill] sm:$0xff] }
 0x2a2   :  { %961 = vmatpush1.bf16.msra.mxu1 %v4094_v27  ;;  %v6225_v54 = vld [vmem:[#allocation55_spill] sm:$0xff]  ;;  %v6226_v55 = vld [vmem:[#allocation29_spill] sm:$0xff] }
 0x2a3   :  { %962 = vmatprep.subr.bf16.mxu1 %v4097_v28  ;;  %v6227_v0 = vld [vmem:[#allocation57_spill] sm:$0xff] }
 0x2a4   :  { %3413 = vmatpush3.bf16.msra.mxu0 %v4544_v1 }
 0x2a5   :  { %3414 = vmatprep.subr.bf16.mxu0 %v6050_v16 }
 0x2a6   :  { %963 = vmatpush1.bf16.msra.mxu1 %v4106_v31 }
 0x2a7   :  { %964 = vmatprep.subr.bf16.mxu1 %v4111_v33 }
 0x2a8   :  { %3416 = vmatpush3.bf16.msra.mxu0 %v4552_v2 }
 0x2a9   :  { %3417 = vmatprep.subr.bf16.mxu0 %v6050_v16 }
 0x2aa   :  { %965 = vmatpush1.bf16.msra.mxu1 %v4114_v34 }
 0x2ab   :  { %966 = vmatprep.subr.bf16.mxu1 %v4123_v37 }
 0x2ac   :  { %3419 = vmatpush3.bf16.msra.mxu0 %v4560_v3 }
 0x2ad   :  { %3420 = vmatprep.subr.bf16.mxu0 %v6050_v16 }
 0x2ae   :  { %967 = vmatpush1.bf16.msra.mxu1 %v4130_v39 }
 0x2af   :  { %968 = vmatprep.subr.bf16.mxu1 %v4135_v41 }
 0x2b0   :  { %3422 = vmatpush3.bf16.msra.mxu0 %v4568_v4 }
 0x2b1   :  { %3423 = vmatprep.subr.bf16.mxu0 %v6050_v16 }
 0x2b2   :  { %969 = vmatpush1.bf16.msra.mxu1 %v4138_v42 }
 0x2b3   :  { %970 = vmatprep.subr.bf16.mxu1 %v4147_v45 }
 0x2b4   :  { %3425 = vmatpush3.bf16.msra.mxu0 %v4576_v5 }
 0x2b5   :  { %3426 = vmatprep.subr.bf16.mxu0 %v6050_v16  ;;  %v6228_v16 = vld [vmem:[#allocation30_spill] sm:$0xff] }
 0x2b6   :  { %971 = vmatpush1.bf16.msra.mxu1 %v4154_v47 }
 0x2b7   :  { %972 = vmatprep.subr.bf16.mxu1 %v4159_v49 }
 0x2b8   :  { %3428 = vmatpush3.bf16.msra.mxu0 %v4584_v6 }
 0x2b9   :  { %997 = vmatprep.subr.bf16.mxu0 %v4077_v21 }
 0x2ba   :  { %973 = vmatpush1.bf16.msra.mxu1 %v4162_v50 }
 0x2bb   :  { %3158 = vmatmul.mubr.f32.vlgmr.msra.gmra.mrb[8].mxu0 %v4522_v63  ;;  %974 = vmatprep.subr.bf16.mxu1 %v4171_v53 }
 0x2bc   :  { %998 = vmatpush1.bf16.msra.mxu0 %v4081_v23  ;;  %1029 = vmatprep.mubr.bf16.mxu0 %v4508_v52  ;;  %v6212_v52 = vld [vmem:[#allocation22_spill] sm:$0xff] }
 0x2bd   :  { %999 = vmatprep.subr.bf16.mxu0 %v4087_v25 }
 0x2be   :  { %975 = vmatpush1.bf16.msra.mxu1 %v6203_v7 }
 0x2bf   :  { %976 = vmatprep.subr.bf16.mxu1 %v6205_v9 }
 0x2c0   :  { %1000 = vmatpush1.bf16.msra.mxu0 %v4090_v26 }
 0x2c1   :  { %1001 = vmatprep.subr.bf16.mxu0 %v6204_v8 }
 0x2c2   :  { %977 = vmatpush1.bf16.msra.mxu1 %v6207_v11 }
 0x2c3   :  { %978 = vmatprep.subr.bf16.mxu1 %v6209_v13 }
 0x2c4   :  { %1002 = vmatpush1.bf16.msra.mxu0 %v6206_v10  ;;  %v6245_v10 = vld [vmem:[#allocation58_spill] sm:$0xff] }
 0x2c5   :  { %1003 = vmatprep.subr.bf16.mxu0 %v6208_v12  ;;  %v6239_v12 = vld [vmem:[#allocation52_spill] sm:$0xff] }
 0x2c6   :  { %979 = vmatpush1.bf16.msra.mxu1 %v6211_v15 }
 0x2c7   :  { %980 = vmatprep.subr.bf16.mxu1 %v6213_v35 }
 0x2c8   :  { %1004 = vmatpush1.bf16.msra.mxu0 %v6210_v14  ;;  %v6237_v14 = vld [vmem:[#allocation48_spill] sm:$0xff] }
 0x2c9   :  { %1005 = vmatprep.subr.bf16.mxu0 %v6212_v52  ;;  %v6235_v52 = vld [vmem:[#allocation44_spill] sm:$0xff] }
 0x2ca   :  { %981 = vmatpush1.bf16.msra.mxu1 %v6215_v48 }
 0x2cb   :  { %982 = vmatprep.subr.bf16.mxu1 %v6217_v61 }
 0x2cc   :  { %1006 = vmatpush1.bf16.msra.mxu0 %v6214_v32  ;;  %v6233_v32 = vld [vmem:[#allocation39_spill] sm:$0xff] }
 0x2cd   :  { %1007 = vmatprep.subr.bf16.mxu0 %v6216_v29  ;;  %v6231_v29 = vld [vmem:[#allocation36_spill] sm:$0xff] }
 0x2ce   :  { %983 = vmatpush1.bf16.msra.mxu1 %v6219_v40 }
 0x2cf   :  { %984 = vmatprep.subr.bf16.mxu1 %v6221_v44 }
 0x2d0   :  { %1008 = vmatpush1.bf16.msra.mxu0 %v6218_v56  ;;  %v6229_v56 = vld [vmem:[#allocation31_spill] sm:$0xff] }
 0x2d1   :  { %1009 = vmatprep.subr.bf16.mxu0 %v6220_v51  ;;  %v6230_v51 = vld [vmem:[#allocation33_spill] sm:$0xff] }
 0x2d2   :  { %985 = vmatpush1.bf16.msra.mxu1 %v6223_v58 }
 0x2d3   :  { %986 = vmatprep.subr.bf16.mxu1 %v6225_v54 }
 0x2d4   :  { %1010 = vmatpush1.bf16.msra.mxu0 %v6222_v36  ;;  %v6232_v36 = vld [vmem:[#allocation37_spill] sm:$0xff] }
 0x2d5   :  { %1011 = vmatprep.subr.bf16.mxu0 %v6224_v17  ;;  %v6234_v17 = vld [vmem:[#allocation41_spill] sm:$0xff] }
 0x2d6   :  { %987 = vmatpush1.bf16.msra.mxu1 %v6227_v0 }
 0x2d7   :  { %1058 = vmatprep.subr.bf16.mxu1 %v4316_v38 }
 0x2d8   :  { %1012 = vmatpush1.bf16.msra.mxu0 %v6226_v55  ;;  %v6236_v55 = vld [vmem:[#allocation46_spill] sm:$0xff] }
 0x2d9   :  { %1013 = vmatprep.subr.bf16.mxu0 %v6228_v16  ;;  %v6238_v16 = vld [vmem:[#allocation50_spill] sm:$0xff] }
 0x2dc   :  { %1014 = vmatpush1.bf16.msra.mxu0 %v6229_v56  ;;  %v6240_v56 = vld [vmem:[#allocation54_spill] sm:$0xff] }
 0x2dd   :  { %1015 = vmatprep.subr.bf16.mxu0 %v6230_v51  ;;  %v6241_v51 = vld [vmem:[#allocation56_spill] sm:$0xff] }
 0x2e0   :  { %1016 = vmatpush1.bf16.msra.mxu0 %v6231_v29  ;;  %v6242_v29 = vld [vmem:[#allocation59_spill] sm:$0xff] }
 0x2e1   :  { %1017 = vmatprep.subr.bf16.mxu0 %v6232_v36  ;;  %v6243_v36 = vld [vmem:[#allocation60_spill] sm:$0xff] }
 0x2e4   :  { %1018 = vmatpush1.bf16.msra.mxu0 %v6233_v32 }
 0x2e5   :  { %1019 = vmatprep.subr.bf16.mxu0 %v6234_v17 }
 0x2e8   :  { %1020 = vmatpush1.bf16.msra.mxu0 %v6235_v52  ;;  %v6244_v52 = vld [vmem:[#allocation13_spill] sm:$0xff] }
 0x2e9   :  { %1021 = vmatprep.subr.bf16.mxu0 %v6236_v55 }
 0x2ec   :  { %1022 = vmatpush1.bf16.msra.mxu0 %v6237_v14 }
 0x2ed   :  { %1023 = vmatprep.subr.bf16.mxu0 %v6238_v16 }
 0x2f0   :  { %1024 = vmatpush1.bf16.msra.mxu0 %v6239_v12 }
 0x2f1   :  { %1025 = vmatprep.subr.bf16.mxu0 %v6240_v56  ;;  %v6255_v56 = vld [vmem:[#allocation78_spill] sm:$0xff] }
 0x2f4   :  { %1026 = vmatpush1.bf16.msra.mxu0 %v6241_v51 }
 0x2f5   :  { %1027 = vmatprep.subr.bf16.mxu0 %v6242_v29  ;;  %v6249_v29 = vld [vmem:[#allocation70_spill] sm:$0xff] }
 0x2f8   :  { %1028 = vmatpush1.bf16.msra.mxu0 %v6243_v36  ;;  %v6247_v36 = vld [vmem:[#allocation69_spill] sm:$0xff] }
 0x2f9   :  { %1099 = vmatprep.subr.bf16.mxu0 %v4323_v57  ;;  %v6248_v57 = vld [vmem:[#allocation72_spill] sm:$0xff] }
 0x38e   :  { %v949_v17 = vpop.f32.mrb[8].mxu0 }
 0x38f   :  { %v950_v32 = vadd.f32 %v6244_v52, %v949_v17  ;;  %v3159_v55 = vpop.f32.mrb[9].mxu0  ;;  %v6250_v17 = vld [vmem:[#allocation73_spill] sm:$0xff] }
 0x390   :  { %v6253_v55 = vld [vmem:[#allocation75_spill] sm:$0xff]  ;;  %v6254_v52 = vld [vmem:[#allocation77_spill] sm:$0xff] }
 0x391   :  { %v4645_v14 = vadd.f32 %v950_v32, %v6245_v10  ;;  %v6251_v10 = vld [vmem:[#allocation74_spill] sm:$0xff]  ;;  %v6252_v32 = vld [vmem:[#allocation76_spill] sm:$0xff] }
 0x393   :  { %6246 = vst [vmem:[#allocation32_spill] sm:$0xff] %v4645_v14  ;;  %954 = vst [vmem:[%s5828_s10] sm:$0xff] %v4645_v14  ;;  %v955_v51 = vpack.c.bf16 %v4645_v14, %v4645_v14  ;;  %v6256_v14 = vld [vmem:[#allocation80_spill] sm:$0xff] }
 0x395   :  { %989 = vmatmul.mubr.bf16.vlgmr.msra.gmra.mrb[8].mxu1 %v955_v51  ;;  %1030 = vmatmul.mubr.bf16.vlgmr.msra.gmra.mrb[12].mxu0 %v955_v51  ;;  %v6257_v51 = vld [vmem:[#allocation79_spill] sm:$0xff] }
 0x396   :  { %1059 = vmatpush1.bf16.msra.mxu1 %v6247_v36  ;;  %1100 = vmatpush1.bf16.msra.mxu0 %v6248_v57  ;;  %v6258_v36 = vld [vmem:[#allocation81_spill] sm:$0xff]  ;;  %v6259_v57 = vld [vmem:[#allocation82_spill] sm:$0xff] }
 0x397   :  { %1060 = vmatprep.subr.bf16.mxu1 %v6249_v29  ;;  %1101 = vmatprep.subr.bf16.mxu0 %v6250_v17  ;;  %v6260_v29 = vld [vmem:[#allocation84_spill] sm:$0xff]  ;;  %v6261_v17 = vld [vmem:[#allocation83_spill] sm:$0xff] }
 0x39a   :  { %1061 = vmatpush1.bf16.msra.mxu1 %v6251_v10  ;;  %1102 = vmatpush1.bf16.msra.mxu0 %v6252_v32  ;;  %v6262_v10 = vld [vmem:[#allocation85_spill] sm:$0xff]  ;;  %v6263_v32 = vld [vmem:[#allocation86_spill] sm:$0xff] }
 0x39b   :  { %1062 = vmatprep.subr.bf16.mxu1 %v6253_v55  ;;  %1103 = vmatprep.subr.bf16.mxu0 %v6254_v52  ;;  %v6264_v55 = vld [vmem:[#allocation88_spill] sm:$0xff]  ;;  %v6265_v52 = vld [vmem:[#allocation87_spill] sm:$0xff] }
 0x39e   :  { %1063 = vmatpush1.bf16.msra.mxu1 %v6255_v56  ;;  %1104 = vmatpush1.bf16.msra.mxu0 %v6256_v14  ;;  %v6266_v56 = vld [vmem:[#allocation89_spill] sm:$0xff]  ;;  %v6267_v14 = vld [vmem:[#allocation90_spill] sm:$0xff] }
 0x39f   :  { %1064 = vmatprep.subr.bf16.mxu1 %v6257_v51  ;;  %1105 = vmatprep.subr.bf16.mxu0 %v6258_v36  ;;  %v6268_v51 = vld [vmem:[#allocation92_spill] sm:$0xff]  ;;  %v6269_v36 = vld [vmem:[#allocation91_spill] sm:$0xff] }
 0x3a2   :  { %1065 = vmatpush1.bf16.msra.mxu1 %v6259_v57  ;;  %1106 = vmatpush1.bf16.msra.mxu0 %v6260_v29  ;;  %v6270_v57 = vld [vmem:[#allocation93_spill] sm:$0xff]  ;;  %v6271_v29 = vld [vmem:[#allocation94_spill] sm:$0xff] }
 0x3a3   :  { %1066 = vmatprep.subr.bf16.mxu1 %v6261_v17  ;;  %1107 = vmatprep.subr.bf16.mxu0 %v6262_v10  ;;  %v6272_v17 = vld [vmem:[#allocation96_spill] sm:$0xff]  ;;  %v6273_v10 = vld [vmem:[#allocation95_spill] sm:$0xff] }
 0x3a6   :  { %1067 = vmatpush1.bf16.msra.mxu1 %v6263_v32  ;;  %1108 = vmatpush1.bf16.msra.mxu0 %v6264_v55  ;;  %v6274_v32 = vld [vmem:[#allocation97_spill] sm:$0xff]  ;;  %v6275_v55 = vld [vmem:[#allocation98_spill] sm:$0xff] }
 0x3a7   :  { %1068 = vmatprep.subr.bf16.mxu1 %v6265_v52  ;;  %1109 = vmatprep.subr.bf16.mxu0 %v6266_v56  ;;  %v6276_v52 = vld [vmem:[#allocation100_spill] sm:$0xff]  ;;  %v6277_v56 = vld [vmem:[#allocation99_spill] sm:$0xff] }
 0x3aa   :  { %1069 = vmatpush1.bf16.msra.mxu1 %v6267_v14  ;;  %1110 = vmatpush1.bf16.msra.mxu0 %v6268_v51  ;;  %v6278_v14 = vld [vmem:[#allocation101_spill] sm:$0xff]  ;;  %v6279_v51 = vld [vmem:[#allocation102_spill] sm:$0xff] }
 0x3ab   :  { %1070 = vmatprep.subr.bf16.mxu1 %v6269_v36  ;;  %1111 = vmatprep.subr.bf16.mxu0 %v6270_v57  ;;  %v6280_v36 = vld [vmem:[#allocation104_spill] sm:$0xff]  ;;  %v6281_v57 = vld [vmem:[#allocation103_spill] sm:$0xff] }
 0x3ae   :  { %1071 = vmatpush1.bf16.msra.mxu1 %v6271_v29  ;;  %1112 = vmatpush1.bf16.msra.mxu0 %v6272_v17  ;;  %v6282_v29 = vld [vmem:[#allocation105_spill] sm:$0xff]  ;;  %v6283_v17 = vld [vmem:[#allocation106_spill] sm:$0xff] }
 0x3af   :  { %1072 = vmatprep.subr.bf16.mxu1 %v6273_v10  ;;  %1113 = vmatprep.subr.bf16.mxu0 %v6274_v32  ;;  %v6284_v10 = vld [vmem:[#allocation108_spill] sm:$0xff]  ;;  %v6285_v32 = vld [vmem:[#allocation107_spill] sm:$0xff] }
 0x3b2   :  { %1073 = vmatpush1.bf16.msra.mxu1 %v6275_v55  ;;  %1114 = vmatpush1.bf16.msra.mxu0 %v6276_v52  ;;  %v6286_v55 = vld [vmem:[#allocation109_spill] sm:$0xff]  ;;  %v6287_v52 = vld [vmem:[#allocation110_spill] sm:$0xff] }
 0x3b3   :  { %1074 = vmatprep.subr.bf16.mxu1 %v6277_v56  ;;  %1115 = vmatprep.subr.bf16.mxu0 %v6278_v14  ;;  %v6288_v56 = vld [vmem:[#allocation112_spill] sm:$0xff]  ;;  %v6289_v14 = vld [vmem:[#allocation111_spill] sm:$0xff] }
 0x3b6   :  { %1075 = vmatpush1.bf16.msra.mxu1 %v6279_v51  ;;  %1116 = vmatpush1.bf16.msra.mxu0 %v6280_v36  ;;  %v6290_v51 = vld [vmem:[#allocation113_spill] sm:$0xff]  ;;  %v6291_v36 = vld [vmem:[#allocation114_spill] sm:$0xff] }
 0x3b7   :  { %1076 = vmatprep.subr.bf16.mxu1 %v6281_v57  ;;  %1117 = vmatprep.subr.bf16.mxu0 %v6282_v29  ;;  %v6292_v57 = vld [vmem:[#allocation116_spill] sm:$0xff]  ;;  %v6293_v29 = vld [vmem:[#allocation115_spill] sm:$0xff] }
 0x3ba   :  { %1077 = vmatpush1.bf16.msra.mxu1 %v6283_v17  ;;  %1118 = vmatpush1.bf16.msra.mxu0 %v6284_v10  ;;  %v6294_v17 = vld [vmem:[#allocation117_spill] sm:$0xff]  ;;  %v6295_v10 = vld [vmem:[#allocation118_spill] sm:$0xff] }
 0x3bb   :  { %1078 = vmatprep.subr.bf16.mxu1 %v6285_v32  ;;  %1119 = vmatprep.subr.bf16.mxu0 %v6286_v55  ;;  %v6296_v32 = vld [vmem:[#allocation120_spill] sm:$0xff]  ;;  %v6297_v55 = vld [vmem:[#allocation119_spill] sm:$0xff] }
 0x3be   :  { %1079 = vmatpush1.bf16.msra.mxu1 %v6287_v52  ;;  %1120 = vmatpush1.bf16.msra.mxu0 %v6288_v56  ;;  %v6298_v52 = vld [vmem:[#allocation121_spill] sm:$0xff]  ;;  %v6299_v56 = vld [vmem:[#allocation122_spill] sm:$0xff] }
 0x3bf   :  { %1080 = vmatprep.subr.bf16.mxu1 %v6289_v14  ;;  %1121 = vmatprep.subr.bf16.mxu0 %v6290_v51  ;;  %v6300_v14 = vld [vmem:[#allocation124_spill] sm:$0xff]  ;;  %v6301_v51 = vld [vmem:[#allocation123_spill] sm:$0xff] }
 0x3c2   :  { %1081 = vmatpush1.bf16.msra.mxu1 %v6291_v36  ;;  %1122 = vmatpush1.bf16.msra.mxu0 %v6292_v57  ;;  %v6302_v36 = vld [vmem:[#allocation125_spill] sm:$0xff]  ;;  %v6303_v57 = vld [vmem:[#allocation126_spill] sm:$0xff] }
 0x3c3   :  { %1082 = vmatprep.subr.bf16.mxu1 %v6293_v29  ;;  %1123 = vmatprep.subr.bf16.mxu0 %v6294_v17  ;;  %v6304_v29 = vld [vmem:[#allocation128_spill] sm:$0xff]  ;;  %v6305_v17 = vld [vmem:[#allocation127_spill] sm:$0xff] }
 0x3c6   :  { %1083 = vmatpush1.bf16.msra.mxu1 %v6295_v10  ;;  %1124 = vmatpush1.bf16.msra.mxu0 %v6296_v32  ;;  %v6306_v10 = vld [vmem:[#allocation129_spill] sm:$0xff]  ;;  %v6307_v32 = vld [vmem:[#allocation130_spill] sm:$0xff] }
 0x3c7   :  { %1084 = vmatprep.subr.bf16.mxu1 %v6297_v55  ;;  %1125 = vmatprep.subr.bf16.mxu0 %v6298_v52  ;;  %v6308_v55 = vld [vmem:[#allocation131_spill] sm:$0xff]  ;;  %v6309_v52 = vmov 0.0|0.0  }
 0x3ca   :  { %1085 = vmatpush1.bf16.msra.mxu1 %v6299_v56  ;;  %1126 = vmatpush1.bf16.msra.mxu0 %v6300_v14 }
 0x3cb   :  { %1086 = vmatprep.subr.bf16.mxu1 %v6301_v51  ;;  %1127 = vmatprep.subr.bf16.mxu0 %v6302_v36  ;;  %v1057_v51 = vpack.c.bf16 %v4522_v63, %v4522_v63  ;;  %v6313_v63 = vld [vmem:[#allocation66_spill] sm:$0xff] }
 0x3cd   :  { %1090 = vmatprep.mubr.bf16.mxu1 %v1057_v51  ;;  %1131 = vmatprep.mubr.bf16.mxu0 %v1057_v51 }
 0x3ce   :  { %1087 = vmatpush1.bf16.msra.mxu1 %v6303_v57  ;;  %1128 = vmatpush1.bf16.msra.mxu0 %v6304_v29  ;;  %v6310_v29 = vld [vmem:[#allocation63_spill] sm:$0xff] }
 0x3cf   :  { %1088 = vmatprep.subr.bf16.mxu1 %v6305_v17  ;;  %1129 = vmatprep.subr.bf16.mxu0 %v6306_v10  ;;  %v6311_v10 = vld [vmem:[#allocation64_spill] sm:$0xff] }
 0x3d2   :  { %1089 = vmatpush1.bf16.msra.mxu1 %v6307_v32  ;;  %1130 = vmatpush1.bf16.msra.mxu0 %v6308_v55 }
 0x3d3   :  { %3429 = vmatprep.subr.bf16.mxu1 %v6309_v52  ;;  %1232 = vmatprep.subr.bf16.mxu0 %v4069_v18  ;;  %v6312_v18 = vld [vmem:[#allocation65_spill] sm:$0xff] }
 0x468   :  { %v990_v57 = vpop.f32.mrb[8].mxu1  ;;  %v1031_v36 = vpop.f32.mrb[12].mxu0 }
 0x469   :  { %v991_v14 = vadd.f32 %v990_v57, %v6310_v29  ;;  %v992_v17 = vpop.f32.mrb[9].mxu1  ;;  %v1033_v56 = vpop.f32.mrb[13].mxu0  ;;  %v1032_v23 = vadd.f32 %v1031_v36, %v6312_v18 }
 0x46a   :  { %v993_v12 = vadd.f32 %v992_v17, %v6311_v10  ;;  %v994_v32 = vpop.f32.mrb[10].mxu1  ;;  %v1035_v16 = vpop.f32.mrb[14].mxu0  ;;  %v1034_v51 = vadd.f32 %v1033_v56, %v6313_v63 }
 0x46b   :  { %v1038_v55 = vmul.f32 0.5, %v991_v14  ;;  %v995_v8 = vpop.f32.mrb[11].mxu1  ;;  %v1036_v26 = vpop.f32.mrb[15].mxu0 }
 0x46c   :  { %v1042_v25 = vmul.f32 0.5, %v993_v12  ;;  %v1047_v62 = vmul.f32 0.5, %v1034_v51  ;;  %v6314_v8 = vld [vmem:[#allocation67_spill] sm:$0xff] }
 0x46d   :  { %3727 = vtanh.f32 %v1038_v55 }
 0x46e   :  { %3729 = vtanh.f32 %v1042_v25 }
 0x46f   :  { %3731 = vtanh.f32 %v1032_v23 }
 0x470   :  { %3733 = vtanh.f32 %v1047_v62 }
 0x477   :  { %v3728_v60 = vpop.eup %3727 }
 0x478   :  { %v3730_v57 = vpop.eup %3729  ;;  %v1040_v29 = vmul.f32 0.5, %v3728_v60 }
 0x479   :  { %v1044_v43 = vmul.f32 0.5, %v3730_v57  ;;  %v3732_v32 = vpop.eup %3731 }
 0x47a   :  { %v1041_v17 = vadd.f32 0.5, %v1040_v29  ;;  %v3734_v25 = vpop.eup %3733  ;;  %v6316_v29 = vld [vmem:[#allocation43_spill] sm:$0xff] }
 0x47b   :  { %v1045_v16 = vadd.f32 0.5, %v1044_v43  ;;  %v1049_v23 = vmul.f32 0.5, %v3734_v25  ;;  %v6315_v43 = vmov 0.0  }
 0x47c   :  { %v1052_v14 = vmul.f32 %v3732_v32, %v1041_v17 }
 0x47d   :  { %v1051_v26 = vmul.f32 %v1045_v16, %v6314_v8  ;;  %v1050_v36 = vadd.f32 0.5, %v1049_v23 }
 0x47f   :  { %v4724_v12 = vadd.f32 %v1052_v14, %v1051_v26 }
 0x481   :  { %3735 = vtanh.f32 %v4724_v12 }
 0x48b   :  { %v3736_v56 = vpop.eup %3735 }
 0x48c   :  { %v1055_v55 = vmul.f32 %v3736_v56, %v1050_v36  ;;  %v6317_v56 = vld [vmem:[#allocation61_spill] sm:$0xff] }
 0x48e   :  { %v4727_v51 = vpack.c.bf16 %v1055_v55, %v1055_v55 }
 0x490   :  { %1091 = vmatmul.mubr.bf16.vlgmr.msra.gmra.mrb[12].mxu1 %v4727_v51  ;;  %1132 = vmatmul.mubr.bf16.vlgmr.msra.gmra.mrb[16].mxu0 %v4727_v51 }
 0x491   :  { %1264 = vmatprep.mubr.bf16.mxu0 %v4727_v51  ;;  %3431 = vmatpush3.bf16.msra.mxu1 %v4526_v30 }
 0x492   :  { %3432 = vmatprep.subr.bf16.mxu1 %v6309_v52  ;;  %3192 = vmatprep.mubr.msk.f32.mxu1 %vm3907_vm0, %v6315_v43 }
 0x493   :  { %1233 = vmatpush1.bf16.msra.mxu0 %v4071_v19 }
 0x494   :  { %1234 = vmatprep.subr.bf16.mxu0 %v4074_v20 }
 0x495   :  { %3434 = vmatpush3.bf16.msra.mxu1 %v4534_v59 }
 0x496   :  { %3435 = vmatprep.subr.bf16.mxu1 %v6309_v52 }
 0x497   :  { %1235 = vmatpush1.bf16.msra.mxu0 %v4079_v22 }
 0x498   :  { %1236 = vmatprep.subr.bf16.mxu0 %v4084_v24 }
 0x499   :  { %3437 = vmatpush3.bf16.msra.mxu1 %v4544_v1 }
 0x49a   :  { %3438 = vmatprep.subr.bf16.mxu1 %v6309_v52 }
 0x49b   :  { %1237 = vmatpush1.bf16.msra.mxu0 %v4094_v27 }
 0x49c   :  { %1238 = vmatprep.subr.bf16.mxu0 %v4097_v28 }
 0x49d   :  { %3440 = vmatpush3.bf16.msra.mxu1 %v4552_v2 }
 0x49e   :  { %3441 = vmatprep.subr.bf16.mxu1 %v6309_v52 }
 0x49f   :  { %1239 = vmatpush1.bf16.msra.mxu0 %v4106_v31 }
 0x4a0   :  { %1240 = vmatprep.subr.bf16.mxu0 %v4111_v33 }
 0x4a1   :  { %3443 = vmatpush3.bf16.msra.mxu1 %v4560_v3 }
 0x4a2   :  { %3444 = vmatprep.subr.bf16.mxu1 %v6309_v52 }
 0x4a3   :  { %1241 = vmatpush1.bf16.msra.mxu0 %v4114_v34 }
 0x4a4   :  { %1242 = vmatprep.subr.bf16.mxu0 %v4123_v37 }
 0x4a5   :  { %3446 = vmatpush3.bf16.msra.mxu1 %v4568_v4 }
 0x4a6   :  { %3447 = vmatprep.subr.bf16.mxu1 %v6309_v52 }
 0x4a7   :  { %1243 = vmatpush1.bf16.msra.mxu0 %v4130_v39 }
 0x4a8   :  { %1244 = vmatprep.subr.bf16.mxu0 %v4135_v41 }
 0x4a9   :  { %3449 = vmatpush3.bf16.msra.mxu1 %v4576_v5 }
 0x4aa   :  { %3450 = vmatprep.subr.bf16.mxu1 %v6309_v52 }
 0x4ab   :  { %1245 = vmatpush1.bf16.msra.mxu0 %v4138_v42 }
 0x4ac   :  { %1246 = vmatprep.subr.bf16.mxu0 %v4147_v45 }
 0x4ad   :  { %3452 = vmatpush3.bf16.msra.mxu1 %v4584_v6 }
 0x4ae   :  { %1273 = vmatprep.subr.bf16.mxu1 %v4077_v21 }
 0x4af   :  { %1247 = vmatpush1.bf16.msra.mxu0 %v4154_v47 }
 0x4b0   :  { %1248 = vmatprep.subr.bf16.mxu0 %v4159_v49 }
 0x4b3   :  { %1249 = vmatpush1.bf16.msra.mxu0 %v4162_v50 }
 0x4b4   :  { %1250 = vmatprep.subr.bf16.mxu0 %v4171_v53 }
 0x4b7   :  { %1251 = vmatpush1.bf16.msra.mxu0 %v6203_v7 }
 0x4b8   :  { %1252 = vmatprep.subr.bf16.mxu0 %v6205_v9 }
 0x4bb   :  { %1253 = vmatpush1.bf16.msra.mxu0 %v6207_v11 }
 0x4bc   :  { %1254 = vmatprep.subr.bf16.mxu0 %v6209_v13 }
 0x4bf   :  { %1255 = vmatpush1.bf16.msra.mxu0 %v6211_v15 }
 0x4c0   :  { %1256 = vmatprep.subr.bf16.mxu0 %v6213_v35 }
 0x4c3   :  { %1257 = vmatpush1.bf16.msra.mxu0 %v6215_v48 }
 0x4c4   :  { %1258 = vmatprep.subr.bf16.mxu0 %v6217_v61 }
 0x4c7   :  { %1259 = vmatpush1.bf16.msra.mxu0 %v6219_v40 }
 0x4c8   :  { %1260 = vmatprep.subr.bf16.mxu0 %v6221_v44 }
 0x4cb   :  { %1261 = vmatpush1.bf16.msra.mxu0 %v6223_v58 }
 0x4cc   :  { %1262 = vmatprep.subr.bf16.mxu0 %v6225_v54 }
 0x4cf   :  { %1263 = vmatpush1.bf16.msra.mxu0 %v6227_v0 }
 0x4d0   :  { %1334 = vmatprep.subr.bf16.mxu0 %v4316_v38  ;;  %v6318_v38 = vld [vmem:[#allocation62_spill] sm:$0xff] }
 0x563   :  { %v1092_v60 = vpop.f32.mrb[12].mxu1  ;;  %v1133_v62 = vpop.f32.mrb[16].mxu0 }
 0x564   :  { %v1093_v57 = vadd.f32 %v1092_v60, %v6316_v29  ;;  %v1094_v17 = vpop.f32.mrb[13].mxu1  ;;  %v1135_v32 = vpop.f32.mrb[17].mxu0  ;;  %v1134_v55 = vadd.f32 %v1133_v62, %v6317_v56 }
 0x565   :  { %v1095_v16 = vadd.f32 %v1094_v17, %v4280_v46  ;;  %v1096_v14 = vpop.f32.mrb[14].mxu1  ;;  %v1137_v8 = vpop.f32.mrb[18].mxu0  ;;  %v1136_v0 = vadd.f32 %v1135_v32, %v6318_v38 }
 0x566   :  { %v1140_v26 = vmul.f32 0.5, %v1093_v57  ;;  %v1097_v25 = vpop.f32.mrb[15].mxu1  ;;  %v1138_v23 = vpop.f32.mrb[19].mxu0 }
 0x567   :  { %v1144_v36 = vmul.f32 0.5, %v1095_v16  ;;  %v1149_v54 = vmul.f32 0.5, %v1136_v0  ;;  %v6319_v25 = vld [vmem:[#allocation132_spill] sm:$0xff] }
 0x568   :  { %3737 = vtanh.f32 %v1140_v26 }
 0x569   :  { %3739 = vtanh.f32 %v1144_v36 }
 0x56a   :  { %3741 = vtanh.f32 %v1134_v55  ;;  %v6324_v55 = vld [vmem:[#allocation19_spill] sm:$0xff] }
 0x56b   :  { %3743 = vtanh.f32 %v1149_v54  ;;  %v6321_v54 = vld [vmem:[#allocation16_spill] sm:$0xff] }
 0x572   :  { %v3738_v58 = vpop.eup %3737 }
 0x573   :  { %v3740_v60 = vpop.eup %3739  ;;  %v1142_v29 = vmul.f32 0.5, %v3738_v58  ;;  %v6320_v58 = vld [vmem:[#allocation15_spill] sm:$0xff] }
 0x574   :  { %v1146_v44 = vmul.f32 0.5, %v3740_v60  ;;  %v3742_v14 = vpop.eup %3741  ;;  %v6325_v60 = vld [vmem:[#allocation20_spill] sm:$0xff] }
 0x575   :  { %v1143_v17 = vadd.f32 0.5, %v1142_v29  ;;  %v3744_v62 = vpop.eup %3743  ;;  %v6323_v29 = vld [vmem:[#allocation18_spill] sm:$0xff] }
 0x576   :  { %v1147_v8 = vadd.f32 0.5, %v1146_v44  ;;  %v1151_v26 = vmul.f32 0.5, %v3744_v62  ;;  %v6322_v44 = vld [vmem:[#allocation17_spill] sm:$0xff]  ;;  %v6333_v62 = vld [vmem:[#allocation28_spill] sm:$0xff] }
 0x577   :  { %v1154_v57 = vmul.f32 %v3742_v14, %v1143_v17  ;;  %v6326_v17 = vld [vmem:[#allocation21_spill] sm:$0xff]  ;;  %v6327_v14 = vld [vmem:[#allocation22_spill] sm:$0xff] }
 0x578   :  { %v1153_v23 = vmul.f32 %v1147_v8, %v6319_v25  ;;  %v1152_v36 = vadd.f32 0.5, %v1151_v26  ;;  %v6328_v8 = vld [vmem:[#allocation23_spill] sm:$0xff]  ;;  %v6331_v25 = vld [vmem:[#allocation26_spill] sm:$0xff]  ;;  %v6334_v26 = vld [vmem:[#allocation29_spill] sm:$0xff] }
 0x57a   :  { %v4787_v16 = vadd.f32 %v1154_v57, %v1153_v23  ;;  %v6329_v57 = vld [vmem:[#allocation24_spill] sm:$0xff]  ;;  %v6332_v23 = vld [vmem:[#allocation27_spill] sm:$0xff] }
 0x57c   :  { %3745 = vtanh.f32 %v4787_v16 }
 0x586   :  { %v3746_v32 = vpop.eup %3745 }
 0x587   :  { %v1157_v0 = vmul.f32 %v3746_v32, %v1152_v36  ;;  %v6335_v36 = vld [vmem:[#allocation30_spill] sm:$0xff]  ;;  %v6336_v32 = vld [vmem:[#allocation31_spill] sm:$0xff] }
 0x589   :  { %3193 = vmatmul.mubr.f32.vlgmr.msra.gmra.mrb[16].mxu1 %v1157_v0 }
 0x58a   :  { %1305 = vmatprep.mubr.bf16.mxu1 %v4727_v51  ;;  %1274 = vmatpush1.bf16.msra.mxu1 %v6320_v58  ;;  %v6330_v51 = vld [vmem:[#allocation25_spill] sm:$0xff] }
 0x58b   :  { %1275 = vmatprep.subr.bf16.mxu1 %v6321_v54 }
 0x58e   :  { %1276 = vmatpush1.bf16.msra.mxu1 %v6322_v44 }
 0x58f   :  { %1277 = vmatprep.subr.bf16.mxu1 %v6323_v29 }
 0x592   :  { %1278 = vmatpush1.bf16.msra.mxu1 %v6324_v55  ;;  %v6353_v55 = vld [vmem:[#allocation32_spill] sm:$0xff] }
 0x593   :  { %1279 = vmatprep.subr.bf16.mxu1 %v6325_v60 }
 0x596   :  { %1280 = vmatpush1.bf16.msra.mxu1 %v6326_v17  ;;  %v6337_v17 = vld [vmem:[#allocation33_spill] sm:$0xff] }
 0x597   :  { %1281 = vmatprep.subr.bf16.mxu1 %v6327_v14  ;;  %v6338_v14 = vld [vmem:[#allocation36_spill] sm:$0xff] }
 0x59a   :  { %1282 = vmatpush1.bf16.msra.mxu1 %v6328_v8  ;;  %v6339_v8 = vld [vmem:[#allocation37_spill] sm:$0xff] }
 0x59b   :  { %1283 = vmatprep.subr.bf16.mxu1 %v6329_v57  ;;  %v6340_v57 = vld [vmem:[#allocation39_spill] sm:$0xff] }
 0x59e   :  { %1284 = vmatpush1.bf16.msra.mxu1 %v6330_v51  ;;  %v6341_v51 = vld [vmem:[#allocation41_spill] sm:$0xff] }
 0x59f   :  { %1285 = vmatprep.subr.bf16.mxu1 %v6331_v25  ;;  %v6342_v25 = vld [vmem:[#allocation44_spill] sm:$0xff] }
 0x5a2   :  { %1286 = vmatpush1.bf16.msra.mxu1 %v6332_v23  ;;  %v6343_v23 = vld [vmem:[#allocation46_spill] sm:$0xff] }
 0x5a3   :  { %1287 = vmatprep.subr.bf16.mxu1 %v6333_v62  ;;  %v6344_v62 = vld [vmem:[#allocation48_spill] sm:$0xff] }
 0x5a6   :  { %1288 = vmatpush1.bf16.msra.mxu1 %v6334_v26  ;;  %v6345_v26 = vld [vmem:[#allocation50_spill] sm:$0xff] }
 0x5a7   :  { %1289 = vmatprep.subr.bf16.mxu1 %v6335_v36  ;;  %v6346_v36 = vld [vmem:[#allocation52_spill] sm:$0xff] }
 0x5aa   :  { %1290 = vmatpush1.bf16.msra.mxu1 %v6336_v32  ;;  %v6347_v32 = vld [vmem:[#allocation54_spill] sm:$0xff] }
 0x5ab   :  { %1291 = vmatprep.subr.bf16.mxu1 %v6337_v17  ;;  %v6348_v17 = vld [vmem:[#allocation56_spill] sm:$0xff] }
 0x5ae   :  { %1292 = vmatpush1.bf16.msra.mxu1 %v6338_v14  ;;  %v6349_v14 = vld [vmem:[#allocation59_spill] sm:$0xff] }
 0x5af   :  { %1293 = vmatprep.subr.bf16.mxu1 %v6339_v8  ;;  %v6350_v8 = vld [vmem:[#allocation60_spill] sm:$0xff] }
 0x5b2   :  { %1294 = vmatpush1.bf16.msra.mxu1 %v6340_v57  ;;  %v6351_v57 = vld [vmem:[#allocation71_spill] sm:$0xff] }
 0x5b3   :  { %1295 = vmatprep.subr.bf16.mxu1 %v6341_v51 }
 0x5b6   :  { %1296 = vmatpush1.bf16.msra.mxu1 %v6342_v25  ;;  %v6352_v25 = vld [vmem:[#allocation13_spill] sm:$0xff] }
 0x5b7   :  { %1297 = vmatprep.subr.bf16.mxu1 %v6343_v23 }
 0x5ba   :  { %1298 = vmatpush1.bf16.msra.mxu1 %v6344_v62 }
 0x5bb   :  { %1299 = vmatprep.subr.bf16.mxu1 %v6345_v26 }
 0x5be   :  { %1300 = vmatpush1.bf16.msra.mxu1 %v6346_v36 }
 0x5bf   :  { %1301 = vmatprep.subr.bf16.mxu1 %v6347_v32 }
 0x5c2   :  { %1302 = vmatpush1.bf16.msra.mxu1 %v6348_v17 }
 0x5c3   :  { %1303 = vmatprep.subr.bf16.mxu1 %v6349_v14  ;;  %v1333_v14 = vpack.c.bf16 %v1157_v0, %v1157_v0  ;;  %v6363_v0 = vld [vmem:[#allocation78_spill] sm:$0xff] }
 0x5c6   :  { %1304 = vmatpush1.bf16.msra.mxu1 %v6350_v8  ;;  %v6361_v8 = vld [vmem:[#allocation75_spill] sm:$0xff] }
 0x5c7   :  { %1375 = vmatprep.subr.bf16.mxu1 %v6351_v57  ;;  %v6355_v57 = vld [vmem:[#allocation69_spill] sm:$0xff] }
 0x65c   :  { %v1224_v51 = vpop.f32.mrb[16].mxu1 }
 0x65d   :  { %v1225_v60 = vadd.f32 %v6352_v25, %v1224_v51  ;;  %v3194_v23 = vpop.f32.mrb[17].mxu1  ;;  %v6356_v51 = vld [vmem:[#allocation72_spill] sm:$0xff] }
 0x65e   :  { %v6357_v23 = vld [vmem:[#allocation70_spill] sm:$0xff]  ;;  %v6360_v25 = vld [vmem:[#allocation76_spill] sm:$0xff] }
 0x65f   :  { %v4825_v62 = vadd.f32 %v1225_v60, %v6353_v55  ;;  %v6358_v55 = vld [vmem:[#allocation73_spill] sm:$0xff]  ;;  %v6359_v60 = vld [vmem:[#allocation74_spill] sm:$0xff] }
 0x661   :  { %6354 = vst [vmem:[#allocation34_spill] sm:$0xff] %v4825_v62  ;;  %2980 = vst [vmem:[%s5828_s10 + $0x8] sm:$0xff] %v4825_v62  ;;  %v1231_v17 = vpack.c.bf16 %v4825_v62, %v4825_v62  ;;  %v6362_v62 = vld [vmem:[#allocation77_spill] sm:$0xff] }
 0x663   :  { %1265 = vmatmul.mubr.bf16.vlgmr.msra.gmra.mrb[20].mxu0 %v1231_v17  ;;  %1306 = vmatmul.mubr.bf16.vlgmr.msra.gmra.mrb[20].mxu1 %v1231_v17  ;;  %v6364_v17 = vld [vmem:[#allocation80_spill] sm:$0xff] }
 0x664   :  { %1366 = vmatprep.mubr.bf16.mxu0 %v1333_v14  ;;  %1407 = vmatprep.mubr.bf16.mxu1 %v1333_v14  ;;  %v6365_v14 = vld [vmem:[#allocation79_spill] sm:$0xff] }
 0x665   :  { %1335 = vmatpush1.bf16.msra.mxu0 %v6355_v57  ;;  %1376 = vmatpush1.bf16.msra.mxu1 %v6356_v51  ;;  %v6366_v57 = vld [vmem:[#allocation81_spill] sm:$0xff]  ;;  %v6367_v51 = vld [vmem:[#allocation82_spill] sm:$0xff] }
 0x666   :  { %1336 = vmatprep.subr.bf16.mxu0 %v6357_v23  ;;  %1377 = vmatprep.subr.bf16.mxu1 %v6358_v55  ;;  %v6368_v23 = vld [vmem:[#allocation84_spill] sm:$0xff]  ;;  %v6369_v55 = vld [vmem:[#allocation83_spill] sm:$0xff] }
 0x669   :  { %1337 = vmatpush1.bf16.msra.mxu0 %v6359_v60  ;;  %1378 = vmatpush1.bf16.msra.mxu1 %v6360_v25  ;;  %v6370_v60 = vld [vmem:[#allocation85_spill] sm:$0xff]  ;;  %v6371_v25 = vld [vmem:[#allocation86_spill] sm:$0xff] }
 0x66a   :  { %1338 = vmatprep.subr.bf16.mxu0 %v6361_v8  ;;  %1379 = vmatprep.subr.bf16.mxu1 %v6362_v62  ;;  %v6372_v8 = vld [vmem:[#allocation88_spill] sm:$0xff]  ;;  %v6373_v62 = vld [vmem:[#allocation87_spill] sm:$0xff] }
 0x66d   :  { %1339 = vmatpush1.bf16.msra.mxu0 %v6363_v0  ;;  %1380 = vmatpush1.bf16.msra.mxu1 %v6364_v17  ;;  %v6374_v0 = vld [vmem:[#allocation89_spill] sm:$0xff]  ;;  %v6375_v17 = vld [vmem:[#allocation90_spill] sm:$0xff] }
 0x66e   :  { %1340 = vmatprep.subr.bf16.mxu0 %v6365_v14  ;;  %1381 = vmatprep.subr.bf16.mxu1 %v6366_v57  ;;  %v6376_v14 = vld [vmem:[#allocation92_spill] sm:$0xff]  ;;  %v6377_v57 = vld [vmem:[#allocation91_spill] sm:$0xff] }
 0x671   :  { %1341 = vmatpush1.bf16.msra.mxu0 %v6367_v51  ;;  %1382 = vmatpush1.bf16.msra.mxu1 %v6368_v23  ;;  %v6378_v51 = vld [vmem:[#allocation93_spill] sm:$0xff]  ;;  %v6379_v23 = vld [vmem:[#allocation94_spill] sm:$0xff] }
 0x672   :  { %1342 = vmatprep.subr.bf16.mxu0 %v6369_v55  ;;  %1383 = vmatprep.subr.bf16.mxu1 %v6370_v60  ;;  %v6380_v55 = vld [vmem:[#allocation96_spill] sm:$0xff]  ;;  %v6381_v60 = vld [vmem:[#allocation95_spill] sm:$0xff] }
 0x675   :  { %1343 = vmatpush1.bf16.msra.mxu0 %v6371_v25  ;;  %1384 = vmatpush1.bf16.msra.mxu1 %v6372_v8  ;;  %v6382_v25 = vld [vmem:[#allocation97_spill] sm:$0xff]  ;;  %v6383_v8 = vld [vmem:[#allocation98_spill] sm:$0xff] }
 0x676   :  { %1344 = vmatprep.subr.bf16.mxu0 %v6373_v62  ;;  %1385 = vmatprep.subr.bf16.mxu1 %v6374_v0  ;;  %v6384_v62 = vld [vmem:[#allocation100_spill] sm:$0xff]  ;;  %v6385_v0 = vld [vmem:[#allocation99_spill] sm:$0xff] }
 0x679   :  { %1345 = vmatpush1.bf16.msra.mxu0 %v6375_v17  ;;  %1386 = vmatpush1.bf16.msra.mxu1 %v6376_v14  ;;  %v6386_v17 = vld [vmem:[#allocation101_spill] sm:$0xff]  ;;  %v6387_v14 = vld [vmem:[#allocation102_spill] sm:$0xff] }
 0x67a   :  { %1346 = vmatprep.subr.bf16.mxu0 %v6377_v57  ;;  %1387 = vmatprep.subr.bf16.mxu1 %v6378_v51  ;;  %v6388_v57 = vld [vmem:[#allocation104_spill] sm:$0xff]  ;;  %v6389_v51 = vld [vmem:[#allocation103_spill] sm:$0xff] }
 0x67d   :  { %1347 = vmatpush1.bf16.msra.mxu0 %v6379_v23  ;;  %1388 = vmatpush1.bf16.msra.mxu1 %v6380_v55  ;;  %v6390_v23 = vld [vmem:[#allocation105_spill] sm:$0xff]  ;;  %v6391_v55 = vld [vmem:[#allocation106_spill] sm:$0xff] }
 0x67e   :  { %1348 = vmatprep.subr.bf16.mxu0 %v6381_v60  ;;  %1389 = vmatprep.subr.bf16.mxu1 %v6382_v25  ;;  %v6392_v60 = vld [vmem:[#allocation108_spill] sm:$0xff]  ;;  %v6393_v25 = vld [vmem:[#allocation107_spill] sm:$0xff] }
 0x681   :  { %1349 = vmatpush1.bf16.msra.mxu0 %v6383_v8  ;;  %1390 = vmatpush1.bf16.msra.mxu1 %v6384_v62  ;;  %v6394_v8 = vld [vmem:[#allocation109_spill] sm:$0xff]  ;;  %v6395_v62 = vld [vmem:[#allocation110_spill] sm:$0xff] }
 0x682   :  { %1350 = vmatprep.subr.bf16.mxu0 %v6385_v0  ;;  %1391 = vmatprep.subr.bf16.mxu1 %v6386_v17  ;;  %v6396_v0 = vld [vmem:[#allocation112_spill] sm:$0xff]  ;;  %v6397_v17 = vld [vmem:[#allocation111_spill] sm:$0xff] }
 0x685   :  { %1351 = vmatpush1.bf16.msra.mxu0 %v6387_v14  ;;  %1392 = vmatpush1.bf16.msra.mxu1 %v6388_v57  ;;  %v6398_v14 = vld [vmem:[#allocation113_spill] sm:$0xff]  ;;  %v6399_v57 = vld [vmem:[#allocation114_spill] sm:$0xff] }
 0x686   :  { %1352 = vmatprep.subr.bf16.mxu0 %v6389_v51  ;;  %1393 = vmatprep.subr.bf16.mxu1 %v6390_v23  ;;  %v6400_v51 = vld [vmem:[#allocation116_spill] sm:$0xff]  ;;  %v6401_v23 = vld [vmem:[#allocation115_spill] sm:$0xff] }
 0x689   :  { %1353 = vmatpush1.bf16.msra.mxu0 %v6391_v55  ;;  %1394 = vmatpush1.bf16.msra.mxu1 %v6392_v60  ;;  %v6402_v55 = vld [vmem:[#allocation117_spill] sm:$0xff]  ;;  %v6403_v60 = vld [vmem:[#allocation118_spill] sm:$0xff] }
 0x68a   :  { %1354 = vmatprep.subr.bf16.mxu0 %v6393_v25  ;;  %1395 = vmatprep.subr.bf16.mxu1 %v6394_v8  ;;  %v6404_v25 = vld [vmem:[#allocation120_spill] sm:$0xff]  ;;  %v6405_v8 = vld [vmem:[#allocation119_spill] sm:$0xff] }
 0x68d   :  { %1355 = vmatpush1.bf16.msra.mxu0 %v6395_v62  ;;  %1396 = vmatpush1.bf16.msra.mxu1 %v6396_v0  ;;  %v6406_v62 = vld [vmem:[#allocation121_spill] sm:$0xff]  ;;  %v6407_v0 = vld [vmem:[#allocation122_spill] sm:$0xff] }
 0x68e   :  { %1356 = vmatprep.subr.bf16.mxu0 %v6397_v17  ;;  %1397 = vmatprep.subr.bf16.mxu1 %v6398_v14  ;;  %v6408_v17 = vld [vmem:[#allocation124_spill] sm:$0xff]  ;;  %v6409_v14 = vld [vmem:[#allocation123_spill] sm:$0xff] }
 0x691   :  { %1357 = vmatpush1.bf16.msra.mxu0 %v6399_v57  ;;  %1398 = vmatpush1.bf16.msra.mxu1 %v6400_v51  ;;  %v6410_v57 = vld [vmem:[#allocation125_spill] sm:$0xff]  ;;  %v6411_v51 = vld [vmem:[#allocation126_spill] sm:$0xff] }
 0x692   :  { %1358 = vmatprep.subr.bf16.mxu0 %v6401_v23  ;;  %1399 = vmatprep.subr.bf16.mxu1 %v6402_v55  ;;  %v6412_v23 = vld [vmem:[#allocation128_spill] sm:$0xff]  ;;  %v6413_v55 = vld [vmem:[#allocation127_spill] sm:$0xff] }
 0x695   :  { %1359 = vmatpush1.bf16.msra.mxu0 %v6403_v60  ;;  %1400 = vmatpush1.bf16.msra.mxu1 %v6404_v25  ;;  %v6414_v60 = vld [vmem:[#allocation129_spill] sm:$0xff]  ;;  %v6415_v25 = vld [vmem:[#allocation130_spill] sm:$0xff] }
 0x696   :  { %1360 = vmatprep.subr.bf16.mxu0 %v6405_v8  ;;  %1401 = vmatprep.subr.bf16.mxu1 %v6406_v62  ;;  %v6416_v8 = vld [vmem:[#allocation131_spill] sm:$0xff] }
 0x697   :  { %v6418_v62 = vld [vmem:[#allocation63_spill] sm:$0xff] }
 0x699   :  { %1361 = vmatpush1.bf16.msra.mxu0 %v6407_v0  ;;  %1402 = vmatpush1.bf16.msra.mxu1 %v6408_v17  ;;  %v6417_v0 = vld [vmem:[#allocation14_spill] sm:$0xff] }
 0x69a   :  { %1362 = vmatprep.subr.bf16.mxu0 %v6409_v14  ;;  %1403 = vmatprep.subr.bf16.mxu1 %v6410_v57 }
 0x69d   :  { %1363 = vmatpush1.bf16.msra.mxu0 %v6411_v51  ;;  %1404 = vmatpush1.bf16.msra.mxu1 %v6412_v23 }
 0x69e   :  { %1364 = vmatprep.subr.bf16.mxu0 %v6413_v55  ;;  %1405 = vmatprep.subr.bf16.mxu1 %v6414_v60 }
 0x6a1   :  { %1365 = vmatpush1.bf16.msra.mxu0 %v6415_v25  ;;  %1406 = vmatpush1.bf16.msra.mxu1 %v6416_v8 }
 0x6a2   :  { %3453 = vmatprep.subr.bf16.mxu0 %v6309_v52  ;;  %1508 = vmatprep.subr.bf16.mxu1 %v6417_v0 }
 0x736   :  { %v1266_v17 = vpop.f32.mrb[20].mxu0  ;;  %v1307_v14 = vpop.f32.mrb[20].mxu1 }
 0x737   :  { %v1267_v57 = vadd.f32 %v1266_v17, %v6418_v62  ;;  %v1268_v32 = vpop.f32.mrb[21].mxu0  ;;  %v1309_v51 = vpop.f32.mrb[21].mxu1  ;;  %v1308_v8 = vadd.f32 %v1307_v14, %v6312_v18 }
 0x738   :  { %v1269_v23 = vadd.f32 %v1268_v32, %v6311_v10  ;;  %v1270_v36 = vpop.f32.mrb[22].mxu0  ;;  %v1311_v55 = vpop.f32.mrb[22].mxu1  ;;  %v1310_v0 = vadd.f32 %v1309_v51, %v6313_v63 }
 0x739   :  { %v1314_v26 = vmul.f32 0.5, %v1267_v57  ;;  %v1271_v60 = vpop.f32.mrb[23].mxu0  ;;  %v1312_v29 = vpop.f32.mrb[23].mxu1 }
 0x73a   :  { %v1318_v25 = vmul.f32 0.5, %v1269_v23  ;;  %v1323_v44 = vmul.f32 0.5, %v1310_v0 }
 0x73b   :  { %3747 = vtanh.f32 %v1314_v26 }
 0x73c   :  { %3749 = vtanh.f32 %v1318_v25 }
 0x73d   :  { %3751 = vtanh.f32 %v1308_v8 }
 0x73e   :  { %3753 = vtanh.f32 %v1323_v44  ;;  %v6422_v44 = vld [vmem:[#allocation57_spill] sm:$0xff] }
 0x745   :  { %v3748_v54 = vpop.eup %3747 }
 0x746   :  { %v3750_v17 = vpop.eup %3749  ;;  %v1316_v62 = vmul.f32 0.5, %v3748_v54  ;;  %v6421_v54 = vld [vmem:[#allocation55_spill] sm:$0xff] }
 0x747   :  { %v1320_v58 = vmul.f32 0.5, %v3750_v17  ;;  %v3752_v36 = vpop.eup %3751 }
 0x748   :  { %v1317_v32 = vadd.f32 0.5, %v1316_v62  ;;  %v3754_v25 = vpop.eup %3753  ;;  %v6423_v62 = vld [vmem:[#allocation68_spill] sm:$0xff] }
 0x749   :  { %v1321_v55 = vadd.f32 0.5, %v1320_v58  ;;  %v1325_v8 = vmul.f32 0.5, %v3754_v25  ;;  %v6420_v58 = vld [vmem:[#allocation53_spill] sm:$0xff] }
 0x74a   :  { %v1328_v57 = vmul.f32 %v3752_v36, %v1317_v32  ;;  %v6424_v32 = vld [vmem:[#allocation43_spill] sm:$0xff] }
 0x74b   :  { %v1327_v29 = vmul.f32 %v1321_v55, %v4724_v12  ;;  %v1326_v26 = vadd.f32 0.5, %v1325_v8  ;;  %v6419_v12 = vld [vmem:[#allocation51_spill] sm:$0xff] }
 0x74d   :  { %v4902_v23 = vadd.f32 %v1328_v57, %v1327_v29 }
 0x74f   :  { %3755 = vtanh.f32 %v4902_v23 }
 0x759   :  { %v3756_v51 = vpop.eup %3755 }
 0x75a   :  { %v1331_v60 = vmul.f32 %v3756_v51, %v1326_v26 }
 0x75c   :  { %v4905_v0 = vpack.c.bf16 %v1331_v60, %v1331_v60 }
 0x75e   :  { %1367 = vmatmul.mubr.bf16.vlgmr.msra.gmra.mrb[24].mxu0 %v4905_v0  ;;  %1408 = vmatmul.mubr.bf16.vlgmr.msra.gmra.mrb[24].mxu1 %v4905_v0 }
 0x75f   :  { %1540 = vmatprep.mubr.bf16.mxu1 %v4905_v0  ;;  %3455 = vmatpush3.bf16.msra.mxu0 %v4526_v30 }
 0x760   :  { %3456 = vmatprep.subr.bf16.mxu0 %v6309_v52  ;;  %3227 = vmatprep.mubr.msk.f32.mxu0 %vm3907_vm0, %v6315_v43 }
 0x761   :  { %1509 = vmatpush1.bf16.msra.mxu1 %v4071_v19 }
 0x762   :  { %1510 = vmatprep.subr.bf16.mxu1 %v4074_v20 }
 0x763   :  { %3458 = vmatpush3.bf16.msra.mxu0 %v4534_v59 }
 0x764   :  { %3459 = vmatprep.subr.bf16.mxu0 %v6309_v52 }
 0x765   :  { %1511 = vmatpush1.bf16.msra.mxu1 %v4079_v22 }
 0x766   :  { %1512 = vmatprep.subr.bf16.mxu1 %v4084_v24 }
 0x767   :  { %3461 = vmatpush3.bf16.msra.mxu0 %v4544_v1 }
 0x768   :  { %3462 = vmatprep.subr.bf16.mxu0 %v6309_v52 }
 0x769   :  { %1513 = vmatpush1.bf16.msra.mxu1 %v4094_v27 }
 0x76a   :  { %1514 = vmatprep.subr.bf16.mxu1 %v4097_v28 }
 0x76b   :  { %3464 = vmatpush3.bf16.msra.mxu0 %v4552_v2 }
 0x76c   :  { %3465 = vmatprep.subr.bf16.mxu0 %v6309_v52 }
 0x76d   :  { %1515 = vmatpush1.bf16.msra.mxu1 %v4106_v31 }
 0x76e   :  { %1516 = vmatprep.subr.bf16.mxu1 %v4111_v33 }
 0x76f   :  { %3467 = vmatpush3.bf16.msra.mxu0 %v4560_v3 }
 0x770   :  { %3468 = vmatprep.subr.bf16.mxu0 %v6309_v52 }
 0x771   :  { %1517 = vmatpush1.bf16.msra.mxu1 %v4114_v34 }
 0x772   :  { %1518 = vmatprep.subr.bf16.mxu1 %v4123_v37 }
 0x773   :  { %3470 = vmatpush3.bf16.msra.mxu0 %v4568_v4 }
 0x774   :  { %3471 = vmatprep.subr.bf16.mxu0 %v6309_v52 }
 0x775   :  { %1519 = vmatpush1.bf16.msra.mxu1 %v4130_v39 }
 0x776   :  { %1520 = vmatprep.subr.bf16.mxu1 %v4135_v41 }
 0x777   :  { %3473 = vmatpush3.bf16.msra.mxu0 %v4576_v5 }
 0x778   :  { %3474 = vmatprep.subr.bf16.mxu0 %v6309_v52 }
 0x779   :  { %1521 = vmatpush1.bf16.msra.mxu1 %v4138_v42 }
 0x77a   :  { %1522 = vmatprep.subr.bf16.mxu1 %v4147_v45 }
 0x77b   :  { %3476 = vmatpush3.bf16.msra.mxu0 %v4584_v6 }
 0x77c   :  { %1549 = vmatprep.subr.bf16.mxu0 %v4077_v21 }
 0x77d   :  { %1523 = vmatpush1.bf16.msra.mxu1 %v4154_v47 }
 0x77e   :  { %1524 = vmatprep.subr.bf16.mxu1 %v4159_v49 }
 0x781   :  { %1525 = vmatpush1.bf16.msra.mxu1 %v4162_v50 }
 0x782   :  { %1526 = vmatprep.subr.bf16.mxu1 %v4171_v53 }
 0x785   :  { %1527 = vmatpush1.bf16.msra.mxu1 %v6203_v7 }
 0x786   :  { %1528 = vmatprep.subr.bf16.mxu1 %v6205_v9 }
 0x789   :  { %1529 = vmatpush1.bf16.msra.mxu1 %v6207_v11 }
 0x78a   :  { %1530 = vmatprep.subr.bf16.mxu1 %v6209_v13 }
 0x78d   :  { %1531 = vmatpush1.bf16.msra.mxu1 %v6211_v15 }
 0x78e   :  { %1532 = vmatprep.subr.bf16.mxu1 %v6213_v35 }
 0x791   :  { %1533 = vmatpush1.bf16.msra.mxu1 %v6215_v48 }
 0x792   :  { %1534 = vmatprep.subr.bf16.mxu1 %v6217_v61 }
 0x795   :  { %1535 = vmatpush1.bf16.msra.mxu1 %v6219_v40 }
 0x796   :  { %1536 = vmatprep.subr.bf16.mxu1 %v6419_v12 }
 0x799   :  { %1537 = vmatpush1.bf16.msra.mxu1 %v6420_v58 }
 0x79a   :  { %1538 = vmatprep.subr.bf16.mxu1 %v6421_v54 }
 0x79d   :  { %1539 = vmatpush1.bf16.msra.mxu1 %v6422_v44 }
 0x79e   :  { %1610 = vmatprep.subr.bf16.mxu1 %v6423_v62 }
 0x831   :  { %v1368_v14 = vpop.f32.mrb[24].mxu0  ;;  %v1409_v17 = vpop.f32.mrb[24].mxu1 }
 0x832   :  { %v1369_v36 = vadd.f32 %v1368_v14, %v6424_v32  ;;  %v1370_v55 = vpop.f32.mrb[25].mxu0  ;;  %v1411_v57 = vpop.f32.mrb[25].mxu1  ;;  %v1410_v54 = vadd.f32 %v1409_v17, %v6317_v56 }
 0x833   :  { %v1371_v29 = vadd.f32 %v1370_v55, %v4280_v46  ;;  %v1372_v25 = vpop.f32.mrb[26].mxu0  ;;  %v1413_v8 = vpop.f32.mrb[26].mxu1  ;;  %v1412_v62 = vadd.f32 %v1411_v57, %v6318_v38 }
 0x834   :  { %v1416_v26 = vmul.f32 0.5, %v1369_v36  ;;  %v1373_v51 = vpop.f32.mrb[27].mxu0  ;;  %v1414_v60 = vpop.f32.mrb[27].mxu1 }
 0x835   :  { %v1420_v58 = vmul.f32 0.5, %v1371_v29  ;;  %v1425_v44 = vmul.f32 0.5, %v1412_v62  ;;  %v6431_v60 = vld [vmem:[#allocation21_spill] sm:$0xff] }
 0x836   :  { %3757 = vtanh.f32 %v1416_v26  ;;  %v6430_v26 = vld [vmem:[#allocation20_spill] sm:$0xff] }
 0x837   :  { %3759 = vtanh.f32 %v1420_v58 }
 0x838   :  { %3761 = vtanh.f32 %v1410_v54 }
 0x839   :  { %3763 = vtanh.f32 %v1425_v44  ;;  %v6426_v44 = vld [vmem:[#allocation16_spill] sm:$0xff] }
 0x840   :  { %v3758_v12 = vpop.eup %3757 }
 0x841   :  { %v3760_v14 = vpop.eup %3759  ;;  %v1418_v32 = vmul.f32 0.5, %v3758_v12  ;;  %v6425_v12 = vld [vmem:[#allocation15_spill] sm:$0xff] }
 0x842   :  { %v1422_v40 = vmul.f32 0.5, %v3760_v14  ;;  %v3762_v25 = vpop.eup %3761  ;;  %v6432_v14 = vld [vmem:[#allocation22_spill] sm:$0xff] }
 0x843   :  { %v1419_v55 = vadd.f32 0.5, %v1418_v32  ;;  %v3764_v58 = vpop.eup %3763  ;;  %v6428_v32 = vld [vmem:[#allocation18_spill] sm:$0xff] }
 0x844   :  { %v1423_v8 = vadd.f32 0.5, %v1422_v40  ;;  %v1427_v54 = vmul.f32 0.5, %v3764_v58  ;;  %v6427_v40 = vld [vmem:[#allocation17_spill] sm:$0xff] }
 0x845   :  { %v1430_v36 = vmul.f32 %v3762_v25, %v1419_v55  ;;  %v6433_v55 = vld [vmem:[#allocation23_spill] sm:$0xff]  ;;  %v6434_v25 = vld [vmem:[#allocation24_spill] sm:$0xff]  ;;  %v6439_v58 = vld [vmem:[#allocation29_spill] sm:$0xff] }
 0x846   :  { %v1429_v51 = vmul.f32 %v1423_v8, %v4787_v16  ;;  %v1428_v17 = vadd.f32 0.5, %v1427_v54  ;;  %v6429_v16 = vld [vmem:[#allocation19_spill] sm:$0xff]  ;;  %v6436_v8 = vld [vmem:[#allocation26_spill] sm:$0xff] }
 0x847   :  { %v6440_v54 = vld [vmem:[#allocation30_spill] sm:$0xff] }
 0x848   :  { %v4965_v29 = vadd.f32 %v1430_v36, %v1429_v51  ;;  %v6437_v36 = vld [vmem:[#allocation27_spill] sm:$0xff]  ;;  %v6438_v51 = vld [vmem:[#allocation28_spill] sm:$0xff] }
 0x84a   :  { %3765 = vtanh.f32 %v4965_v29 }
 0x854   :  { %v3766_v57 = vpop.eup %3765 }
 0x855   :  { %v1433_v62 = vmul.f32 %v3766_v57, %v1428_v17  ;;  %v6441_v17 = vld [vmem:[#allocation31_spill] sm:$0xff]  ;;  %v6442_v57 = vld [vmem:[#allocation33_spill] sm:$0xff] }
 0x857   :  { %3228 = vmatmul.mubr.f32.vlgmr.msra.gmra.mrb[10].mxu0 %v1433_v62 }
 0x858   :  { %1581 = vmatprep.mubr.bf16.mxu0 %v4905_v0  ;;  %1550 = vmatpush1.bf16.msra.mxu0 %v6425_v12  ;;  %v6435_v0 = vld [vmem:[#allocation25_spill] sm:$0xff] }
 0x859   :  { %1551 = vmatprep.subr.bf16.mxu0 %v6426_v44 }
 0x85c   :  { %1552 = vmatpush1.bf16.msra.mxu0 %v6427_v40 }
 0x85d   :  { %1553 = vmatprep.subr.bf16.mxu0 %v6428_v32 }
 0x860   :  { %1554 = vmatpush1.bf16.msra.mxu0 %v6429_v16 }
 0x861   :  { %1555 = vmatprep.subr.bf16.mxu0 %v6430_v26  ;;  %v6458_v26 = vld [vmem:[#allocation34_spill] sm:$0xff] }
 0x864   :  { %1556 = vmatpush1.bf16.msra.mxu0 %v6431_v60 }
 0x865   :  { %1557 = vmatprep.subr.bf16.mxu0 %v6432_v14  ;;  %v6443_v14 = vld [vmem:[#allocation36_spill] sm:$0xff] }
 0x868   :  { %1558 = vmatpush1.bf16.msra.mxu0 %v6433_v55  ;;  %v6444_v55 = vld [vmem:[#allocation37_spill] sm:$0xff] }
 0x869   :  { %1559 = vmatprep.subr.bf16.mxu0 %v6434_v25  ;;  %v6445_v25 = vld [vmem:[#allocation39_spill] sm:$0xff] }
 0x86c   :  { %1560 = vmatpush1.bf16.msra.mxu0 %v6435_v0  ;;  %v6446_v0 = vld [vmem:[#allocation41_spill] sm:$0xff] }
 0x86d   :  { %1561 = vmatprep.subr.bf16.mxu0 %v6436_v8  ;;  %v6447_v8 = vld [vmem:[#allocation44_spill] sm:$0xff] }
 0x870   :  { %1562 = vmatpush1.bf16.msra.mxu0 %v6437_v36  ;;  %v6448_v36 = vld [vmem:[#allocation46_spill] sm:$0xff] }
 0x871   :  { %1563 = vmatprep.subr.bf16.mxu0 %v6438_v51  ;;  %v6449_v51 = vld [vmem:[#allocation48_spill] sm:$0xff] }
 0x874   :  { %1564 = vmatpush1.bf16.msra.mxu0 %v6439_v58  ;;  %v6450_v58 = vld [vmem:[#allocation50_spill] sm:$0xff] }
 0x875   :  { %1565 = vmatprep.subr.bf16.mxu0 %v6440_v54  ;;  %v6451_v54 = vld [vmem:[#allocation52_spill] sm:$0xff] }
 0x878   :  { %1566 = vmatpush1.bf16.msra.mxu0 %v6441_v17  ;;  %v6452_v17 = vld [vmem:[#allocation54_spill] sm:$0xff] }
 0x879   :  { %1567 = vmatprep.subr.bf16.mxu0 %v6442_v57  ;;  %v6453_v57 = vld [vmem:[#allocation56_spill] sm:$0xff] }
 0x87c   :  { %1568 = vmatpush1.bf16.msra.mxu0 %v6443_v14  ;;  %v6454_v14 = vld [vmem:[#allocation59_spill] sm:$0xff] }
 0x87d   :  { %1569 = vmatprep.subr.bf16.mxu0 %v6444_v55  ;;  %v6455_v55 = vld [vmem:[#allocation60_spill] sm:$0xff] }
 0x880   :  { %1570 = vmatpush1.bf16.msra.mxu0 %v6445_v25  ;;  %v6456_v25 = vld [vmem:[#allocation71_spill] sm:$0xff] }
 0x881   :  { %1571 = vmatprep.subr.bf16.mxu0 %v6446_v0 }
 0x884   :  { %1572 = vmatpush1.bf16.msra.mxu0 %v6447_v8  ;;  %v6457_v8 = vld [vmem:[#allocation13_spill] sm:$0xff] }
 0x885   :  { %1573 = vmatprep.subr.bf16.mxu0 %v6448_v36 }
 0x888   :  { %1574 = vmatpush1.bf16.msra.mxu0 %v6449_v51 }
 0x889   :  { %1575 = vmatprep.subr.bf16.mxu0 %v6450_v58 }
 0x88c   :  { %1576 = vmatpush1.bf16.msra.mxu0 %v6451_v54 }
 0x88d   :  { %1577 = vmatprep.subr.bf16.mxu0 %v6452_v17 }
 0x890   :  { %1578 = vmatpush1.bf16.msra.mxu0 %v6453_v57 }
 0x891   :  { %1579 = vmatprep.subr.bf16.mxu0 %v6454_v14  ;;  %v1609_v14 = vpack.c.bf16 %v1433_v62, %v1433_v62  ;;  %v6468_v62 = vld [vmem:[#allocation78_spill] sm:$0xff] }
 0x894   :  { %1580 = vmatpush1.bf16.msra.mxu0 %v6455_v55  ;;  %v6466_v55 = vld [vmem:[#allocation75_spill] sm:$0xff] }
 0x895   :  { %1651 = vmatprep.subr.bf16.mxu0 %v6456_v25  ;;  %v6460_v25 = vld [vmem:[#allocation69_spill] sm:$0xff] }
 0x92a   :  { %v1500_v0 = vpop.f32.mrb[10].mxu0 }
 0x92b   :  { %v1501_v60 = vadd.f32 %v6457_v8, %v1500_v0  ;;  %v3229_v36 = vpop.f32.mrb[11].mxu0  ;;  %v6461_v0 = vld [vmem:[#allocation72_spill] sm:$0xff] }
 0x92c   :  { %v6462_v36 = vld [vmem:[#allocation70_spill] sm:$0xff]  ;;  %v6465_v8 = vld [vmem:[#allocation76_spill] sm:$0xff] }
 0x92d   :  { %v5003_v51 = vadd.f32 %v1501_v60, %v6458_v26  ;;  %v6463_v26 = vld [vmem:[#allocation73_spill] sm:$0xff]  ;;  %v6464_v60 = vld [vmem:[#allocation74_spill] sm:$0xff] }
 0x92f   :  { %6459 = vst [vmem:[#allocation35_spill] sm:$0xff] %v5003_v51  ;;  %2981 = vst [vmem:[%s5828_s10 + $0x10] sm:$0xff] %v5003_v51  ;;  %v1507_v57 = vpack.c.bf16 %v5003_v51, %v5003_v51  ;;  %v6467_v51 = vld [vmem:[#allocation77_spill] sm:$0xff] }
 0x931   :  { %1541 = vmatmul.mubr.bf16.vlgmr.msra.gmra.mrb[28].mxu1 %v1507_v57  ;;  %1582 = vmatmul.mubr.bf16.vlgmr.msra.gmra.mrb[28].mxu0 %v1507_v57  ;;  %v6469_v57 = vld [vmem:[#allocation80_spill] sm:$0xff] }
 0x932   :  { %1642 = vmatprep.mubr.bf16.mxu1 %v1609_v14  ;;  %1683 = vmatprep.mubr.bf16.mxu0 %v1609_v14  ;;  %v6470_v14 = vld [vmem:[#allocation79_spill] sm:$0xff] }
 0x933   :  { %1611 = vmatpush1.bf16.msra.mxu1 %v6460_v25  ;;  %1652 = vmatpush1.bf16.msra.mxu0 %v6461_v0  ;;  %v6471_v25 = vld [vmem:[#allocation81_spill] sm:$0xff]  ;;  %v6472_v0 = vld [vmem:[#allocation82_spill] sm:$0xff] }
 0x934   :  { %1612 = vmatprep.subr.bf16.mxu1 %v6462_v36  ;;  %1653 = vmatprep.subr.bf16.mxu0 %v6463_v26  ;;  %v6473_v36 = vld [vmem:[#allocation84_spill] sm:$0xff]  ;;  %v6474_v26 = vld [vmem:[#allocation83_spill] sm:$0xff] }
 0x937   :  { %1613 = vmatpush1.bf16.msra.mxu1 %v6464_v60  ;;  %1654 = vmatpush1.bf16.msra.mxu0 %v6465_v8  ;;  %v6475_v60 = vld [vmem:[#allocation85_spill] sm:$0xff]  ;;  %v6476_v8 = vld [vmem:[#allocation86_spill] sm:$0xff] }
 0x938   :  { %1614 = vmatprep.subr.bf16.mxu1 %v6466_v55  ;;  %1655 = vmatprep.subr.bf16.mxu0 %v6467_v51  ;;  %v6477_v55 = vld [vmem:[#allocation88_spill] sm:$0xff]  ;;  %v6478_v51 = vld [vmem:[#allocation87_spill] sm:$0xff] }
 0x93b   :  { %1615 = vmatpush1.bf16.msra.mxu1 %v6468_v62  ;;  %1656 = vmatpush1.bf16.msra.mxu0 %v6469_v57  ;;  %v6479_v62 = vld [vmem:[#allocation89_spill] sm:$0xff]  ;;  %v6480_v57 = vld [vmem:[#allocation90_spill] sm:$0xff] }
 0x93c   :  { %1616 = vmatprep.subr.bf16.mxu1 %v6470_v14  ;;  %1657 = vmatprep.subr.bf16.mxu0 %v6471_v25  ;;  %v6481_v14 = vld [vmem:[#allocation92_spill] sm:$0xff]  ;;  %v6482_v25 = vld [vmem:[#allocation91_spill] sm:$0xff] }
 0x93f   :  { %1617 = vmatpush1.bf16.msra.mxu1 %v6472_v0  ;;  %1658 = vmatpush1.bf16.msra.mxu0 %v6473_v36  ;;  %v6483_v0 = vld [vmem:[#allocation93_spill] sm:$0xff]  ;;  %v6484_v36 = vld [vmem:[#allocation94_spill] sm:$0xff] }
 0x940   :  { %1618 = vmatprep.subr.bf16.mxu1 %v6474_v26  ;;  %1659 = vmatprep.subr.bf16.mxu0 %v6475_v60  ;;  %v6485_v26 = vld [vmem:[#allocation96_spill] sm:$0xff]  ;;  %v6486_v60 = vld [vmem:[#allocation95_spill] sm:$0xff] }
 0x943   :  { %1619 = vmatpush1.bf16.msra.mxu1 %v6476_v8  ;;  %1660 = vmatpush1.bf16.msra.mxu0 %v6477_v55  ;;  %v6487_v8 = vld [vmem:[#allocation97_spill] sm:$0xff]  ;;  %v6488_v55 = vld [vmem:[#allocation98_spill] sm:$0xff] }
 0x944   :  { %1620 = vmatprep.subr.bf16.mxu1 %v6478_v51  ;;  %1661 = vmatprep.subr.bf16.mxu0 %v6479_v62  ;;  %v6489_v51 = vld [vmem:[#allocation100_spill] sm:$0xff]  ;;  %v6490_v62 = vld [vmem:[#allocation99_spill] sm:$0xff] }
 0x947   :  { %1621 = vmatpush1.bf16.msra.mxu1 %v6480_v57  ;;  %1662 = vmatpush1.bf16.msra.mxu0 %v6481_v14  ;;  %v6491_v57 = vld [vmem:[#allocation101_spill] sm:$0xff]  ;;  %v6492_v14 = vld [vmem:[#allocation102_spill] sm:$0xff] }
 0x948   :  { %1622 = vmatprep.subr.bf16.mxu1 %v6482_v25  ;;  %1663 = vmatprep.subr.bf16.mxu0 %v6483_v0  ;;  %v6493_v25 = vld [vmem:[#allocation104_spill] sm:$0xff]  ;;  %v6494_v0 = vld [vmem:[#allocation103_spill] sm:$0xff] }
 0x94b   :  { %1623 = vmatpush1.bf16.msra.mxu1 %v6484_v36  ;;  %1664 = vmatpush1.bf16.msra.mxu0 %v6485_v26  ;;  %v6495_v36 = vld [vmem:[#allocation105_spill] sm:$0xff]  ;;  %v6496_v26 = vld [vmem:[#allocation106_spill] sm:$0xff] }
 0x94c   :  { %1624 = vmatprep.subr.bf16.mxu1 %v6486_v60  ;;  %1665 = vmatprep.subr.bf16.mxu0 %v6487_v8  ;;  %v6497_v60 = vld [vmem:[#allocation108_spill] sm:$0xff]  ;;  %v6498_v8 = vld [vmem:[#allocation107_spill] sm:$0xff] }
 0x94f   :  { %1625 = vmatpush1.bf16.msra.mxu1 %v6488_v55  ;;  %1666 = vmatpush1.bf16.msra.mxu0 %v6489_v51  ;;  %v6499_v55 = vld [vmem:[#allocation109_spill] sm:$0xff]  ;;  %v6500_v51 = vld [vmem:[#allocation110_spill] sm:$0xff] }
 0x950   :  { %1626 = vmatprep.subr.bf16.mxu1 %v6490_v62  ;;  %1667 = vmatprep.subr.bf16.mxu0 %v6491_v57  ;;  %v6501_v62 = vld [vmem:[#allocation112_spill] sm:$0xff]  ;;  %v6502_v57 = vld [vmem:[#allocation111_spill] sm:$0xff] }
 0x953   :  { %1627 = vmatpush1.bf16.msra.mxu1 %v6492_v14  ;;  %1668 = vmatpush1.bf16.msra.mxu0 %v6493_v25  ;;  %v6503_v14 = vld [vmem:[#allocation113_spill] sm:$0xff]  ;;  %v6504_v25 = vld [vmem:[#allocation114_spill] sm:$0xff] }
 0x954   :  { %1628 = vmatprep.subr.bf16.mxu1 %v6494_v0  ;;  %1669 = vmatprep.subr.bf16.mxu0 %v6495_v36  ;;  %v6505_v0 = vld [vmem:[#allocation116_spill] sm:$0xff]  ;;  %v6506_v36 = vld [vmem:[#allocation115_spill] sm:$0xff] }
 0x957   :  { %1629 = vmatpush1.bf16.msra.mxu1 %v6496_v26  ;;  %1670 = vmatpush1.bf16.msra.mxu0 %v6497_v60  ;;  %v6507_v26 = vld [vmem:[#allocation117_spill] sm:$0xff]  ;;  %v6508_v60 = vld [vmem:[#allocation118_spill] sm:$0xff] }
 0x958   :  { %1630 = vmatprep.subr.bf16.mxu1 %v6498_v8  ;;  %1671 = vmatprep.subr.bf16.mxu0 %v6499_v55  ;;  %v6509_v8 = vld [vmem:[#allocation120_spill] sm:$0xff]  ;;  %v6510_v55 = vld [vmem:[#allocation119_spill] sm:$0xff] }
 0x95b   :  { %1631 = vmatpush1.bf16.msra.mxu1 %v6500_v51  ;;  %1672 = vmatpush1.bf16.msra.mxu0 %v6501_v62  ;;  %v6511_v51 = vld [vmem:[#allocation121_spill] sm:$0xff]  ;;  %v6512_v62 = vld [vmem:[#allocation122_spill] sm:$0xff] }
 0x95c   :  { %1632 = vmatprep.subr.bf16.mxu1 %v6502_v57  ;;  %1673 = vmatprep.subr.bf16.mxu0 %v6503_v14  ;;  %v6513_v57 = vld [vmem:[#allocation124_spill] sm:$0xff]  ;;  %v6514_v14 = vld [vmem:[#allocation123_spill] sm:$0xff] }
 0x95f   :  { %1633 = vmatpush1.bf16.msra.mxu1 %v6504_v25  ;;  %1674 = vmatpush1.bf16.msra.mxu0 %v6505_v0  ;;  %v6515_v25 = vld [vmem:[#allocation125_spill] sm:$0xff]  ;;  %v6516_v0 = vld [vmem:[#allocation126_spill] sm:$0xff] }
 0x960   :  { %1634 = vmatprep.subr.bf16.mxu1 %v6506_v36  ;;  %1675 = vmatprep.subr.bf16.mxu0 %v6507_v26  ;;  %v6517_v36 = vld [vmem:[#allocation128_spill] sm:$0xff]  ;;  %v6518_v26 = vld [vmem:[#allocation127_spill] sm:$0xff] }
 0x963   :  { %1635 = vmatpush1.bf16.msra.mxu1 %v6508_v60  ;;  %1676 = vmatpush1.bf16.msra.mxu0 %v6509_v8  ;;  %v6519_v60 = vld [vmem:[#allocation129_spill] sm:$0xff]  ;;  %v6520_v8 = vld [vmem:[#allocation130_spill] sm:$0xff] }
 0x964   :  { %1636 = vmatprep.subr.bf16.mxu1 %v6510_v55  ;;  %1677 = vmatprep.subr.bf16.mxu0 %v6511_v51  ;;  %v6521_v55 = vld [vmem:[#allocation131_spill] sm:$0xff] }
 0x965   :  { %v6523_v51 = vld [vmem:[#allocation63_spill] sm:$0xff] }
 0x967   :  { %1637 = vmatpush1.bf16.msra.mxu1 %v6512_v62  ;;  %1678 = vmatpush1.bf16.msra.mxu0 %v6513_v57  ;;  %v6522_v62 = vld [vmem:[#allocation14_spill] sm:$0xff] }
 0x968   :  { %1638 = vmatprep.subr.bf16.mxu1 %v6514_v14  ;;  %1679 = vmatprep.subr.bf16.mxu0 %v6515_v25 }
 0x96b   :  { %1639 = vmatpush1.bf16.msra.mxu1 %v6516_v0  ;;  %1680 = vmatpush1.bf16.msra.mxu0 %v6517_v36 }
 0x96c   :  { %1640 = vmatprep.subr.bf16.mxu1 %v6518_v26  ;;  %1681 = vmatprep.subr.bf16.mxu0 %v6519_v60 }
 0x96f   :  { %1641 = vmatpush1.bf16.msra.mxu1 %v6520_v8  ;;  %1682 = vmatpush1.bf16.msra.mxu0 %v6521_v55 }
 0x970   :  { %3477 = vmatprep.subr.bf16.mxu1 %v6309_v52  ;;  %1784 = vmatprep.subr.bf16.mxu0 %v6522_v62 }
 0xa04   :  { %v1542_v57 = vpop.f32.mrb[28].mxu1  ;;  %v1583_v14 = vpop.f32.mrb[28].mxu0 }
 0xa05   :  { %v1543_v25 = vadd.f32 %v1542_v57, %v6523_v51  ;;  %v1544_v17 = vpop.f32.mrb[29].mxu1  ;;  %v1585_v0 = vpop.f32.mrb[29].mxu0  ;;  %v1584_v55 = vadd.f32 %v1583_v14, %v6312_v18  ;;  %v6529_v14 = vld [vmem:[#allocation68_spill] sm:$0xff] }
 0xa06   :  { %v1545_v36 = vadd.f32 %v1544_v17, %v6311_v10  ;;  %v1546_v54 = vpop.f32.mrb[30].mxu1  ;;  %v1587_v26 = vpop.f32.mrb[30].mxu0  ;;  %v1586_v62 = vadd.f32 %v1585_v0, %v6313_v63 }
 0xa07   :  { %v1590_v58 = vmul.f32 0.5, %v1543_v25  ;;  %v1547_v60 = vpop.f32.mrb[31].mxu1  ;;  %v1588_v16 = vpop.f32.mrb[31].mxu0 }
 0xa08   :  { %v1594_v8 = vmul.f32 0.5, %v1545_v36  ;;  %v1599_v32 = vmul.f32 0.5, %v1586_v62 }
 0xa09   :  { %3767 = vtanh.f32 %v1590_v58 }
 0xa0a   :  { %3769 = vtanh.f32 %v1594_v8 }
 0xa0b   :  { %3771 = vtanh.f32 %v1584_v55 }
 0xa0c   :  { %3773 = vtanh.f32 %v1599_v32  ;;  %v6527_v32 = vld [vmem:[#allocation55_spill] sm:$0xff] }
 0xa13   :  { %v3768_v40 = vpop.eup %3767 }
 0xa14   :  { %v3770_v57 = vpop.eup %3769  ;;  %v1592_v51 = vmul.f32 0.5, %v3768_v40  ;;  %v6526_v40 = vld [vmem:[#allocation53_spill] sm:$0xff] }
 0xa15   :  { %v1596_v44 = vmul.f32 0.5, %v3770_v57  ;;  %v3772_v54 = vpop.eup %3771 }
 0xa16   :  { %v1593_v17 = vadd.f32 0.5, %v1592_v51  ;;  %v3774_v8 = vpop.eup %3773  ;;  %v6528_v51 = vld [vmem:[#allocation57_spill] sm:$0xff] }
 0xa17   :  { %v1597_v26 = vadd.f32 0.5, %v1596_v44  ;;  %v1601_v55 = vmul.f32 0.5, %v3774_v8  ;;  %v6525_v44 = vld [vmem:[#allocation51_spill] sm:$0xff] }
 0xa18   :  { %v1604_v25 = vmul.f32 %v3772_v54, %v1593_v17  ;;  %v6530_v54 = vld [vmem:[#allocation43_spill] sm:$0xff] }
 0xa19   :  { %v1603_v16 = vmul.f32 %v1597_v26, %v4902_v23  ;;  %v1602_v58 = vadd.f32 0.5, %v1601_v55  ;;  %v6524_v23 = vld [vmem:[#allocation49_spill] sm:$0xff] }
 0xa1b   :  { %v5080_v36 = vadd.f32 %v1604_v25, %v1603_v16 }
 0xa1d   :  { %3775 = vtanh.f32 %v5080_v36 }
 0xa27   :  { %v3776_v0 = vpop.eup %3775 }
 0xa28   :  { %v1607_v60 = vmul.f32 %v3776_v0, %v1602_v58 }
 0xa2a   :  { %v5083_v62 = vpack.c.bf16 %v1607_v60, %v1607_v60 }
 0xa2c   :  { %1643 = vmatmul.mubr.bf16.vlgmr.msra.gmra.mrb[32].mxu1 %v5083_v62  ;;  %1684 = vmatmul.mubr.bf16.vlgmr.msra.gmra.mrb[32].mxu0 %v5083_v62 }
 0xa2d   :  { %1816 = vmatprep.mubr.bf16.mxu0 %v5083_v62  ;;  %3479 = vmatpush3.bf16.msra.mxu1 %v4526_v30 }
 0xa2e   :  { %3480 = vmatprep.subr.bf16.mxu1 %v6309_v52  ;;  %3262 = vmatprep.mubr.msk.f32.mxu1 %vm3907_vm0, %v6315_v43 }
 0xa2f   :  { %1785 = vmatpush1.bf16.msra.mxu0 %v4071_v19 }
 0xa30   :  { %1786 = vmatprep.subr.bf16.mxu0 %v4074_v20 }
 0xa31   :  { %3482 = vmatpush3.bf16.msra.mxu1 %v4534_v59 }
 0xa32   :  { %3483 = vmatprep.subr.bf16.mxu1 %v6309_v52 }
 0xa33   :  { %1787 = vmatpush1.bf16.msra.mxu0 %v4079_v22 }
 0xa34   :  { %1788 = vmatprep.subr.bf16.mxu0 %v4084_v24 }
 0xa35   :  { %3485 = vmatpush3.bf16.msra.mxu1 %v4544_v1 }
 0xa36   :  { %3486 = vmatprep.subr.bf16.mxu1 %v6309_v52 }
 0xa37   :  { %1789 = vmatpush1.bf16.msra.mxu0 %v4094_v27 }
 0xa38   :  { %1790 = vmatprep.subr.bf16.mxu0 %v4097_v28 }
 0xa39   :  { %3488 = vmatpush3.bf16.msra.mxu1 %v4552_v2 }
 0xa3a   :  { %3489 = vmatprep.subr.bf16.mxu1 %v6309_v52 }
 0xa3b   :  { %1791 = vmatpush1.bf16.msra.mxu0 %v4106_v31 }
 0xa3c   :  { %1792 = vmatprep.subr.bf16.mxu0 %v4111_v33 }
 0xa3d   :  { %3491 = vmatpush3.bf16.msra.mxu1 %v4560_v3 }
 0xa3e   :  { %3492 = vmatprep.subr.bf16.mxu1 %v6309_v52 }
 0xa3f   :  { %1793 = vmatpush1.bf16.msra.mxu0 %v4114_v34 }
 0xa40   :  { %1794 = vmatprep.subr.bf16.mxu0 %v4123_v37 }
 0xa41   :  { %3494 = vmatpush3.bf16.msra.mxu1 %v4568_v4 }
 0xa42   :  { %3495 = vmatprep.subr.bf16.mxu1 %v6309_v52 }
 0xa43   :  { %1795 = vmatpush1.bf16.msra.mxu0 %v4130_v39 }
 0xa44   :  { %1796 = vmatprep.subr.bf16.mxu0 %v4135_v41 }
 0xa45   :  { %3497 = vmatpush3.bf16.msra.mxu1 %v4576_v5 }
 0xa46   :  { %3498 = vmatprep.subr.bf16.mxu1 %v6309_v52 }
 0xa47   :  { %1797 = vmatpush1.bf16.msra.mxu0 %v4138_v42 }
 0xa48   :  { %1798 = vmatprep.subr.bf16.mxu0 %v4147_v45 }
 0xa49   :  { %3500 = vmatpush3.bf16.msra.mxu1 %v4584_v6 }
 0xa4a   :  { %1825 = vmatprep.subr.bf16.mxu1 %v4077_v21 }
 0xa4b   :  { %1799 = vmatpush1.bf16.msra.mxu0 %v4154_v47 }
 0xa4c   :  { %1800 = vmatprep.subr.bf16.mxu0 %v4159_v49 }
 0xa4f   :  { %1801 = vmatpush1.bf16.msra.mxu0 %v4162_v50 }
 0xa50   :  { %1802 = vmatprep.subr.bf16.mxu0 %v4171_v53 }
 0xa53   :  { %1803 = vmatpush1.bf16.msra.mxu0 %v6203_v7 }
 0xa54   :  { %1804 = vmatprep.subr.bf16.mxu0 %v6205_v9 }
 0xa57   :  { %1805 = vmatpush1.bf16.msra.mxu0 %v6207_v11 }
 0xa58   :  { %1806 = vmatprep.subr.bf16.mxu0 %v6209_v13 }
 0xa5b   :  { %1807 = vmatpush1.bf16.msra.mxu0 %v6211_v15 }
 0xa5c   :  { %1808 = vmatprep.subr.bf16.mxu0 %v6213_v35 }
 0xa5f   :  { %1809 = vmatpush1.bf16.msra.mxu0 %v6215_v48 }
 0xa60   :  { %1810 = vmatprep.subr.bf16.mxu0 %v6217_v61 }
 0xa63   :  { %1811 = vmatpush1.bf16.msra.mxu0 %v6524_v23 }
 0xa64   :  { %1812 = vmatprep.subr.bf16.mxu0 %v6525_v44 }
 0xa67   :  { %1813 = vmatpush1.bf16.msra.mxu0 %v6526_v40 }
 0xa68   :  { %1814 = vmatprep.subr.bf16.mxu0 %v6527_v32 }
 0xa6b   :  { %1815 = vmatpush1.bf16.msra.mxu0 %v6528_v51 }
 0xa6c   :  { %1886 = vmatprep.subr.bf16.mxu0 %v6529_v14 }
 0xaff   :  { %v1644_v57 = vpop.f32.mrb[32].mxu1  ;;  %v1685_v17 = vpop.f32.mrb[32].mxu0 }
 0xb00   :  { %v1645_v26 = vadd.f32 %v1644_v57, %v6530_v54  ;;  %v1646_v25 = vpop.f32.mrb[33].mxu1  ;;  %v1687_v16 = vpop.f32.mrb[33].mxu0  ;;  %v1686_v32 = vadd.f32 %v1685_v17, %v6317_v56 }
 0xb01   :  { %v1647_v8 = vadd.f32 %v1646_v25, %v4280_v46  ;;  %v1648_v55 = vpop.f32.mrb[34].mxu1  ;;  %v1689_v58 = vpop.f32.mrb[34].mxu0  ;;  %v1688_v14 = vadd.f32 %v1687_v16, %v6318_v38 }
 0xb02   :  { %v1692_v0 = vmul.f32 0.5, %v1645_v26  ;;  %v1649_v60 = vpop.f32.mrb[35].mxu1  ;;  %v1690_v44 = vpop.f32.mrb[35].mxu0 }
 0xb03   :  { %v1696_v40 = vmul.f32 0.5, %v1647_v8  ;;  %v1701_v51 = vmul.f32 0.5, %v1688_v14  ;;  %v6537_v60 = vld [vmem:[#allocation22_spill] sm:$0xff] }
 0xb04   :  { %3777 = vtanh.f32 %v1692_v0  ;;  %v6536_v0 = vld [vmem:[#allocation21_spill] sm:$0xff] }
 0xb05   :  { %3779 = vtanh.f32 %v1696_v40 }
 0xb06   :  { %3781 = vtanh.f32 %v1686_v32 }
 0xb07   :  { %3783 = vtanh.f32 %v1701_v51  ;;  %v6533_v51 = vld [vmem:[#allocation18_spill] sm:$0xff] }
 0xb0e   :  { %v3778_v23 = vpop.eup %3777 }
 0xb0f   :  { %v3780_v57 = vpop.eup %3779  ;;  %v1694_v54 = vmul.f32 0.5, %v3778_v23  ;;  %v6531_v23 = vld [vmem:[#allocation16_spill] sm:$0xff] }
 0xb10   :  { %v1698_v61 = vmul.f32 0.5, %v3780_v57  ;;  %v3782_v55 = vpop.eup %3781  ;;  %v6538_v57 = vld [vmem:[#allocation23_spill] sm:$0xff] }
 0xb11   :  { %v1695_v25 = vadd.f32 0.5, %v1694_v54  ;;  %v3784_v40 = vpop.eup %3783  ;;  %v6535_v54 = vld [vmem:[#allocation20_spill] sm:$0xff] }
 0xb12   :  { %v1699_v58 = vadd.f32 0.5, %v1698_v61  ;;  %v1703_v32 = vmul.f32 0.5, %v3784_v40  ;;  %v6532_v61 = vld [vmem:[#allocation17_spill] sm:$0xff]  ;;  %v6545_v40 = vld [vmem:[#allocation30_spill] sm:$0xff] }
 0xb13   :  { %v1706_v26 = vmul.f32 %v3782_v55, %v1695_v25  ;;  %v6539_v25 = vld [vmem:[#allocation24_spill] sm:$0xff]  ;;  %v6541_v55 = vld [vmem:[#allocation26_spill] sm:$0xff] }
 0xb14   :  { %v1705_v44 = vmul.f32 %v1699_v58, %v4965_v29  ;;  %v1704_v17 = vadd.f32 0.5, %v1703_v32  ;;  %v6534_v29 = vld [vmem:[#allocation19_spill] sm:$0xff] }
 0xb15   :  { %v6542_v58 = vld [vmem:[#allocation27_spill] sm:$0xff] }
 0xb16   :  { %v5143_v8 = vadd.f32 %v1706_v26, %v1705_v44  ;;  %v6543_v26 = vld [vmem:[#allocation28_spill] sm:$0xff]  ;;  %v6544_v44 = vld [vmem:[#allocation29_spill] sm:$0xff]  ;;  %v6546_v32 = vld [vmem:[#allocation31_spill] sm:$0xff] }
 0xb18   :  { %3785 = vtanh.f32 %v5143_v8 }
 0xb22   :  { %v3786_v16 = vpop.eup %3785 }
 0xb23   :  { %v1709_v14 = vmul.f32 %v3786_v16, %v1704_v17  ;;  %v6547_v17 = vld [vmem:[#allocation33_spill] sm:$0xff]  ;;  %v6548_v16 = vld [vmem:[#allocation36_spill] sm:$0xff] }
 0xb25   :  { %3263 = vmatmul.mubr.f32.vlgmr.msra.gmra.mrb[18].mxu1 %v1709_v14 }
 0xb26   :  { %1857 = vmatprep.mubr.bf16.mxu1 %v5083_v62  ;;  %1826 = vmatpush1.bf16.msra.mxu1 %v6425_v12  ;;  %v6540_v62 = vld [vmem:[#allocation25_spill] sm:$0xff] }
 0xb27   :  { %1827 = vmatprep.subr.bf16.mxu1 %v6531_v23 }
 0xb2a   :  { %1828 = vmatpush1.bf16.msra.mxu1 %v6532_v61 }
 0xb2b   :  { %1829 = vmatprep.subr.bf16.mxu1 %v6533_v51 }
 0xb2e   :  { %1830 = vmatpush1.bf16.msra.mxu1 %v6534_v29 }
 0xb2f   :  { %1831 = vmatprep.subr.bf16.mxu1 %v6535_v54 }
 0xb32   :  { %1832 = vmatpush1.bf16.msra.mxu1 %v6536_v0  ;;  %v6563_v0 = vld [vmem:[#allocation35_spill] sm:$0xff] }
 0xb33   :  { %1833 = vmatprep.subr.bf16.mxu1 %v6537_v60 }
 0xb36   :  { %1834 = vmatpush1.bf16.msra.mxu1 %v6538_v57  ;;  %v6549_v57 = vld [vmem:[#allocation37_spill] sm:$0xff] }
 0xb37   :  { %1835 = vmatprep.subr.bf16.mxu1 %v6539_v25  ;;  %v6550_v25 = vld [vmem:[#allocation39_spill] sm:$0xff] }
 0xb3a   :  { %1836 = vmatpush1.bf16.msra.mxu1 %v6540_v62  ;;  %v6551_v62 = vld [vmem:[#allocation41_spill] sm:$0xff] }
 0xb3b   :  { %1837 = vmatprep.subr.bf16.mxu1 %v6541_v55  ;;  %v6552_v55 = vld [vmem:[#allocation44_spill] sm:$0xff] }
 0xb3e   :  { %1838 = vmatpush1.bf16.msra.mxu1 %v6542_v58  ;;  %v6553_v58 = vld [vmem:[#allocation46_spill] sm:$0xff] }
 0xb3f   :  { %1839 = vmatprep.subr.bf16.mxu1 %v6543_v26  ;;  %v6554_v26 = vld [vmem:[#allocation48_spill] sm:$0xff] }
 0xb42   :  { %1840 = vmatpush1.bf16.msra.mxu1 %v6544_v44  ;;  %v6555_v44 = vld [vmem:[#allocation50_spill] sm:$0xff] }
 0xb43   :  { %1841 = vmatprep.subr.bf16.mxu1 %v6545_v40  ;;  %v6556_v40 = vld [vmem:[#allocation52_spill] sm:$0xff] }
 0xb46   :  { %1842 = vmatpush1.bf16.msra.mxu1 %v6546_v32  ;;  %v6557_v32 = vld [vmem:[#allocation54_spill] sm:$0xff] }
 0xb47   :  { %1843 = vmatprep.subr.bf16.mxu1 %v6547_v17  ;;  %v6558_v17 = vld [vmem:[#allocation56_spill] sm:$0xff] }
 0xb4a   :  { %1844 = vmatpush1.bf16.msra.mxu1 %v6548_v16  ;;  %v6559_v16 = vld [vmem:[#allocation59_spill] sm:$0xff] }
 0xb4b   :  { %1845 = vmatprep.subr.bf16.mxu1 %v6549_v57  ;;  %v6560_v57 = vld [vmem:[#allocation60_spill] sm:$0xff] }
 0xb4e   :  { %1846 = vmatpush1.bf16.msra.mxu1 %v6550_v25  ;;  %v6561_v25 = vld [vmem:[#allocation71_spill] sm:$0xff] }
 0xb4f   :  { %1847 = vmatprep.subr.bf16.mxu1 %v6551_v62 }
 0xb52   :  { %1848 = vmatpush1.bf16.msra.mxu1 %v6552_v55  ;;  %v6562_v55 = vld [vmem:[#allocation13_spill] sm:$0xff] }
 0xb53   :  { %1849 = vmatprep.subr.bf16.mxu1 %v6553_v58 }
 0xb56   :  { %1850 = vmatpush1.bf16.msra.mxu1 %v6554_v26 }
 0xb57   :  { %1851 = vmatprep.subr.bf16.mxu1 %v6555_v44 }
 0xb5a   :  { %1852 = vmatpush1.bf16.msra.mxu1 %v6556_v40 }
 0xb5b   :  { %1853 = vmatprep.subr.bf16.mxu1 %v6557_v32 }
 0xb5e   :  { %1854 = vmatpush1.bf16.msra.mxu1 %v6558_v17 }
 0xb5f   :  { %1855 = vmatprep.subr.bf16.mxu1 %v6559_v16  ;;  %v1885_v16 = vpack.c.bf16 %v1709_v14, %v1709_v14  ;;  %v6573_v14 = vld [vmem:[#allocation78_spill] sm:$0xff] }
 0xb62   :  { %1856 = vmatpush1.bf16.msra.mxu1 %v6560_v57  ;;  %v6571_v57 = vld [vmem:[#allocation75_spill] sm:$0xff] }
 0xb63   :  { %1927 = vmatprep.subr.bf16.mxu1 %v6561_v25  ;;  %v6565_v25 = vld [vmem:[#allocation69_spill] sm:$0xff] }
 0xbf8   :  { %v1776_v62 = vpop.f32.mrb[18].mxu1 }
 0xbf9   :  { %v1777_v60 = vadd.f32 %v6562_v55, %v1776_v62  ;;  %v3264_v58 = vpop.f32.mrb[19].mxu1  ;;  %v6566_v62 = vld [vmem:[#allocation72_spill] sm:$0xff] }
 0xbfa   :  { %v6567_v58 = vld [vmem:[#allocation70_spill] sm:$0xff]  ;;  %v6570_v55 = vld [vmem:[#allocation76_spill] sm:$0xff] }
 0xbfb   :  { %v5181_v26 = vadd.f32 %v1777_v60, %v6563_v0  ;;  %v6568_v0 = vld [vmem:[#allocation73_spill] sm:$0xff]  ;;  %v6569_v60 = vld [vmem:[#allocation74_spill] sm:$0xff] }
 0xbfd   :  { %6564 = vst [vmem:[#allocation38_spill] sm:$0xff] %v5181_v26  ;;  %2982 = vst [vmem:[%s5828_s10 + $0x18] sm:$0xff] %v5181_v26  ;;  %v1783_v17 = vpack.c.bf16 %v5181_v26, %v5181_v26  ;;  %v6572_v26 = vld [vmem:[#allocation77_spill] sm:$0xff] }
 0xbff   :  { %1817 = vmatmul.mubr.bf16.vlgmr.msra.gmra.mrb[36].mxu0 %v1783_v17  ;;  %1858 = vmatmul.mubr.bf16.vlgmr.msra.gmra.mrb[36].mxu1 %v1783_v17  ;;  %v6574_v17 = vld [vmem:[#allocation80_spill] sm:$0xff] }
 0xc00   :  { %1918 = vmatprep.mubr.bf16.mxu0 %v1885_v16  ;;  %1959 = vmatprep.mubr.bf16.mxu1 %v1885_v16  ;;  %v6575_v16 = vld [vmem:[#allocation79_spill] sm:$0xff] }
 0xc01   :  { %1887 = vmatpush1.bf16.msra.mxu0 %v6565_v25  ;;  %1928 = vmatpush1.bf16.msra.mxu1 %v6566_v62  ;;  %v6576_v25 = vld [vmem:[#allocation81_spill] sm:$0xff]  ;;  %v6577_v62 = vld [vmem:[#allocation82_spill] sm:$0xff] }
 0xc02   :  { %1888 = vmatprep.subr.bf16.mxu0 %v6567_v58  ;;  %1929 = vmatprep.subr.bf16.mxu1 %v6568_v0  ;;  %v6578_v58 = vld [vmem:[#allocation84_spill] sm:$0xff]  ;;  %v6579_v0 = vld [vmem:[#allocation83_spill] sm:$0xff] }
 0xc05   :  { %1889 = vmatpush1.bf16.msra.mxu0 %v6569_v60  ;;  %1930 = vmatpush1.bf16.msra.mxu1 %v6570_v55  ;;  %v6580_v60 = vld [vmem:[#allocation85_spill] sm:$0xff]  ;;  %v6581_v55 = vld [vmem:[#allocation86_spill] sm:$0xff] }
 0xc06   :  { %1890 = vmatprep.subr.bf16.mxu0 %v6571_v57  ;;  %1931 = vmatprep.subr.bf16.mxu1 %v6572_v26  ;;  %v6582_v57 = vld [vmem:[#allocation88_spill] sm:$0xff]  ;;  %v6583_v26 = vld [vmem:[#allocation87_spill] sm:$0xff] }
 0xc09   :  { %1891 = vmatpush1.bf16.msra.mxu0 %v6573_v14  ;;  %1932 = vmatpush1.bf16.msra.mxu1 %v6574_v17  ;;  %v6584_v14 = vld [vmem:[#allocation89_spill] sm:$0xff]  ;;  %v6585_v17 = vld [vmem:[#allocation90_spill] sm:$0xff] }
 0xc0a   :  { %1892 = vmatprep.subr.bf16.mxu0 %v6575_v16  ;;  %1933 = vmatprep.subr.bf16.mxu1 %v6576_v25  ;;  %v6586_v16 = vld [vmem:[#allocation92_spill] sm:$0xff]  ;;  %v6587_v25 = vld [vmem:[#allocation91_spill] sm:$0xff] }
 0xc0d   :  { %1893 = vmatpush1.bf16.msra.mxu0 %v6577_v62  ;;  %1934 = vmatpush1.bf16.msra.mxu1 %v6578_v58  ;;  %v6588_v62 = vld [vmem:[#allocation93_spill] sm:$0xff]  ;;  %v6589_v58 = vld [vmem:[#allocation94_spill] sm:$0xff] }
 0xc0e   :  { %1894 = vmatprep.subr.bf16.mxu0 %v6579_v0  ;;  %1935 = vmatprep.subr.bf16.mxu1 %v6580_v60  ;;  %v6590_v0 = vld [vmem:[#allocation96_spill] sm:$0xff]  ;;  %v6591_v60 = vld [vmem:[#allocation95_spill] sm:$0xff] }
 0xc11   :  { %1895 = vmatpush1.bf16.msra.mxu0 %v6581_v55  ;;  %1936 = vmatpush1.bf16.msra.mxu1 %v6582_v57  ;;  %v6592_v55 = vld [vmem:[#allocation97_spill] sm:$0xff]  ;;  %v6593_v57 = vld [vmem:[#allocation98_spill] sm:$0xff] }
 0xc12   :  { %1896 = vmatprep.subr.bf16.mxu0 %v6583_v26  ;;  %1937 = vmatprep.subr.bf16.mxu1 %v6584_v14  ;;  %v6594_v26 = vld [vmem:[#allocation100_spill] sm:$0xff]  ;;  %v6595_v14 = vld [vmem:[#allocation99_spill] sm:$0xff] }
 0xc15   :  { %1897 = vmatpush1.bf16.msra.mxu0 %v6585_v17  ;;  %1938 = vmatpush1.bf16.msra.mxu1 %v6586_v16  ;;  %v6596_v17 = vld [vmem:[#allocation101_spill] sm:$0xff]  ;;  %v6597_v16 = vld [vmem:[#allocation102_spill] sm:$0xff] }
 0xc16   :  { %1898 = vmatprep.subr.bf16.mxu0 %v6587_v25  ;;  %1939 = vmatprep.subr.bf16.mxu1 %v6588_v62  ;;  %v6598_v25 = vld [vmem:[#allocation104_spill] sm:$0xff]  ;;  %v6599_v62 = vld [vmem:[#allocation103_spill] sm:$0xff] }
 0xc19   :  { %1899 = vmatpush1.bf16.msra.mxu0 %v6589_v58  ;;  %1940 = vmatpush1.bf16.msra.mxu1 %v6590_v0  ;;  %v6600_v58 = vld [vmem:[#allocation105_spill] sm:$0xff]  ;;  %v6601_v0 = vld [vmem:[#allocation106_spill] sm:$0xff] }
 0xc1a   :  { %1900 = vmatprep.subr.bf16.mxu0 %v6591_v60  ;;  %1941 = vmatprep.subr.bf16.mxu1 %v6592_v55  ;;  %v6602_v60 = vld [vmem:[#allocation108_spill] sm:$0xff]  ;;  %v6603_v55 = vld [vmem:[#allocation107_spill] sm:$0xff] }
 0xc1d   :  { %1901 = vmatpush1.bf16.msra.mxu0 %v6593_v57  ;;  %1942 = vmatpush1.bf16.msra.mxu1 %v6594_v26  ;;  %v6604_v57 = vld [vmem:[#allocation109_spill] sm:$0xff]  ;;  %v6605_v26 = vld [vmem:[#allocation110_spill] sm:$0xff] }
 0xc1e   :  { %1902 = vmatprep.subr.bf16.mxu0 %v6595_v14  ;;  %1943 = vmatprep.subr.bf16.mxu1 %v6596_v17  ;;  %v6606_v14 = vld [vmem:[#allocation112_spill] sm:$0xff]  ;;  %v6607_v17 = vld [vmem:[#allocation111_spill] sm:$0xff] }
 0xc21   :  { %1903 = vmatpush1.bf16.msra.mxu0 %v6597_v16  ;;  %1944 = vmatpush1.bf16.msra.mxu1 %v6598_v25  ;;  %v6608_v16 = vld [vmem:[#allocation113_spill] sm:$0xff]  ;;  %v6609_v25 = vld [vmem:[#allocation114_spill] sm:$0xff] }
 0xc22   :  { %1904 = vmatprep.subr.bf16.mxu0 %v6599_v62  ;;  %1945 = vmatprep.subr.bf16.mxu1 %v6600_v58  ;;  %v6610_v62 = vld [vmem:[#allocation116_spill] sm:$0xff]  ;;  %v6611_v58 = vld [vmem:[#allocation115_spill] sm:$0xff] }
 0xc25   :  { %1905 = vmatpush1.bf16.msra.mxu0 %v6601_v0  ;;  %1946 = vmatpush1.bf16.msra.mxu1 %v6602_v60  ;;  %v6612_v0 = vld [vmem:[#allocation117_spill] sm:$0xff]  ;;  %v6613_v60 = vld [vmem:[#allocation118_spill] sm:$0xff] }
 0xc26   :  { %1906 = vmatprep.subr.bf16.mxu0 %v6603_v55  ;;  %1947 = vmatprep.subr.bf16.mxu1 %v6604_v57  ;;  %v6614_v55 = vld [vmem:[#allocation120_spill] sm:$0xff]  ;;  %v6615_v57 = vld [vmem:[#allocation119_spill] sm:$0xff] }
 0xc29   :  { %1907 = vmatpush1.bf16.msra.mxu0 %v6605_v26  ;;  %1948 = vmatpush1.bf16.msra.mxu1 %v6606_v14  ;;  %v6616_v26 = vld [vmem:[#allocation121_spill] sm:$0xff]  ;;  %v6617_v14 = vld [vmem:[#allocation122_spill] sm:$0xff] }
 0xc2a   :  { %1908 = vmatprep.subr.bf16.mxu0 %v6607_v17  ;;  %1949 = vmatprep.subr.bf16.mxu1 %v6608_v16  ;;  %v6618_v17 = vld [vmem:[#allocation124_spill] sm:$0xff]  ;;  %v6619_v16 = vld [vmem:[#allocation123_spill] sm:$0xff] }
 0xc2d   :  { %1909 = vmatpush1.bf16.msra.mxu0 %v6609_v25  ;;  %1950 = vmatpush1.bf16.msra.mxu1 %v6610_v62  ;;  %v6620_v25 = vld [vmem:[#allocation125_spill] sm:$0xff]  ;;  %v6621_v62 = vld [vmem:[#allocation126_spill] sm:$0xff] }
 0xc2e   :  { %1910 = vmatprep.subr.bf16.mxu0 %v6611_v58  ;;  %1951 = vmatprep.subr.bf16.mxu1 %v6612_v0  ;;  %v6622_v58 = vld [vmem:[#allocation128_spill] sm:$0xff]  ;;  %v6623_v0 = vld [vmem:[#allocation127_spill] sm:$0xff] }
 0xc31   :  { %1911 = vmatpush1.bf16.msra.mxu0 %v6613_v60  ;;  %1952 = vmatpush1.bf16.msra.mxu1 %v6614_v55  ;;  %v6624_v60 = vld [vmem:[#allocation129_spill] sm:$0xff]  ;;  %v6625_v55 = vld [vmem:[#allocation130_spill] sm:$0xff] }
 0xc32   :  { %1912 = vmatprep.subr.bf16.mxu0 %v6615_v57  ;;  %1953 = vmatprep.subr.bf16.mxu1 %v6616_v26  ;;  %v6626_v57 = vld [vmem:[#allocation131_spill] sm:$0xff] }
 0xc33   :  { %v6628_v26 = vld [vmem:[#allocation63_spill] sm:$0xff] }
 0xc35   :  { %1913 = vmatpush1.bf16.msra.mxu0 %v6617_v14  ;;  %1954 = vmatpush1.bf16.msra.mxu1 %v6618_v17  ;;  %v6627_v14 = vld [vmem:[#allocation14_spill] sm:$0xff] }
 0xc36   :  { %1914 = vmatprep.subr.bf16.mxu0 %v6619_v16  ;;  %1955 = vmatprep.subr.bf16.mxu1 %v6620_v25 }
 0xc39   :  { %1915 = vmatpush1.bf16.msra.mxu0 %v6621_v62  ;;  %1956 = vmatpush1.bf16.msra.mxu1 %v6622_v58 }
 0xc3a   :  { %1916 = vmatprep.subr.bf16.mxu0 %v6623_v0  ;;  %1957 = vmatprep.subr.bf16.mxu1 %v6624_v60 }
 0xc3d   :  { %1917 = vmatpush1.bf16.msra.mxu0 %v6625_v55  ;;  %1958 = vmatpush1.bf16.msra.mxu1 %v6626_v57 }
 0xc3e   :  { %3501 = vmatprep.subr.bf16.mxu0 %v6309_v52  ;;  %2060 = vmatprep.subr.bf16.mxu1 %v6627_v14 }
 0xcd2   :  { %v1818_v17 = vpop.f32.mrb[36].mxu0  ;;  %v1859_v16 = vpop.f32.mrb[36].mxu1 }
 0xcd3   :  { %v1819_v25 = vadd.f32 %v1818_v17, %v6628_v26  ;;  %v1820_v32 = vpop.f32.mrb[37].mxu0  ;;  %v1861_v62 = vpop.f32.mrb[37].mxu1  ;;  %v1860_v57 = vadd.f32 %v1859_v16, %v6312_v18  ;;  %v6634_v16 = vld [vmem:[#allocation57_spill] sm:$0xff] }
 0xcd4   :  { %v1821_v58 = vadd.f32 %v1820_v32, %v6311_v10  ;;  %v1822_v40 = vpop.f32.mrb[38].mxu0  ;;  %v1863_v0 = vpop.f32.mrb[38].mxu1  ;;  %v1862_v14 = vadd.f32 %v1861_v62, %v6313_v63 }
 0xcd5   :  { %v1866_v44 = vmul.f32 0.5, %v1819_v25  ;;  %v1823_v60 = vpop.f32.mrb[39].mxu0  ;;  %v1864_v54 = vpop.f32.mrb[39].mxu1 }
 0xcd6   :  { %v1870_v55 = vmul.f32 0.5, %v1821_v58  ;;  %v1875_v29 = vmul.f32 0.5, %v1862_v14 }
 0xcd7   :  { %3787 = vtanh.f32 %v1866_v44 }
 0xcd8   :  { %3789 = vtanh.f32 %v1870_v55 }
 0xcd9   :  { %3791 = vtanh.f32 %v1860_v57 }
 0xcda   :  { %3793 = vtanh.f32 %v1875_v29  ;;  %v6632_v29 = vld [vmem:[#allocation53_spill] sm:$0xff] }
 0xce1   :  { %v3788_v51 = vpop.eup %3787 }
 0xce2   :  { %v3790_v17 = vpop.eup %3789  ;;  %v1868_v26 = vmul.f32 0.5, %v3788_v51  ;;  %v6631_v51 = vld [vmem:[#allocation51_spill] sm:$0xff] }
 0xce3   :  { %v1872_v61 = vmul.f32 0.5, %v3790_v17  ;;  %v3792_v40 = vpop.eup %3791  ;;  %v6635_v17 = vld [vmem:[#allocation68_spill] sm:$0xff] }
 0xce4   :  { %v1869_v32 = vadd.f32 0.5, %v1868_v26  ;;  %v3794_v55 = vpop.eup %3793  ;;  %v6633_v26 = vld [vmem:[#allocation55_spill] sm:$0xff] }
 0xce5   :  { %v1873_v0 = vadd.f32 0.5, %v1872_v61  ;;  %v1877_v57 = vmul.f32 0.5, %v3794_v55  ;;  %v6630_v61 = vld [vmem:[#allocation49_spill] sm:$0xff] }
 0xce6   :  { %v1880_v25 = vmul.f32 %v3792_v40, %v1869_v32 }
 0xce7   :  { %v1879_v54 = vmul.f32 %v1873_v0, %v5080_v36  ;;  %v1878_v44 = vadd.f32 0.5, %v1877_v57  ;;  %v6629_v36 = vld [vmem:[#allocation47_spill] sm:$0xff] }
 0xce8   :  { %v6636_v0 = vld [vmem:[#allocation43_spill] sm:$0xff] }
 0xce9   :  { %v5258_v58 = vadd.f32 %v1880_v25, %v1879_v54 }
 0xceb   :  { %3795 = vtanh.f32 %v5258_v58 }
 0xcf5   :  { %v3796_v62 = vpop.eup %3795 }
 0xcf6   :  { %v1883_v60 = vmul.f32 %v3796_v62, %v1878_v44 }
 0xcf8   :  { %v5261_v14 = vpack.c.bf16 %v1883_v60, %v1883_v60 }
 0xcfa   :  { %1919 = vmatmul.mubr.bf16.vlgmr.msra.gmra.mrb[40].mxu0 %v5261_v14  ;;  %1960 = vmatmul.mubr.bf16.vlgmr.msra.gmra.mrb[40].mxu1 %v5261_v14 }
 0xcfb   :  { %2092 = vmatprep.mubr.bf16.mxu1 %v5261_v14  ;;  %3503 = vmatpush3.bf16.msra.mxu0 %v4526_v30 }
 0xcfc   :  { %3504 = vmatprep.subr.bf16.mxu0 %v6309_v52  ;;  %3297 = vmatprep.mubr.msk.f32.mxu0 %vm3907_vm0, %v6315_v43 }
 0xcfd   :  { %2061 = vmatpush1.bf16.msra.mxu1 %v4071_v19 }
 0xcfe   :  { %2062 = vmatprep.subr.bf16.mxu1 %v4074_v20 }
 0xcff   :  { %3506 = vmatpush3.bf16.msra.mxu0 %v4534_v59 }
 0xd00   :  { %3507 = vmatprep.subr.bf16.mxu0 %v6309_v52 }
 0xd01   :  { %2063 = vmatpush1.bf16.msra.mxu1 %v4079_v22 }
 0xd02   :  { %2064 = vmatprep.subr.bf16.mxu1 %v4084_v24 }
 0xd03   :  { %3509 = vmatpush3.bf16.msra.mxu0 %v4544_v1 }
 0xd04   :  { %3510 = vmatprep.subr.bf16.mxu0 %v6309_v52 }
 0xd05   :  { %2065 = vmatpush1.bf16.msra.mxu1 %v4094_v27 }
 0xd06   :  { %2066 = vmatprep.subr.bf16.mxu1 %v4097_v28 }
 0xd07   :  { %3512 = vmatpush3.bf16.msra.mxu0 %v4552_v2 }
 0xd08   :  { %3513 = vmatprep.subr.bf16.mxu0 %v6309_v52 }
 0xd09   :  { %2067 = vmatpush1.bf16.msra.mxu1 %v4106_v31 }
 0xd0a   :  { %2068 = vmatprep.subr.bf16.mxu1 %v4111_v33 }
 0xd0b   :  { %3515 = vmatpush3.bf16.msra.mxu0 %v4560_v3 }
 0xd0c   :  { %3516 = vmatprep.subr.bf16.mxu0 %v6309_v52 }
 0xd0d   :  { %2069 = vmatpush1.bf16.msra.mxu1 %v4114_v34 }
 0xd0e   :  { %2070 = vmatprep.subr.bf16.mxu1 %v4123_v37 }
 0xd0f   :  { %3518 = vmatpush3.bf16.msra.mxu0 %v4568_v4 }
 0xd10   :  { %3519 = vmatprep.subr.bf16.mxu0 %v6309_v52 }
 0xd11   :  { %2071 = vmatpush1.bf16.msra.mxu1 %v4130_v39 }
 0xd12   :  { %2072 = vmatprep.subr.bf16.mxu1 %v4135_v41 }
 0xd13   :  { %3521 = vmatpush3.bf16.msra.mxu0 %v4576_v5 }
 0xd14   :  { %3522 = vmatprep.subr.bf16.mxu0 %v6309_v52 }
 0xd15   :  { %2073 = vmatpush1.bf16.msra.mxu1 %v4138_v42 }
 0xd16   :  { %2074 = vmatprep.subr.bf16.mxu1 %v4147_v45 }
 0xd17   :  { %3524 = vmatpush3.bf16.msra.mxu0 %v4584_v6 }
 0xd18   :  { %2101 = vmatprep.subr.bf16.mxu0 %v4077_v21 }
 0xd19   :  { %2075 = vmatpush1.bf16.msra.mxu1 %v4154_v47 }
 0xd1a   :  { %2076 = vmatprep.subr.bf16.mxu1 %v4159_v49 }
 0xd1d   :  { %2077 = vmatpush1.bf16.msra.mxu1 %v4162_v50 }
 0xd1e   :  { %2078 = vmatprep.subr.bf16.mxu1 %v4171_v53 }
 0xd21   :  { %2079 = vmatpush1.bf16.msra.mxu1 %v6203_v7 }
 0xd22   :  { %2080 = vmatprep.subr.bf16.mxu1 %v6205_v9 }
 0xd25   :  { %2081 = vmatpush1.bf16.msra.mxu1 %v6207_v11 }
 0xd26   :  { %2082 = vmatprep.subr.bf16.mxu1 %v6209_v13 }
 0xd29   :  { %2083 = vmatpush1.bf16.msra.mxu1 %v6211_v15 }
 0xd2a   :  { %2084 = vmatprep.subr.bf16.mxu1 %v6213_v35 }
 0xd2d   :  { %2085 = vmatpush1.bf16.msra.mxu1 %v6215_v48 }
 0xd2e   :  { %2086 = vmatprep.subr.bf16.mxu1 %v6629_v36 }
 0xd31   :  { %2087 = vmatpush1.bf16.msra.mxu1 %v6630_v61 }
 0xd32   :  { %2088 = vmatprep.subr.bf16.mxu1 %v6631_v51 }
 0xd35   :  { %2089 = vmatpush1.bf16.msra.mxu1 %v6632_v29 }
 0xd36   :  { %2090 = vmatprep.subr.bf16.mxu1 %v6633_v26 }
 0xd39   :  { %2091 = vmatpush1.bf16.msra.mxu1 %v6634_v16 }
 0xd3a   :  { %2162 = vmatprep.subr.bf16.mxu1 %v6635_v17 }
 0xdcd   :  { %v1920_v32 = vpop.f32.mrb[40].mxu0  ;;  %v1961_v40 = vpop.f32.mrb[40].mxu1 }
 0xdce   :  { %v1921_v25 = vadd.f32 %v1920_v32, %v6636_v0  ;;  %v1922_v54 = vpop.f32.mrb[41].mxu0  ;;  %v1963_v55 = vpop.f32.mrb[41].mxu1  ;;  %v1962_v26 = vadd.f32 %v1961_v40, %v6317_v56 }
 0xdcf   :  { %v1923_v57 = vadd.f32 %v1922_v54, %v4280_v46  ;;  %v1924_v44 = vpop.f32.mrb[42].mxu0  ;;  %v1965_v62 = vpop.f32.mrb[42].mxu1  ;;  %v1964_v17 = vadd.f32 %v1963_v55, %v6318_v38 }
 0xdd0   :  { %v1968_v60 = vmul.f32 0.5, %v1921_v25  ;;  %v1925_v51 = vpop.f32.mrb[43].mxu0  ;;  %v1966_v61 = vpop.f32.mrb[43].mxu1 }
 0xdd1   :  { %v1972_v29 = vmul.f32 0.5, %v1923_v57  ;;  %v1977_v16 = vmul.f32 0.5, %v1964_v17  ;;  %v6642_v57 = vld [vmem:[#allocation22_spill] sm:$0xff] }
 0xdd2   :  { %3797 = vtanh.f32 %v1968_v60  ;;  %v6643_v60 = vld [vmem:[#allocation23_spill] sm:$0xff] }
 0xdd3   :  { %3799 = vtanh.f32 %v1972_v29 }
 0xdd4   :  { %3801 = vtanh.f32 %v1962_v26 }
 0xdd5   :  { %3803 = vtanh.f32 %v1977_v16  ;;  %v6640_v16 = vld [vmem:[#allocation20_spill] sm:$0xff] }
 0xddc   :  { %v3798_v36 = vpop.eup %3797 }
 0xddd   :  { %v3800_v32 = vpop.eup %3799  ;;  %v1970_v0 = vmul.f32 0.5, %v3798_v36  ;;  %v6638_v36 = vld [vmem:[#allocation18_spill] sm:$0xff] }
 0xdde   :  { %v1974_v48 = vmul.f32 0.5, %v3800_v32  ;;  %v3802_v44 = vpop.eup %3801  ;;  %v6644_v32 = vld [vmem:[#allocation24_spill] sm:$0xff] }
 0xddf   :  { %v1971_v54 = vadd.f32 0.5, %v1970_v0  ;;  %v3804_v29 = vpop.eup %3803  ;;  %v6641_v0 = vld [vmem:[#allocation21_spill] sm:$0xff] }
 0xde0   :  { %v1975_v62 = vadd.f32 0.5, %v1974_v48  ;;  %v1979_v26 = vmul.f32 0.5, %v3804_v29  ;;  %v6637_v48 = vld [vmem:[#allocation17_spill] sm:$0xff]  ;;  %v6651_v29 = vld [vmem:[#allocation31_spill] sm:$0xff] }
 0xde1   :  { %v1982_v25 = vmul.f32 %v3802_v44, %v1971_v54  ;;  %v6646_v54 = vld [vmem:[#allocation26_spill] sm:$0xff]  ;;  %v6647_v44 = vld [vmem:[#allocation27_spill] sm:$0xff] }
 0xde2   :  { %v1981_v61 = vmul.f32 %v1975_v62, %v5143_v8  ;;  %v1980_v40 = vadd.f32 0.5, %v1979_v26  ;;  %v6639_v8 = vld [vmem:[#allocation19_spill] sm:$0xff]  ;;  %v6648_v62 = vld [vmem:[#allocation28_spill] sm:$0xff]  ;;  %v6652_v26 = vld [vmem:[#allocation33_spill] sm:$0xff] }
 0xde4   :  { %v5321_v51 = vadd.f32 %v1982_v25, %v1981_v61  ;;  %v6649_v25 = vld [vmem:[#allocation29_spill] sm:$0xff]  ;;  %v6650_v61 = vld [vmem:[#allocation30_spill] sm:$0xff] }
 0xde6   :  { %3805 = vtanh.f32 %v5321_v51 }
 0xdf0   :  { %v3806_v55 = vpop.eup %3805 }
 0xdf1   :  { %v1985_v17 = vmul.f32 %v3806_v55, %v1980_v40  ;;  %v6653_v40 = vld [vmem:[#allocation36_spill] sm:$0xff]  ;;  %v6654_v55 = vld [vmem:[#allocation37_spill] sm:$0xff] }
 0xdf3   :  { %3298 = vmatmul.mubr.f32.vlgmr.msra.gmra.mrb[44].mxu0 %v1985_v17 }
 0xdf4   :  { %2133 = vmatprep.mubr.bf16.mxu0 %v5261_v14  ;;  %2102 = vmatpush1.bf16.msra.mxu0 %v6425_v12  ;;  %v6645_v14 = vld [vmem:[#allocation25_spill] sm:$0xff] }
 0xdf5   :  { %2103 = vmatprep.subr.bf16.mxu0 %v6531_v23 }
 0xdf8   :  { %2104 = vmatpush1.bf16.msra.mxu0 %v6637_v48 }
 0xdf9   :  { %2105 = vmatprep.subr.bf16.mxu0 %v6638_v36 }
 0xdfc   :  { %2106 = vmatpush1.bf16.msra.mxu0 %v6639_v8 }
 0xdfd   :  { %2107 = vmatprep.subr.bf16.mxu0 %v6640_v16 }
 0xe00   :  { %2108 = vmatpush1.bf16.msra.mxu0 %v6641_v0 }
 0xe01   :  { %2109 = vmatprep.subr.bf16.mxu0 %v6642_v57  ;;  %v6668_v57 = vld [vmem:[#allocation38_spill] sm:$0xff] }
 0xe04   :  { %2110 = vmatpush1.bf16.msra.mxu0 %v6643_v60 }
 0xe05   :  { %2111 = vmatprep.subr.bf16.mxu0 %v6644_v32  ;;  %v6655_v32 = vld [vmem:[#allocation39_spill] sm:$0xff] }
 0xe08   :  { %2112 = vmatpush1.bf16.msra.mxu0 %v6645_v14  ;;  %v6656_v14 = vld [vmem:[#allocation41_spill] sm:$0xff] }
 0xe09   :  { %2113 = vmatprep.subr.bf16.mxu0 %v6646_v54  ;;  %v6657_v54 = vld [vmem:[#allocation44_spill] sm:$0xff] }
 0xe0c   :  { %2114 = vmatpush1.bf16.msra.mxu0 %v6647_v44  ;;  %v6658_v44 = vld [vmem:[#allocation46_spill] sm:$0xff] }
 0xe0d   :  { %2115 = vmatprep.subr.bf16.mxu0 %v6648_v62  ;;  %v6659_v62 = vld [vmem:[#allocation48_spill] sm:$0xff] }
 0xe10   :  { %2116 = vmatpush1.bf16.msra.mxu0 %v6649_v25  ;;  %v6660_v25 = vld [vmem:[#allocation50_spill] sm:$0xff] }
 0xe11   :  { %2117 = vmatprep.subr.bf16.mxu0 %v6650_v61  ;;  %v6661_v61 = vld [vmem:[#allocation52_spill] sm:$0xff] }
 0xe14   :  { %2118 = vmatpush1.bf16.msra.mxu0 %v6651_v29  ;;  %v6662_v29 = vld [vmem:[#allocation54_spill] sm:$0xff] }
 0xe15   :  { %2119 = vmatprep.subr.bf16.mxu0 %v6652_v26  ;;  %v6663_v26 = vld [vmem:[#allocation56_spill] sm:$0xff] }
 0xe18   :  { %2120 = vmatpush1.bf16.msra.mxu0 %v6653_v40  ;;  %v6664_v40 = vld [vmem:[#allocation59_spill] sm:$0xff] }
 0xe19   :  { %2121 = vmatprep.subr.bf16.mxu0 %v6654_v55  ;;  %v6665_v55 = vld [vmem:[#allocation60_spill] sm:$0xff] }
 0xe1c   :  { %2122 = vmatpush1.bf16.msra.mxu0 %v6655_v32  ;;  %v6666_v32 = vld [vmem:[#allocation71_spill] sm:$0xff] }
 0xe1d   :  { %2123 = vmatprep.subr.bf16.mxu0 %v6656_v14 }
 0xe20   :  { %2124 = vmatpush1.bf16.msra.mxu0 %v6657_v54  ;;  %v6667_v54 = vld [vmem:[#allocation13_spill] sm:$0xff] }
 0xe21   :  { %2125 = vmatprep.subr.bf16.mxu0 %v6658_v44 }
 0xe24   :  { %2126 = vmatpush1.bf16.msra.mxu0 %v6659_v62 }
 0xe25   :  { %2127 = vmatprep.subr.bf16.mxu0 %v6660_v25 }
 0xe28   :  { %2128 = vmatpush1.bf16.msra.mxu0 %v6661_v61 }
 0xe29   :  { %2129 = vmatprep.subr.bf16.mxu0 %v6662_v29 }
 0xe2c   :  { %2130 = vmatpush1.bf16.msra.mxu0 %v6663_v26 }
 0xe2d   :  { %2131 = vmatprep.subr.bf16.mxu0 %v6664_v40  ;;  %v2161_v40 = vpack.c.bf16 %v1985_v17, %v1985_v17  ;;  %v6678_v17 = vld [vmem:[#allocation78_spill] sm:$0xff] }
 0xe30   :  { %2132 = vmatpush1.bf16.msra.mxu0 %v6665_v55  ;;  %v6676_v55 = vld [vmem:[#allocation75_spill] sm:$0xff] }
 0xe31   :  { %2203 = vmatprep.subr.bf16.mxu0 %v6666_v32  ;;  %v6670_v32 = vld [vmem:[#allocation69_spill] sm:$0xff] }
 0xec6   :  { %v2052_v14 = vpop.f32.mrb[44].mxu0 }
 0xec7   :  { %v2053_v60 = vadd.f32 %v6667_v54, %v2052_v14  ;;  %v3299_v44 = vpop.f32.mrb[45].mxu0  ;;  %v6671_v14 = vld [vmem:[#allocation72_spill] sm:$0xff] }
 0xec8   :  { %v6672_v44 = vld [vmem:[#allocation70_spill] sm:$0xff]  ;;  %v6675_v54 = vld [vmem:[#allocation76_spill] sm:$0xff] }
 0xec9   :  { %v5359_v62 = vadd.f32 %v2053_v60, %v6668_v57  ;;  %v6673_v57 = vld [vmem:[#allocation73_spill] sm:$0xff]  ;;  %v6674_v60 = vld [vmem:[#allocation74_spill] sm:$0xff] }
 0xecb   :  { %6669 = vst [vmem:[#allocation40_spill] sm:$0xff] %v5359_v62  ;;  %2983 = vst [vmem:[%s5828_s10 + $0x20] sm:$0xff] %v5359_v62  ;;  %v2059_v26 = vpack.c.bf16 %v5359_v62, %v5359_v62  ;;  %v6677_v62 = vld [vmem:[#allocation77_spill] sm:$0xff] }
 0xecd   :  { %2093 = vmatmul.mubr.bf16.vlgmr.msra.gmra.mrb[44].mxu1 %v2059_v26  ;;  %2134 = vmatmul.mubr.bf16.vlgmr.msra.gmra.mrb[48].mxu0 %v2059_v26  ;;  %v6679_v26 = vld [vmem:[#allocation80_spill] sm:$0xff] }
 0xece   :  { %2194 = vmatprep.mubr.bf16.mxu1 %v2161_v40  ;;  %2235 = vmatprep.mubr.bf16.mxu0 %v2161_v40  ;;  %v6680_v40 = vld [vmem:[#allocation79_spill] sm:$0xff] }
 0xecf   :  { %2163 = vmatpush1.bf16.msra.mxu1 %v6670_v32  ;;  %2204 = vmatpush1.bf16.msra.mxu0 %v6671_v14  ;;  %v6681_v32 = vld [vmem:[#allocation81_spill] sm:$0xff]  ;;  %v6682_v14 = vld [vmem:[#allocation82_spill] sm:$0xff] }
 0xed0   :  { %2164 = vmatprep.subr.bf16.mxu1 %v6672_v44  ;;  %2205 = vmatprep.subr.bf16.mxu0 %v6673_v57  ;;  %v6683_v44 = vld [vmem:[#allocation84_spill] sm:$0xff]  ;;  %v6684_v57 = vld [vmem:[#allocation83_spill] sm:$0xff] }
 0xed3   :  { %2165 = vmatpush1.bf16.msra.mxu1 %v6674_v60  ;;  %2206 = vmatpush1.bf16.msra.mxu0 %v6675_v54  ;;  %v6685_v60 = vld [vmem:[#allocation85_spill] sm:$0xff]  ;;  %v6686_v54 = vld [vmem:[#allocation86_spill] sm:$0xff] }
 0xed4   :  { %2166 = vmatprep.subr.bf16.mxu1 %v6676_v55  ;;  %2207 = vmatprep.subr.bf16.mxu0 %v6677_v62  ;;  %v6687_v55 = vld [vmem:[#allocation88_spill] sm:$0xff]  ;;  %v6688_v62 = vld [vmem:[#allocation87_spill] sm:$0xff] }
 0xed7   :  { %2167 = vmatpush1.bf16.msra.mxu1 %v6678_v17  ;;  %2208 = vmatpush1.bf16.msra.mxu0 %v6679_v26  ;;  %v6689_v17 = vld [vmem:[#allocation89_spill] sm:$0xff]  ;;  %v6690_v26 = vld [vmem:[#allocation90_spill] sm:$0xff] }
 0xed8   :  { %2168 = vmatprep.subr.bf16.mxu1 %v6680_v40  ;;  %2209 = vmatprep.subr.bf16.mxu0 %v6681_v32  ;;  %v6691_v40 = vld [vmem:[#allocation92_spill] sm:$0xff]  ;;  %v6692_v32 = vld [vmem:[#allocation91_spill] sm:$0xff] }
 0xedb   :  { %2169 = vmatpush1.bf16.msra.mxu1 %v6682_v14  ;;  %2210 = vmatpush1.bf16.msra.mxu0 %v6683_v44  ;;  %v6693_v14 = vld [vmem:[#allocation93_spill] sm:$0xff]  ;;  %v6694_v44 = vld [vmem:[#allocation94_spill] sm:$0xff] }
 0xedc   :  { %2170 = vmatprep.subr.bf16.mxu1 %v6684_v57  ;;  %2211 = vmatprep.subr.bf16.mxu0 %v6685_v60  ;;  %v6695_v57 = vld [vmem:[#allocation96_spill] sm:$0xff]  ;;  %v6696_v60 = vld [vmem:[#allocation95_spill] sm:$0xff] }
 0xedf   :  { %2171 = vmatpush1.bf16.msra.mxu1 %v6686_v54  ;;  %2212 = vmatpush1.bf16.msra.mxu0 %v6687_v55  ;;  %v6697_v54 = vld [vmem:[#allocation97_spill] sm:$0xff]  ;;  %v6698_v55 = vld [vmem:[#allocation98_spill] sm:$0xff] }
 0xee0   :  { %2172 = vmatprep.subr.bf16.mxu1 %v6688_v62  ;;  %2213 = vmatprep.subr.bf16.mxu0 %v6689_v17  ;;  %v6699_v62 = vld [vmem:[#allocation100_spill] sm:$0xff]  ;;  %v6700_v17 = vld [vmem:[#allocation99_spill] sm:$0xff] }
 0xee3   :  { %2173 = vmatpush1.bf16.msra.mxu1 %v6690_v26  ;;  %2214 = vmatpush1.bf16.msra.mxu0 %v6691_v40  ;;  %v6701_v26 = vld [vmem:[#allocation101_spill] sm:$0xff]  ;;  %v6702_v40 = vld [vmem:[#allocation102_spill] sm:$0xff] }
 0xee4   :  { %2174 = vmatprep.subr.bf16.mxu1 %v6692_v32  ;;  %2215 = vmatprep.subr.bf16.mxu0 %v6693_v14  ;;  %v6703_v32 = vld [vmem:[#allocation104_spill] sm:$0xff]  ;;  %v6704_v14 = vld [vmem:[#allocation103_spill] sm:$0xff] }
 0xee7   :  { %2175 = vmatpush1.bf16.msra.mxu1 %v6694_v44  ;;  %2216 = vmatpush1.bf16.msra.mxu0 %v6695_v57  ;;  %v6705_v44 = vld [vmem:[#allocation105_spill] sm:$0xff]  ;;  %v6706_v57 = vld [vmem:[#allocation106_spill] sm:$0xff] }
 0xee8   :  { %2176 = vmatprep.subr.bf16.mxu1 %v6696_v60  ;;  %2217 = vmatprep.subr.bf16.mxu0 %v6697_v54  ;;  %v6707_v60 = vld [vmem:[#allocation108_spill] sm:$0xff]  ;;  %v6708_v54 = vld [vmem:[#allocation107_spill] sm:$0xff] }
 0xeeb   :  { %2177 = vmatpush1.bf16.msra.mxu1 %v6698_v55  ;;  %2218 = vmatpush1.bf16.msra.mxu0 %v6699_v62  ;;  %v6709_v55 = vld [vmem:[#allocation109_spill] sm:$0xff]  ;;  %v6710_v62 = vld [vmem:[#allocation110_spill] sm:$0xff] }
 0xeec   :  { %2178 = vmatprep.subr.bf16.mxu1 %v6700_v17  ;;  %2219 = vmatprep.subr.bf16.mxu0 %v6701_v26  ;;  %v6711_v17 = vld [vmem:[#allocation112_spill] sm:$0xff]  ;;  %v6712_v26 = vld [vmem:[#allocation111_spill] sm:$0xff] }
 0xeef   :  { %2179 = vmatpush1.bf16.msra.mxu1 %v6702_v40  ;;  %2220 = vmatpush1.bf16.msra.mxu0 %v6703_v32  ;;  %v6713_v40 = vld [vmem:[#allocation113_spill] sm:$0xff]  ;;  %v6714_v32 = vld [vmem:[#allocation114_spill] sm:$0xff] }
 0xef0   :  { %2180 = vmatprep.subr.bf16.mxu1 %v6704_v14  ;;  %2221 = vmatprep.subr.bf16.mxu0 %v6705_v44  ;;  %v6715_v14 = vld [vmem:[#allocation116_spill] sm:$0xff]  ;;  %v6716_v44 = vld [vmem:[#allocation115_spill] sm:$0xff] }
 0xef3   :  { %2181 = vmatpush1.bf16.msra.mxu1 %v6706_v57  ;;  %2222 = vmatpush1.bf16.msra.mxu0 %v6707_v60  ;;  %v6717_v57 = vld [vmem:[#allocation117_spill] sm:$0xff]  ;;  %v6718_v60 = vld [vmem:[#allocation118_spill] sm:$0xff] }
 0xef4   :  { %2182 = vmatprep.subr.bf16.mxu1 %v6708_v54  ;;  %2223 = vmatprep.subr.bf16.mxu0 %v6709_v55  ;;  %v6719_v54 = vld [vmem:[#allocation120_spill] sm:$0xff]  ;;  %v6720_v55 = vld [vmem:[#allocation119_spill] sm:$0xff] }
 0xef7   :  { %2183 = vmatpush1.bf16.msra.mxu1 %v6710_v62  ;;  %2224 = vmatpush1.bf16.msra.mxu0 %v6711_v17  ;;  %v6721_v62 = vld [vmem:[#allocation121_spill] sm:$0xff]  ;;  %v6722_v17 = vld [vmem:[#allocation122_spill] sm:$0xff] }
 0xef8   :  { %2184 = vmatprep.subr.bf16.mxu1 %v6712_v26  ;;  %2225 = vmatprep.subr.bf16.mxu0 %v6713_v40  ;;  %v6723_v26 = vld [vmem:[#allocation124_spill] sm:$0xff]  ;;  %v6724_v40 = vld [vmem:[#allocation123_spill] sm:$0xff] }
 0xefb   :  { %2185 = vmatpush1.bf16.msra.mxu1 %v6714_v32  ;;  %2226 = vmatpush1.bf16.msra.mxu0 %v6715_v14  ;;  %v6725_v32 = vld [vmem:[#allocation125_spill] sm:$0xff]  ;;  %v6726_v14 = vld [vmem:[#allocation126_spill] sm:$0xff] }
 0xefc   :  { %2186 = vmatprep.subr.bf16.mxu1 %v6716_v44  ;;  %2227 = vmatprep.subr.bf16.mxu0 %v6717_v57  ;;  %v6727_v44 = vld [vmem:[#allocation128_spill] sm:$0xff]  ;;  %v6728_v57 = vld [vmem:[#allocation127_spill] sm:$0xff] }
 0xeff   :  { %2187 = vmatpush1.bf16.msra.mxu1 %v6718_v60  ;;  %2228 = vmatpush1.bf16.msra.mxu0 %v6719_v54  ;;  %v6729_v60 = vld [vmem:[#allocation129_spill] sm:$0xff]  ;;  %v6730_v54 = vld [vmem:[#allocation130_spill] sm:$0xff] }
 0xf00   :  { %2188 = vmatprep.subr.bf16.mxu1 %v6720_v55  ;;  %2229 = vmatprep.subr.bf16.mxu0 %v6721_v62  ;;  %v6731_v55 = vld [vmem:[#allocation131_spill] sm:$0xff] }
 0xf01   :  { %v6733_v62 = vld [vmem:[#allocation63_spill] sm:$0xff] }
 0xf03   :  { %2189 = vmatpush1.bf16.msra.mxu1 %v6722_v17  ;;  %2230 = vmatpush1.bf16.msra.mxu0 %v6723_v26  ;;  %v6732_v17 = vld [vmem:[#allocation14_spill] sm:$0xff] }
 0xf04   :  { %2190 = vmatprep.subr.bf16.mxu1 %v6724_v40  ;;  %2231 = vmatprep.subr.bf16.mxu0 %v6725_v32 }
 0xf07   :  { %2191 = vmatpush1.bf16.msra.mxu1 %v6726_v14  ;;  %2232 = vmatpush1.bf16.msra.mxu0 %v6727_v44 }
 0xf08   :  { %2192 = vmatprep.subr.bf16.mxu1 %v6728_v57  ;;  %2233 = vmatprep.subr.bf16.mxu0 %v6729_v60 }
 0xf0b   :  { %2193 = vmatpush1.bf16.msra.mxu1 %v6730_v54  ;;  %2234 = vmatpush1.bf16.msra.mxu0 %v6731_v55 }
 0xf0c   :  { %3525 = vmatprep.subr.bf16.mxu1 %v6309_v52  ;;  %2336 = vmatprep.subr.bf16.mxu0 %v6732_v17 }
 0xfa0   :  { %v2094_v26 = vpop.f32.mrb[44].mxu1  ;;  %v2135_v40 = vpop.f32.mrb[48].mxu0 }
 0xfa1   :  { %v2095_v32 = vadd.f32 %v2094_v26, %v6733_v62  ;;  %v2096_v29 = vpop.f32.mrb[45].mxu1  ;;  %v2137_v14 = vpop.f32.mrb[49].mxu0  ;;  %v2136_v55 = vadd.f32 %v2135_v40, %v6312_v18  ;;  %v6739_v40 = vld [vmem:[#allocation55_spill] sm:$0xff] }
 0xfa2   :  { %v2097_v44 = vadd.f32 %v2096_v29, %v6311_v10  ;;  %v2098_v61 = vpop.f32.mrb[46].mxu1  ;;  %v2139_v57 = vpop.f32.mrb[50].mxu0  ;;  %v2138_v17 = vadd.f32 %v2137_v14, %v6313_v63 }
 0xfa3   :  { %v2142_v25 = vmul.f32 0.5, %v2095_v32  ;;  %v2099_v60 = vpop.f32.mrb[47].mxu1  ;;  %v2140_v0 = vpop.f32.mrb[51].mxu0 }
 0xfa4   :  { %v2146_v54 = vmul.f32 0.5, %v2097_v44  ;;  %v2151_v16 = vmul.f32 0.5, %v2138_v17 }
 0xfa5   :  { %3807 = vtanh.f32 %v2142_v25 }
 0xfa6   :  { %3809 = vtanh.f32 %v2146_v54 }
 0xfa7   :  { %3811 = vtanh.f32 %v2136_v55 }
 0xfa8   :  { %3813 = vtanh.f32 %v2151_v16  ;;  %v6737_v16 = vld [vmem:[#allocation51_spill] sm:$0xff] }
 0xfaf   :  { %v3808_v8 = vpop.eup %3807 }
 0xfb0   :  { %v3810_v26 = vpop.eup %3809  ;;  %v2144_v62 = vmul.f32 0.5, %v3808_v8  ;;  %v6736_v8 = vld [vmem:[#allocation49_spill] sm:$0xff] }
 0xfb1   :  { %v2148_v36 = vmul.f32 0.5, %v3810_v26  ;;  %v3812_v61 = vpop.eup %3811  ;;  %v6740_v26 = vld [vmem:[#allocation57_spill] sm:$0xff] }
 0xfb2   :  { %v2145_v29 = vadd.f32 0.5, %v2144_v62  ;;  %v3814_v54 = vpop.eup %3813  ;;  %v6738_v62 = vld [vmem:[#allocation53_spill] sm:$0xff] }
 0xfb3   :  { %v2149_v57 = vadd.f32 0.5, %v2148_v36  ;;  %v2153_v25 = vmul.f32 0.5, %v3814_v54  ;;  %v6735_v36 = vld [vmem:[#allocation47_spill] sm:$0xff] }
 0xfb4   :  { %v2156_v32 = vmul.f32 %v3812_v61, %v2145_v29  ;;  %v6741_v29 = vld [vmem:[#allocation68_spill] sm:$0xff] }
 0xfb5   :  { %v2155_v0 = vmul.f32 %v2149_v57, %v5258_v58  ;;  %v2154_v55 = vadd.f32 0.5, %v2153_v25  ;;  %v6734_v58 = vld [vmem:[#allocation45_spill] sm:$0xff] }
 0xfb7   :  { %v5436_v44 = vadd.f32 %v2156_v32, %v2155_v0  ;;  %v6742_v32 = vld [vmem:[#allocation43_spill] sm:$0xff] }
 0xfb9   :  { %3815 = vtanh.f32 %v5436_v44 }
 0xfc3   :  { %v3816_v14 = vpop.eup %3815 }
 0xfc4   :  { %v2159_v60 = vmul.f32 %v3816_v14, %v2154_v55 }
 0xfc6   :  { %v5439_v17 = vpack.c.bf16 %v2159_v60, %v2159_v60 }
 0xfc8   :  { %2195 = vmatmul.mubr.bf16.vlgmr.msra.gmra.mrb[48].mxu1 %v5439_v17  ;;  %2236 = vmatmul.mubr.bf16.vlgmr.msra.gmra.mrb[52].mxu0 %v5439_v17 }
 0xfc9   :  { %2368 = vmatprep.mubr.bf16.mxu0 %v5439_v17  ;;  %3527 = vmatpush3.bf16.msra.mxu1 %v4526_v30 }
 0xfca   :  { %3528 = vmatprep.subr.bf16.mxu1 %v6309_v52  ;;  %3332 = vmatprep.mubr.msk.f32.mxu1 %vm3907_vm0, %v6315_v43 }
 0xfcb   :  { %2337 = vmatpush1.bf16.msra.mxu0 %v4071_v19 }
 0xfcc   :  { %2338 = vmatprep.subr.bf16.mxu0 %v4074_v20 }
 0xfcd   :  { %3530 = vmatpush3.bf16.msra.mxu1 %v4534_v59 }
 0xfce   :  { %3531 = vmatprep.subr.bf16.mxu1 %v6309_v52 }
 0xfcf   :  { %2339 = vmatpush1.bf16.msra.mxu0 %v4079_v22 }
 0xfd0   :  { %2340 = vmatprep.subr.bf16.mxu0 %v4084_v24 }
 0xfd1   :  { %3533 = vmatpush3.bf16.msra.mxu1 %v4544_v1 }
 0xfd2   :  { %3534 = vmatprep.subr.bf16.mxu1 %v6309_v52 }
 0xfd3   :  { %2341 = vmatpush1.bf16.msra.mxu0 %v4094_v27 }
 0xfd4   :  { %2342 = vmatprep.subr.bf16.mxu0 %v4097_v28 }
 0xfd5   :  { %3536 = vmatpush3.bf16.msra.mxu1 %v4552_v2 }
 0xfd6   :  { %3537 = vmatprep.subr.bf16.mxu1 %v6309_v52 }
 0xfd7   :  { %2343 = vmatpush1.bf16.msra.mxu0 %v4106_v31 }
 0xfd8   :  { %2344 = vmatprep.subr.bf16.mxu0 %v4111_v33 }
 0xfd9   :  { %3539 = vmatpush3.bf16.msra.mxu1 %v4560_v3 }
 0xfda   :  { %3540 = vmatprep.subr.bf16.mxu1 %v6309_v52 }
 0xfdb   :  { %2345 = vmatpush1.bf16.msra.mxu0 %v4114_v34 }
 0xfdc   :  { %2346 = vmatprep.subr.bf16.mxu0 %v4123_v37 }
 0xfdd   :  { %3542 = vmatpush3.bf16.msra.mxu1 %v4568_v4 }
 0xfde   :  { %3543 = vmatprep.subr.bf16.mxu1 %v6309_v52 }
 0xfdf   :  { %2347 = vmatpush1.bf16.msra.mxu0 %v4130_v39 }
 0xfe0   :  { %2348 = vmatprep.subr.bf16.mxu0 %v4135_v41 }
 0xfe1   :  { %3545 = vmatpush3.bf16.msra.mxu1 %v4576_v5 }
 0xfe2   :  { %3546 = vmatprep.subr.bf16.mxu1 %v6309_v52 }
 0xfe3   :  { %2349 = vmatpush1.bf16.msra.mxu0 %v4138_v42 }
 0xfe4   :  { %2350 = vmatprep.subr.bf16.mxu0 %v4147_v45 }
 0xfe5   :  { %3548 = vmatpush3.bf16.msra.mxu1 %v4584_v6 }
 0xfe6   :  { %2377 = vmatprep.subr.bf16.mxu1 %v4077_v21 }
 0xfe7   :  { %2351 = vmatpush1.bf16.msra.mxu0 %v4154_v47 }
 0xfe8   :  { %2352 = vmatprep.subr.bf16.mxu0 %v4159_v49 }
 0xfeb   :  { %2353 = vmatpush1.bf16.msra.mxu0 %v4162_v50 }
 0xfec   :  { %2354 = vmatprep.subr.bf16.mxu0 %v4171_v53 }
 0xfef   :  { %2355 = vmatpush1.bf16.msra.mxu0 %v6203_v7 }
 0xff0   :  { %2356 = vmatprep.subr.bf16.mxu0 %v6205_v9 }
 0xff3   :  { %2357 = vmatpush1.bf16.msra.mxu0 %v6207_v11 }
 0xff4   :  { %2358 = vmatprep.subr.bf16.mxu0 %v6209_v13 }
 0xff7   :  { %2359 = vmatpush1.bf16.msra.mxu0 %v6211_v15 }
 0xff8   :  { %2360 = vmatprep.subr.bf16.mxu0 %v6213_v35 }
 0xffb   :  { %2361 = vmatpush1.bf16.msra.mxu0 %v6734_v58 }
 0xffc   :  { %2362 = vmatprep.subr.bf16.mxu0 %v6735_v36 }
 0xfff   :  { %2363 = vmatpush1.bf16.msra.mxu0 %v6736_v8 }
0x1000   :  { %2364 = vmatprep.subr.bf16.mxu0 %v6737_v16 }
0x1003   :  { %2365 = vmatpush1.bf16.msra.mxu0 %v6738_v62 }
0x1004   :  { %2366 = vmatprep.subr.bf16.mxu0 %v6739_v40 }
0x1007   :  { %2367 = vmatpush1.bf16.msra.mxu0 %v6740_v26 }
0x1008   :  { %2438 = vmatprep.subr.bf16.mxu0 %v6741_v29 }
0x109b   :  { %v2196_v61 = vpop.f32.mrb[48].mxu1  ;;  %v2237_v57 = vpop.f32.mrb[52].mxu0 }
0x109c   :  { %v2197_v0 = vadd.f32 %v2196_v61, %v6742_v32  ;;  %v2198_v54 = vpop.f32.mrb[49].mxu1  ;;  %v2239_v25 = vpop.f32.mrb[53].mxu0  ;;  %v2238_v40 = vadd.f32 %v2237_v57, %v6317_v56 }
0x109d   :  { %v2199_v55 = vadd.f32 %v2198_v54, %v4280_v46  ;;  %v2200_v14 = vpop.f32.mrb[50].mxu1  ;;  %v2241_v60 = vpop.f32.mrb[54].mxu0  ;;  %v2240_v29 = vadd.f32 %v2239_v25, %v6318_v38  ;;  %v6748_v25 = vld [vmem:[#allocation23_spill] sm:$0xff] }
0x109e   :  { %v2244_v8 = vmul.f32 0.5, %v2197_v0  ;;  %v2201_v16 = vpop.f32.mrb[51].mxu1  ;;  %v2242_v36 = vpop.f32.mrb[55].mxu0 }
0x109f   :  { %v2248_v62 = vmul.f32 0.5, %v2199_v55  ;;  %v2253_v26 = vmul.f32 0.5, %v2240_v29  ;;  %v6749_v55 = vld [vmem:[#allocation24_spill] sm:$0xff] }
0x10a0   :  { %3817 = vtanh.f32 %v2244_v8 }
0x10a1   :  { %3819 = vtanh.f32 %v2248_v62 }
0x10a2   :  { %3821 = vtanh.f32 %v2238_v40 }
0x10a3   :  { %3823 = vtanh.f32 %v2253_v26  ;;  %v6746_v26 = vld [vmem:[#allocation21_spill] sm:$0xff] }
0x10aa   :  { %v3818_v58 = vpop.eup %3817 }
0x10ab   :  { %v3820_v61 = vpop.eup %3819  ;;  %v2246_v32 = vmul.f32 0.5, %v3818_v58  ;;  %v6745_v58 = vld [vmem:[#allocation20_spill] sm:$0xff] }
0x10ac   :  { %v2250_v35 = vmul.f32 0.5, %v3820_v61  ;;  %v3822_v14 = vpop.eup %3821  ;;  %v6751_v61 = vld [vmem:[#allocation26_spill] sm:$0xff] }
0x10ad   :  { %v2247_v54 = vadd.f32 0.5, %v2246_v32  ;;  %v3824_v8 = vpop.eup %3823  ;;  %v6747_v32 = vld [vmem:[#allocation22_spill] sm:$0xff] }
0x10ae   :  { %v2251_v60 = vadd.f32 0.5, %v2250_v35  ;;  %v2255_v62 = vmul.f32 0.5, %v3824_v8  ;;  %v6743_v35 = vld [vmem:[#allocation18_spill] sm:$0xff]  ;;  %v6757_v8 = vld [vmem:[#allocation33_spill] sm:$0xff] }
0x10af   :  { %v2258_v0 = vmul.f32 %v3822_v14, %v2247_v54  ;;  %v6752_v54 = vld [vmem:[#allocation27_spill] sm:$0xff]  ;;  %v6753_v14 = vld [vmem:[#allocation28_spill] sm:$0xff] }
0x10b0   :  { %v2257_v36 = vmul.f32 %v2251_v60, %v5321_v51  ;;  %v2256_v40 = vadd.f32 0.5, %v2255_v62  ;;  %v6744_v51 = vld [vmem:[#allocation19_spill] sm:$0xff]  ;;  %v6754_v60 = vld [vmem:[#allocation29_spill] sm:$0xff]  ;;  %v6758_v62 = vld [vmem:[#allocation36_spill] sm:$0xff] }
0x10b2   :  { %v5499_v16 = vadd.f32 %v2258_v0, %v2257_v36  ;;  %v6755_v0 = vld [vmem:[#allocation30_spill] sm:$0xff]  ;;  %v6756_v36 = vld [vmem:[#allocation31_spill] sm:$0xff] }
0x10b4   :  { %3825 = vtanh.f32 %v5499_v16 }
0x10be   :  { %v3826_v57 = vpop.eup %3825 }
0x10bf   :  { %v2261_v29 = vmul.f32 %v3826_v57, %v2256_v40  ;;  %v6759_v40 = vld [vmem:[#allocation37_spill] sm:$0xff]  ;;  %v6760_v57 = vld [vmem:[#allocation39_spill] sm:$0xff] }
0x10c1   :  { %3333 = vmatmul.mubr.f32.vlgmr.msra.gmra.mrb[52].mxu1 %v2261_v29 }
0x10c2   :  { %2409 = vmatprep.mubr.bf16.mxu1 %v5439_v17  ;;  %2378 = vmatpush1.bf16.msra.mxu1 %v6425_v12  ;;  %v6750_v17 = vld [vmem:[#allocation25_spill] sm:$0xff] }
0x10c3   :  { %2379 = vmatprep.subr.bf16.mxu1 %v6531_v23 }
0x10c6   :  { %2380 = vmatpush1.bf16.msra.mxu1 %v6637_v48 }
0x10c7   :  { %2381 = vmatprep.subr.bf16.mxu1 %v6743_v35 }
0x10ca   :  { %2382 = vmatpush1.bf16.msra.mxu1 %v6744_v51 }
0x10cb   :  { %2383 = vmatprep.subr.bf16.mxu1 %v6745_v58 }
0x10ce   :  { %2384 = vmatpush1.bf16.msra.mxu1 %v6746_v26 }
0x10cf   :  { %2385 = vmatprep.subr.bf16.mxu1 %v6747_v32 }
0x10d2   :  { %2386 = vmatpush1.bf16.msra.mxu1 %v6748_v25  ;;  %v6773_v25 = vld [vmem:[#allocation40_spill] sm:$0xff] }
0x10d3   :  { %2387 = vmatprep.subr.bf16.mxu1 %v6749_v55 }
0x10d6   :  { %2388 = vmatpush1.bf16.msra.mxu1 %v6750_v17  ;;  %v6761_v17 = vld [vmem:[#allocation41_spill] sm:$0xff] }
0x10d7   :  { %2389 = vmatprep.subr.bf16.mxu1 %v6751_v61  ;;  %v6762_v61 = vld [vmem:[#allocation44_spill] sm:$0xff] }
0x10da   :  { %2390 = vmatpush1.bf16.msra.mxu1 %v6752_v54  ;;  %v6763_v54 = vld [vmem:[#allocation46_spill] sm:$0xff] }
0x10db   :  { %2391 = vmatprep.subr.bf16.mxu1 %v6753_v14  ;;  %v6764_v14 = vld [vmem:[#allocation48_spill] sm:$0xff] }
0x10de   :  { %2392 = vmatpush1.bf16.msra.mxu1 %v6754_v60  ;;  %v6765_v60 = vld [vmem:[#allocation50_spill] sm:$0xff] }
0x10df   :  { %2393 = vmatprep.subr.bf16.mxu1 %v6755_v0  ;;  %v6766_v0 = vld [vmem:[#allocation52_spill] sm:$0xff] }
0x10e2   :  { %2394 = vmatpush1.bf16.msra.mxu1 %v6756_v36  ;;  %v6767_v36 = vld [vmem:[#allocation54_spill] sm:$0xff] }
0x10e3   :  { %2395 = vmatprep.subr.bf16.mxu1 %v6757_v8  ;;  %v6768_v8 = vld [vmem:[#allocation56_spill] sm:$0xff] }
0x10e6   :  { %2396 = vmatpush1.bf16.msra.mxu1 %v6758_v62  ;;  %v6769_v62 = vld [vmem:[#allocation59_spill] sm:$0xff] }
0x10e7   :  { %2397 = vmatprep.subr.bf16.mxu1 %v6759_v40  ;;  %v6770_v40 = vld [vmem:[#allocation60_spill] sm:$0xff] }
0x10ea   :  { %2398 = vmatpush1.bf16.msra.mxu1 %v6760_v57  ;;  %v6771_v57 = vld [vmem:[#allocation71_spill] sm:$0xff] }
0x10eb   :  { %2399 = vmatprep.subr.bf16.mxu1 %v6761_v17 }
0x10ee   :  { %2400 = vmatpush1.bf16.msra.mxu1 %v6762_v61  ;;  %v6772_v61 = vld [vmem:[#allocation13_spill] sm:$0xff] }
0x10ef   :  { %2401 = vmatprep.subr.bf16.mxu1 %v6763_v54 }
0x10f2   :  { %2402 = vmatpush1.bf16.msra.mxu1 %v6764_v14 }
0x10f3   :  { %2403 = vmatprep.subr.bf16.mxu1 %v6765_v60 }
0x10f6   :  { %2404 = vmatpush1.bf16.msra.mxu1 %v6766_v0 }
0x10f7   :  { %2405 = vmatprep.subr.bf16.mxu1 %v6767_v36 }
0x10fa   :  { %2406 = vmatpush1.bf16.msra.mxu1 %v6768_v8 }
0x10fb   :  { %2407 = vmatprep.subr.bf16.mxu1 %v6769_v62  ;;  %v2437_v62 = vpack.c.bf16 %v2261_v29, %v2261_v29  ;;  %v6783_v29 = vld [vmem:[#allocation78_spill] sm:$0xff] }
0x10fe   :  { %2408 = vmatpush1.bf16.msra.mxu1 %v6770_v40  ;;  %v6781_v40 = vld [vmem:[#allocation75_spill] sm:$0xff] }
0x10ff   :  { %2479 = vmatprep.subr.bf16.mxu1 %v6771_v57  ;;  %v6775_v57 = vld [vmem:[#allocation69_spill] sm:$0xff] }
0x1194   :  { %v2328_v17 = vpop.f32.mrb[52].mxu1 }
0x1195   :  { %v2329_v55 = vadd.f32 %v6772_v61, %v2328_v17  ;;  %v3334_v54 = vpop.f32.mrb[53].mxu1  ;;  %v6776_v17 = vld [vmem:[#allocation72_spill] sm:$0xff] }
0x1196   :  { %v6777_v54 = vld [vmem:[#allocation70_spill] sm:$0xff]  ;;  %v6780_v61 = vld [vmem:[#allocation76_spill] sm:$0xff] }
0x1197   :  { %v5537_v14 = vadd.f32 %v2329_v55, %v6773_v25  ;;  %v6778_v25 = vld [vmem:[#allocation73_spill] sm:$0xff]  ;;  %v6779_v55 = vld [vmem:[#allocation74_spill] sm:$0xff] }
0x1199   :  { %6774 = vst [vmem:[#allocation58_spill] sm:$0xff] %v5537_v14  ;;  %2984 = vst [vmem:[%s5828_s10 + $0x28] sm:$0xff] %v5537_v14  ;;  %v2335_v8 = vpack.c.bf16 %v5537_v14, %v5537_v14  ;;  %v6782_v14 = vld [vmem:[#allocation77_spill] sm:$0xff] }
0x119b   :  { %2369 = vmatmul.mubr.bf16.vlgmr.msra.gmra.mrb[56].mxu0 %v2335_v8  ;;  %2410 = vmatmul.mubr.bf16.vlgmr.msra.gmra.mrb[56].mxu1 %v2335_v8  ;;  %v6784_v8 = vld [vmem:[#allocation80_spill] sm:$0xff] }
0x119c   :  { %2470 = vmatprep.mubr.bf16.mxu0 %v2437_v62  ;;  %2511 = vmatprep.mubr.bf16.mxu1 %v2437_v62  ;;  %v6785_v62 = vld [vmem:[#allocation79_spill] sm:$0xff] }
0x119d   :  { %2439 = vmatpush1.bf16.msra.mxu0 %v6775_v57  ;;  %2480 = vmatpush1.bf16.msra.mxu1 %v6776_v17  ;;  %v6786_v57 = vld [vmem:[#allocation81_spill] sm:$0xff]  ;;  %v6787_v17 = vld [vmem:[#allocation82_spill] sm:$0xff] }
0x119e   :  { %2440 = vmatprep.subr.bf16.mxu0 %v6777_v54  ;;  %2481 = vmatprep.subr.bf16.mxu1 %v6778_v25  ;;  %v6788_v54 = vld [vmem:[#allocation84_spill] sm:$0xff]  ;;  %v6789_v25 = vld [vmem:[#allocation83_spill] sm:$0xff] }
0x11a1   :  { %2441 = vmatpush1.bf16.msra.mxu0 %v6779_v55  ;;  %2482 = vmatpush1.bf16.msra.mxu1 %v6780_v61  ;;  %v6790_v55 = vld [vmem:[#allocation85_spill] sm:$0xff]  ;;  %v6791_v61 = vld [vmem:[#allocation86_spill] sm:$0xff] }
0x11a2   :  { %2442 = vmatprep.subr.bf16.mxu0 %v6781_v40  ;;  %2483 = vmatprep.subr.bf16.mxu1 %v6782_v14  ;;  %v6792_v40 = vld [vmem:[#allocation88_spill] sm:$0xff]  ;;  %v6793_v14 = vld [vmem:[#allocation87_spill] sm:$0xff] }
0x11a5   :  { %2443 = vmatpush1.bf16.msra.mxu0 %v6783_v29  ;;  %2484 = vmatpush1.bf16.msra.mxu1 %v6784_v8  ;;  %v6794_v29 = vld [vmem:[#allocation89_spill] sm:$0xff]  ;;  %v6795_v8 = vld [vmem:[#allocation90_spill] sm:$0xff] }
0x11a6   :  { %2444 = vmatprep.subr.bf16.mxu0 %v6785_v62  ;;  %2485 = vmatprep.subr.bf16.mxu1 %v6786_v57  ;;  %v6796_v62 = vld [vmem:[#allocation92_spill] sm:$0xff]  ;;  %v6797_v57 = vld [vmem:[#allocation91_spill] sm:$0xff] }
0x11a9   :  { %2445 = vmatpush1.bf16.msra.mxu0 %v6787_v17  ;;  %2486 = vmatpush1.bf16.msra.mxu1 %v6788_v54  ;;  %v6798_v17 = vld [vmem:[#allocation93_spill] sm:$0xff]  ;;  %v6799_v54 = vld [vmem:[#allocation94_spill] sm:$0xff] }
0x11aa   :  { %2446 = vmatprep.subr.bf16.mxu0 %v6789_v25  ;;  %2487 = vmatprep.subr.bf16.mxu1 %v6790_v55  ;;  %v6800_v25 = vld [vmem:[#allocation96_spill] sm:$0xff]  ;;  %v6801_v55 = vld [vmem:[#allocation95_spill] sm:$0xff] }
0x11ad   :  { %2447 = vmatpush1.bf16.msra.mxu0 %v6791_v61  ;;  %2488 = vmatpush1.bf16.msra.mxu1 %v6792_v40  ;;  %v6802_v61 = vld [vmem:[#allocation97_spill] sm:$0xff]  ;;  %v6803_v40 = vld [vmem:[#allocation98_spill] sm:$0xff] }
0x11ae   :  { %2448 = vmatprep.subr.bf16.mxu0 %v6793_v14  ;;  %2489 = vmatprep.subr.bf16.mxu1 %v6794_v29  ;;  %v6804_v14 = vld [vmem:[#allocation100_spill] sm:$0xff]  ;;  %v6805_v29 = vld [vmem:[#allocation99_spill] sm:$0xff] }
0x11b1   :  { %2449 = vmatpush1.bf16.msra.mxu0 %v6795_v8  ;;  %2490 = vmatpush1.bf16.msra.mxu1 %v6796_v62  ;;  %v6806_v8 = vld [vmem:[#allocation101_spill] sm:$0xff]  ;;  %v6807_v62 = vld [vmem:[#allocation102_spill] sm:$0xff] }
0x11b2   :  { %2450 = vmatprep.subr.bf16.mxu0 %v6797_v57  ;;  %2491 = vmatprep.subr.bf16.mxu1 %v6798_v17  ;;  %v6808_v57 = vld [vmem:[#allocation104_spill] sm:$0xff]  ;;  %v6809_v17 = vld [vmem:[#allocation103_spill] sm:$0xff] }
0x11b5   :  { %2451 = vmatpush1.bf16.msra.mxu0 %v6799_v54  ;;  %2492 = vmatpush1.bf16.msra.mxu1 %v6800_v25  ;;  %v6810_v54 = vld [vmem:[#allocation105_spill] sm:$0xff]  ;;  %v6811_v25 = vld [vmem:[#allocation106_spill] sm:$0xff] }
0x11b6   :  { %2452 = vmatprep.subr.bf16.mxu0 %v6801_v55  ;;  %2493 = vmatprep.subr.bf16.mxu1 %v6802_v61  ;;  %v6812_v55 = vld [vmem:[#allocation108_spill] sm:$0xff]  ;;  %v6813_v61 = vld [vmem:[#allocation107_spill] sm:$0xff] }
0x11b9   :  { %2453 = vmatpush1.bf16.msra.mxu0 %v6803_v40  ;;  %2494 = vmatpush1.bf16.msra.mxu1 %v6804_v14  ;;  %v6814_v40 = vld [vmem:[#allocation109_spill] sm:$0xff]  ;;  %v6815_v14 = vld [vmem:[#allocation110_spill] sm:$0xff] }
0x11ba   :  { %2454 = vmatprep.subr.bf16.mxu0 %v6805_v29  ;;  %2495 = vmatprep.subr.bf16.mxu1 %v6806_v8  ;;  %v6816_v29 = vld [vmem:[#allocation112_spill] sm:$0xff]  ;;  %v6817_v8 = vld [vmem:[#allocation111_spill] sm:$0xff] }
0x11bd   :  { %2455 = vmatpush1.bf16.msra.mxu0 %v6807_v62  ;;  %2496 = vmatpush1.bf16.msra.mxu1 %v6808_v57  ;;  %v6818_v62 = vld [vmem:[#allocation113_spill] sm:$0xff]  ;;  %v6819_v57 = vld [vmem:[#allocation114_spill] sm:$0xff] }
0x11be   :  { %2456 = vmatprep.subr.bf16.mxu0 %v6809_v17  ;;  %2497 = vmatprep.subr.bf16.mxu1 %v6810_v54  ;;  %v6820_v17 = vld [vmem:[#allocation116_spill] sm:$0xff]  ;;  %v6821_v54 = vld [vmem:[#allocation115_spill] sm:$0xff] }
0x11c1   :  { %2457 = vmatpush1.bf16.msra.mxu0 %v6811_v25  ;;  %2498 = vmatpush1.bf16.msra.mxu1 %v6812_v55  ;;  %v6822_v25 = vld [vmem:[#allocation117_spill] sm:$0xff]  ;;  %v6823_v55 = vld [vmem:[#allocation118_spill] sm:$0xff] }
0x11c2   :  { %2458 = vmatprep.subr.bf16.mxu0 %v6813_v61  ;;  %2499 = vmatprep.subr.bf16.mxu1 %v6814_v40  ;;  %v6824_v61 = vld [vmem:[#allocation120_spill] sm:$0xff]  ;;  %v6825_v40 = vld [vmem:[#allocation119_spill] sm:$0xff] }
0x11c5   :  { %2459 = vmatpush1.bf16.msra.mxu0 %v6815_v14  ;;  %2500 = vmatpush1.bf16.msra.mxu1 %v6816_v29  ;;  %v6826_v14 = vld [vmem:[#allocation121_spill] sm:$0xff]  ;;  %v6827_v29 = vld [vmem:[#allocation122_spill] sm:$0xff] }
0x11c6   :  { %2460 = vmatprep.subr.bf16.mxu0 %v6817_v8  ;;  %2501 = vmatprep.subr.bf16.mxu1 %v6818_v62  ;;  %v6828_v8 = vld [vmem:[#allocation124_spill] sm:$0xff]  ;;  %v6829_v62 = vld [vmem:[#allocation123_spill] sm:$0xff] }
0x11c9   :  { %2461 = vmatpush1.bf16.msra.mxu0 %v6819_v57  ;;  %2502 = vmatpush1.bf16.msra.mxu1 %v6820_v17  ;;  %v6830_v57 = vld [vmem:[#allocation125_spill] sm:$0xff]  ;;  %v6831_v17 = vld [vmem:[#allocation126_spill] sm:$0xff] }
0x11ca   :  { %2462 = vmatprep.subr.bf16.mxu0 %v6821_v54  ;;  %2503 = vmatprep.subr.bf16.mxu1 %v6822_v25  ;;  %v6832_v54 = vld [vmem:[#allocation128_spill] sm:$0xff]  ;;  %v6833_v25 = vld [vmem:[#allocation127_spill] sm:$0xff] }
0x11cd   :  { %2463 = vmatpush1.bf16.msra.mxu0 %v6823_v55  ;;  %2504 = vmatpush1.bf16.msra.mxu1 %v6824_v61  ;;  %v6834_v55 = vld [vmem:[#allocation129_spill] sm:$0xff]  ;;  %v6835_v61 = vld [vmem:[#allocation130_spill] sm:$0xff] }
0x11ce   :  { %2464 = vmatprep.subr.bf16.mxu0 %v6825_v40  ;;  %2505 = vmatprep.subr.bf16.mxu1 %v6826_v14  ;;  %v6836_v40 = vld [vmem:[#allocation131_spill] sm:$0xff] }
0x11cf   :  { %v6838_v14 = vld [vmem:[#allocation63_spill] sm:$0xff] }
0x11d1   :  { %2465 = vmatpush1.bf16.msra.mxu0 %v6827_v29  ;;  %2506 = vmatpush1.bf16.msra.mxu1 %v6828_v8  ;;  %v6837_v29 = vld [vmem:[#allocation14_spill] sm:$0xff] }
0x11d2   :  { %2466 = vmatprep.subr.bf16.mxu0 %v6829_v62  ;;  %2507 = vmatprep.subr.bf16.mxu1 %v6830_v57 }
0x11d5   :  { %2467 = vmatpush1.bf16.msra.mxu0 %v6831_v17  ;;  %2508 = vmatpush1.bf16.msra.mxu1 %v6832_v54 }
0x11d6   :  { %2468 = vmatprep.subr.bf16.mxu0 %v6833_v25  ;;  %2509 = vmatprep.subr.bf16.mxu1 %v6834_v55 }
0x11d9   :  { %2469 = vmatpush1.bf16.msra.mxu0 %v6835_v61  ;;  %2510 = vmatpush1.bf16.msra.mxu1 %v6836_v40 }
0x11da   :  { %3549 = vmatprep.subr.bf16.mxu0 %v6309_v52  ;;  %2612 = vmatprep.subr.bf16.mxu1 %v6837_v29 }
0x126e   :  { %v2370_v8 = vpop.f32.mrb[56].mxu0  ;;  %v2411_v62 = vpop.f32.mrb[56].mxu1 }
0x126f   :  { %v2371_v57 = vadd.f32 %v2370_v8, %v6838_v14  ;;  %v2372_v36 = vpop.f32.mrb[57].mxu0  ;;  %v2413_v17 = vpop.f32.mrb[57].mxu1  ;;  %v2412_v40 = vadd.f32 %v2411_v62, %v6312_v18 }
0x1270   :  { %v2373_v54 = vadd.f32 %v2372_v36, %v6311_v10  ;;  %v2374_v0 = vpop.f32.mrb[58].mxu0  ;;  %v2415_v25 = vpop.f32.mrb[58].mxu1  ;;  %v2414_v29 = vadd.f32 %v2413_v17, %v6313_v63 }
0x1271   :  { %v2418_v60 = vmul.f32 0.5, %v2371_v57  ;;  %v2375_v55 = vpop.f32.mrb[59].mxu0  ;;  %v2416_v32 = vpop.f32.mrb[59].mxu1 }
0x1272   :  { %v2422_v61 = vmul.f32 0.5, %v2373_v54  ;;  %v2427_v26 = vmul.f32 0.5, %v2414_v29 }
0x1273   :  { %3827 = vtanh.f32 %v2418_v60 }
0x1274   :  { %3829 = vtanh.f32 %v2422_v61 }
0x1275   :  { %3831 = vtanh.f32 %v2412_v40 }
0x1276   :  { %3833 = vtanh.f32 %v2427_v26 }
0x127d   :  { %v3828_v58 = vpop.eup %3827 }
0x127e   :  { %v3830_v8 = vpop.eup %3829  ;;  %v2420_v14 = vmul.f32 0.5, %v3828_v58 }
0x127f   :  { %v2424_v51 = vmul.f32 0.5, %v3830_v8  ;;  %v3832_v0 = vpop.eup %3831 }
0x1280   :  { %v2421_v36 = vadd.f32 0.5, %v2420_v14  ;;  %v3834_v61 = vpop.eup %3833 }
0x1281   :  { %v2425_v25 = vadd.f32 0.5, %v2424_v51  ;;  %v2429_v60 = vmul.f32 0.5, %v3834_v61 }
0x1282   :  { %v2432_v57 = vmul.f32 %v3832_v0, %v2421_v36 }
0x1283   :  { %v2431_v32 = vmul.f32 %v2425_v25, %v5436_v44  ;;  %v2430_v40 = vadd.f32 0.5, %v2429_v60 }
0x1285   :  { %v5614_v54 = vadd.f32 %v2432_v57, %v2431_v32 }
0x1287   :  { %3835 = vtanh.f32 %v5614_v54 }
0x1291   :  { %v3836_v17 = vpop.eup %3835 }
0x1292   :  { %v2435_v55 = vmul.f32 %v3836_v17, %v2430_v40 }
0x1294   :  { %v5617_v62 = vpack.c.bf16 %v2435_v55, %v2435_v55  ;;  %v6850_v55 = vld [vmem:[#allocation20_spill] sm:$0xff] }
0x1296   :  { %2471 = vmatmul.mubr.bf16.vlgmr.msra.gmra.mrb[60].mxu0 %v5617_v62  ;;  %2512 = vmatmul.mubr.bf16.vlgmr.msra.gmra.mrb[60].mxu1 %v5617_v62 }
0x1297   :  { %2644 = vmatprep.mubr.bf16.mxu1 %v5617_v62  ;;  %3551 = vmatpush3.bf16.msra.mxu0 %v4526_v30 }
0x1298   :  { %3552 = vmatprep.subr.bf16.mxu0 %v6309_v52  ;;  %3367 = vmatprep.mubr.msk.f32.mxu0 %vm3907_vm0, %v6315_v43 }
0x1299   :  { %2613 = vmatpush1.bf16.msra.mxu1 %v4071_v19  ;;  %v6839_v19 = vld [vmem:[#allocation42_spill] sm:$0xff] }
0x129a   :  { %2614 = vmatprep.subr.bf16.mxu1 %v4074_v20  ;;  %v6840_v20 = vld [vmem:[#allocation45_spill] sm:$0xff] }
0x129b   :  { %3554 = vmatpush3.bf16.msra.mxu0 %v4534_v59 }
0x129c   :  { %3555 = vmatprep.subr.bf16.mxu0 %v6309_v52 }
0x129d   :  { %2615 = vmatpush1.bf16.msra.mxu1 %v4079_v22  ;;  %v6842_v22 = vld [vmem:[#allocation49_spill] sm:$0xff] }
0x129e   :  { %2616 = vmatprep.subr.bf16.mxu1 %v4084_v24  ;;  %v6843_v24 = vld [vmem:[#allocation51_spill] sm:$0xff] }
0x129f   :  { %3557 = vmatpush3.bf16.msra.mxu0 %v4544_v1 }
0x12a0   :  { %3558 = vmatprep.subr.bf16.mxu0 %v6309_v52 }
0x12a1   :  { %2617 = vmatpush1.bf16.msra.mxu1 %v4094_v27  ;;  %v6844_v27 = vld [vmem:[#allocation53_spill] sm:$0xff] }
0x12a2   :  { %2618 = vmatprep.subr.bf16.mxu1 %v4097_v28  ;;  %v6845_v28 = vld [vmem:[#allocation55_spill] sm:$0xff] }
0x12a3   :  { %3560 = vmatpush3.bf16.msra.mxu0 %v4552_v2 }
0x12a4   :  { %3561 = vmatprep.subr.bf16.mxu0 %v6309_v52 }
0x12a5   :  { %2619 = vmatpush1.bf16.msra.mxu1 %v4106_v31  ;;  %v6846_v31 = vld [vmem:[#allocation57_spill] sm:$0xff] }
0x12a6   :  { %2620 = vmatprep.subr.bf16.mxu1 %v4111_v33  ;;  %v6847_v33 = vld [vmem:[#allocation68_spill] sm:$0xff] }
0x12a7   :  { %3563 = vmatpush3.bf16.msra.mxu0 %v4560_v3 }
0x12a8   :  { %3564 = vmatprep.subr.bf16.mxu0 %v6309_v52 }
0x12a9   :  { %2621 = vmatpush1.bf16.msra.mxu1 %v4114_v34 }
0x12aa   :  { %2622 = vmatprep.subr.bf16.mxu1 %v4123_v37 }
0x12ab   :  { %3566 = vmatpush3.bf16.msra.mxu0 %v4568_v4 }
0x12ac   :  { %3567 = vmatprep.subr.bf16.mxu0 %v6309_v52 }
0x12ad   :  { %2623 = vmatpush1.bf16.msra.mxu1 %v4130_v39  ;;  %v6848_v39 = vld [vmem:[#allocation43_spill] sm:$0xff] }
0x12ae   :  { %2624 = vmatprep.subr.bf16.mxu1 %v4135_v41 }
0x12af   :  { %3569 = vmatpush3.bf16.msra.mxu0 %v4576_v5 }
0x12b0   :  { %3570 = vmatprep.subr.bf16.mxu0 %v6309_v52 }
0x12b1   :  { %2625 = vmatpush1.bf16.msra.mxu1 %v4138_v42 }
0x12b2   :  { %2626 = vmatprep.subr.bf16.mxu1 %v4147_v45 }
0x12b3   :  { %3572 = vmatpush3.bf16.msra.mxu0 %v4584_v6 }
0x12b4   :  { %2653 = vmatprep.subr.bf16.mxu0 %v4077_v21  ;;  %v6841_v21 = vld [vmem:[#allocation47_spill] sm:$0xff] }
0x12b5   :  { %2627 = vmatpush1.bf16.msra.mxu1 %v4154_v47 }
0x12b6   :  { %2628 = vmatprep.subr.bf16.mxu1 %v4159_v49 }
0x12b9   :  { %2629 = vmatpush1.bf16.msra.mxu1 %v4162_v50 }
0x12ba   :  { %2630 = vmatprep.subr.bf16.mxu1 %v4171_v53 }
0x12bd   :  { %2631 = vmatpush1.bf16.msra.mxu1 %v6203_v7 }
0x12be   :  { %2632 = vmatprep.subr.bf16.mxu1 %v6205_v9 }
0x12c1   :  { %2633 = vmatpush1.bf16.msra.mxu1 %v6207_v11 }
0x12c2   :  { %2634 = vmatprep.subr.bf16.mxu1 %v6209_v13 }
0x12c5   :  { %2635 = vmatpush1.bf16.msra.mxu1 %v6211_v15 }
0x12c6   :  { %2636 = vmatprep.subr.bf16.mxu1 %v6839_v19  ;;  %v6851_v19 = vld [vmem:[#allocation21_spill] sm:$0xff] }
0x12c9   :  { %2637 = vmatpush1.bf16.msra.mxu1 %v6840_v20  ;;  %v6852_v20 = vld [vmem:[#allocation22_spill] sm:$0xff] }
0x12ca   :  { %2638 = vmatprep.subr.bf16.mxu1 %v6841_v21  ;;  %v6853_v21 = vld [vmem:[#allocation23_spill] sm:$0xff] }
0x12cd   :  { %2639 = vmatpush1.bf16.msra.mxu1 %v6842_v22  ;;  %v6854_v22 = vld [vmem:[#allocation24_spill] sm:$0xff] }
0x12ce   :  { %2640 = vmatprep.subr.bf16.mxu1 %v6843_v24  ;;  %v6860_v24 = vld [vmem:[#allocation30_spill] sm:$0xff] }
0x12d1   :  { %2641 = vmatpush1.bf16.msra.mxu1 %v6844_v27  ;;  %v6861_v27 = vld [vmem:[#allocation31_spill] sm:$0xff] }
0x12d2   :  { %2642 = vmatprep.subr.bf16.mxu1 %v6845_v28  ;;  %v6862_v28 = vld [vmem:[#allocation33_spill] sm:$0xff] }
0x12d5   :  { %2643 = vmatpush1.bf16.msra.mxu1 %v6846_v31  ;;  %v6863_v31 = vld [vmem:[#allocation36_spill] sm:$0xff] }
0x12d6   :  { %2714 = vmatprep.subr.bf16.mxu1 %v6847_v33  ;;  %v6864_v33 = vld [vmem:[#allocation37_spill] sm:$0xff] }
0x1369   :  { %v2472_v34 = vpop.f32.mrb[60].mxu0  ;;  %v2513_v37 = vpop.f32.mrb[60].mxu1 }
0x136a   :  { %v2473_v41 = vadd.f32 %v2472_v34, %v6848_v39  ;;  %v2474_v42 = vpop.f32.mrb[61].mxu0  ;;  %v2515_v45 = vpop.f32.mrb[61].mxu1  ;;  %v2514_v13 = vadd.f32 %v2513_v37, %v6317_v56  ;;  %v6865_v34 = vld [vmem:[#allocation39_spill] sm:$0xff]  ;;  %v6866_v37 = vld [vmem:[#allocation41_spill] sm:$0xff] }
0x136b   :  { %v2475_v47 = vadd.f32 %v2474_v42, %v4280_v46  ;;  %v2476_v49 = vpop.f32.mrb[62].mxu0  ;;  %v2517_v50 = vpop.f32.mrb[62].mxu1  ;;  %v2516_v15 = vadd.f32 %v2515_v45, %v6318_v38  ;;  %v6868_v42 = vld [vmem:[#allocation46_spill] sm:$0xff]  ;;  %v6869_v45 = vld [vmem:[#allocation48_spill] sm:$0xff] }
0x136c   :  { %v2520_v53 = vmul.f32 0.5, %v2473_v41  ;;  %v2477_v7 = vpop.f32.mrb[63].mxu0  ;;  %v2518_v9 = vpop.f32.mrb[63].mxu1  ;;  %v6867_v41 = vld [vmem:[#allocation44_spill] sm:$0xff]  ;;  %v6872_v50 = vld [vmem:[#allocation54_spill] sm:$0xff] }
0x136d   :  { %v2524_v11 = vmul.f32 0.5, %v2475_v47  ;;  %v2529_v44 = vmul.f32 0.5, %v2516_v15  ;;  %v6870_v47 = vld [vmem:[#allocation50_spill] sm:$0xff]  ;;  %v6871_v49 = vld [vmem:[#allocation52_spill] sm:$0xff]  ;;  %v6874_v7 = vld [vmem:[#allocation59_spill] sm:$0xff] }
0x136e   :  { %3837 = vtanh.f32 %v2520_v53  ;;  %v6873_v53 = vld [vmem:[#allocation56_spill] sm:$0xff]  ;;  %v6877_v15 = vld [vmem:[#allocation13_spill] sm:$0xff] }
0x136f   :  { %3839 = vtanh.f32 %v2524_v11  ;;  %v6875_v9 = vld [vmem:[#allocation60_spill] sm:$0xff]  ;;  %v6876_v11 = vld [vmem:[#allocation71_spill] sm:$0xff] }
0x1370   :  { %3841 = vtanh.f32 %v2514_v13 }
0x1371   :  { %3843 = vtanh.f32 %v2529_v44 }
0x1378   :  { %v3838_v51 = vpop.eup %3837 }
0x1379   :  { %v3840_v58 = vpop.eup %3839  ;;  %v2522_v26 = vmul.f32 0.5, %v3838_v51 }
0x137a   :  { %v2526_v14 = vmul.f32 0.5, %v3840_v58  ;;  %v3842_v8 = vpop.eup %3841  ;;  %v6878_v58 = vld [vmem:[#allocation58_spill] sm:$0xff] }
0x137b   :  { %v2523_v29 = vadd.f32 0.5, %v2522_v26  ;;  %v3844_v32 = vpop.eup %3843 }
0x137c   :  { %v2527_v36 = vadd.f32 0.5, %v2526_v14  ;;  %v2531_v61 = vmul.f32 0.5, %v3844_v32  ;;  %v6883_v32 = vld [vmem:[#allocation74_spill] sm:$0xff] }
0x137d   :  { %v2534_v0 = vmul.f32 %v3842_v8, %v2523_v29  ;;  %v6879_v8 = vld [vmem:[#allocation69_spill] sm:$0xff] }
0x137e   :  { %v2533_v25 = vmul.f32 %v2527_v36, %v5499_v16  ;;  %v2532_v60 = vadd.f32 0.5, %v2531_v61  ;;  %v6849_v16 = vld [vmem:[#allocation19_spill] sm:$0xff]  ;;  %v6880_v36 = vld [vmem:[#allocation72_spill] sm:$0xff] }
0x137f   :  { %v6884_v61 = vld [vmem:[#allocation76_spill] sm:$0xff] }
0x1380   :  { %v5677_v57 = vadd.f32 %v2534_v0, %v2533_v25  ;;  %v6881_v0 = vld [vmem:[#allocation70_spill] sm:$0xff]  ;;  %v6882_v25 = vld [vmem:[#allocation73_spill] sm:$0xff] }
0x1382   :  { %3845 = vtanh.f32 %v5677_v57 }
0x138c   :  { %v3846_v40 = vpop.eup %3845 }
0x138d   :  { %v2537_v17 = vmul.f32 %v3846_v40, %v2532_v60  ;;  %v6885_v60 = vld [vmem:[#allocation75_spill] sm:$0xff]  ;;  %v6886_v40 = vld [vmem:[#allocation77_spill] sm:$0xff] }
0x138f   :  { %3368 = vmatmul.mubr.f32.vlgmr.msra.gmra.mrb[46].mxu0 %v2537_v17  ;;  %v2713_v29 = vpack.c.bf16 %v2537_v17, %v2537_v17  ;;  %v6887_v17 = vld [vmem:[#allocation78_spill] sm:$0xff] }
0x1390   :  { %2685 = vmatprep.mubr.bf16.mxu0 %v5617_v62  ;;  %2654 = vmatpush1.bf16.msra.mxu0 %v6425_v12  ;;  %v6855_v62 = vld [vmem:[#allocation25_spill] sm:$0xff]  ;;  %v6856_v12 = vld [vmem:[#allocation26_spill] sm:$0xff] }
0x1391   :  { %2655 = vmatprep.subr.bf16.mxu0 %v6531_v23  ;;  %v6857_v23 = vld [vmem:[#allocation27_spill] sm:$0xff] }
0x1394   :  { %2656 = vmatpush1.bf16.msra.mxu0 %v6637_v48  ;;  %v6858_v48 = vld [vmem:[#allocation28_spill] sm:$0xff] }
0x1395   :  { %2657 = vmatprep.subr.bf16.mxu0 %v6743_v35  ;;  %v6859_v35 = vld [vmem:[#allocation29_spill] sm:$0xff] }
0x1398   :  { %2658 = vmatpush1.bf16.msra.mxu0 %v6849_v16  ;;  %v6888_v16 = vld [vmem:[#allocation80_spill] sm:$0xff] }
0x1399   :  { %2659 = vmatprep.subr.bf16.mxu0 %v6850_v55  ;;  %v6889_v55 = vld [vmem:[#allocation79_spill] sm:$0xff] }
0x139c   :  { %2660 = vmatpush1.bf16.msra.mxu0 %v6851_v19  ;;  %v6890_v19 = vld [vmem:[#allocation81_spill] sm:$0xff] }
0x139d   :  { %2661 = vmatprep.subr.bf16.mxu0 %v6852_v20  ;;  %v6891_v20 = vld [vmem:[#allocation82_spill] sm:$0xff] }
0x13a0   :  { %2662 = vmatpush1.bf16.msra.mxu0 %v6853_v21  ;;  %v6892_v21 = vld [vmem:[#allocation84_spill] sm:$0xff] }
0x13a1   :  { %2663 = vmatprep.subr.bf16.mxu0 %v6854_v22  ;;  %v6893_v22 = vld [vmem:[#allocation83_spill] sm:$0xff] }
0x13a4   :  { %2664 = vmatpush1.bf16.msra.mxu0 %v6855_v62  ;;  %v6894_v62 = vld [vmem:[#allocation85_spill] sm:$0xff] }
0x13a5   :  { %2665 = vmatprep.subr.bf16.mxu0 %v6856_v12  ;;  %v6895_v12 = vld [vmem:[#allocation86_spill] sm:$0xff] }
0x13a8   :  { %2666 = vmatpush1.bf16.msra.mxu0 %v6857_v23  ;;  %v6896_v23 = vld [vmem:[#allocation88_spill] sm:$0xff] }
0x13a9   :  { %2667 = vmatprep.subr.bf16.mxu0 %v6858_v48  ;;  %v6897_v48 = vld [vmem:[#allocation87_spill] sm:$0xff] }
0x13ac   :  { %2668 = vmatpush1.bf16.msra.mxu0 %v6859_v35  ;;  %v6898_v35 = vld [vmem:[#allocation89_spill] sm:$0xff] }
0x13ad   :  { %2669 = vmatprep.subr.bf16.mxu0 %v6860_v24  ;;  %v6899_v24 = vld [vmem:[#allocation90_spill] sm:$0xff] }
0x13b0   :  { %2670 = vmatpush1.bf16.msra.mxu0 %v6861_v27  ;;  %v6900_v27 = vld [vmem:[#allocation92_spill] sm:$0xff] }
0x13b1   :  { %2671 = vmatprep.subr.bf16.mxu0 %v6862_v28  ;;  %v6901_v28 = vld [vmem:[#allocation91_spill] sm:$0xff] }
0x13b4   :  { %2672 = vmatpush1.bf16.msra.mxu0 %v6863_v31  ;;  %v6902_v31 = vld [vmem:[#allocation93_spill] sm:$0xff] }
0x13b5   :  { %2673 = vmatprep.subr.bf16.mxu0 %v6864_v33  ;;  %v6903_v33 = vld [vmem:[#allocation94_spill] sm:$0xff] }
0x13b8   :  { %2674 = vmatpush1.bf16.msra.mxu0 %v6865_v34  ;;  %v6904_v34 = vld [vmem:[#allocation96_spill] sm:$0xff] }
0x13b9   :  { %2675 = vmatprep.subr.bf16.mxu0 %v6866_v37  ;;  %v6905_v37 = vld [vmem:[#allocation95_spill] sm:$0xff] }
0x13bc   :  { %2676 = vmatpush1.bf16.msra.mxu0 %v6867_v41  ;;  %v6906_v41 = vld [vmem:[#allocation97_spill] sm:$0xff] }
0x13bd   :  { %2677 = vmatprep.subr.bf16.mxu0 %v6868_v42  ;;  %v6907_v42 = vld [vmem:[#allocation98_spill] sm:$0xff] }
0x13c0   :  { %2678 = vmatpush1.bf16.msra.mxu0 %v6869_v45  ;;  %v6908_v45 = vld [vmem:[#allocation100_spill] sm:$0xff] }
0x13c1   :  { %2679 = vmatprep.subr.bf16.mxu0 %v6870_v47  ;;  %v6909_v47 = vld [vmem:[#allocation99_spill] sm:$0xff] }
0x13c4   :  { %2680 = vmatpush1.bf16.msra.mxu0 %v6871_v49  ;;  %v6910_v49 = vld [vmem:[#allocation101_spill] sm:$0xff] }
0x13c5   :  { %2681 = vmatprep.subr.bf16.mxu0 %v6872_v50  ;;  %v6911_v50 = vld [vmem:[#allocation102_spill] sm:$0xff] }
0x13c8   :  { %2682 = vmatpush1.bf16.msra.mxu0 %v6873_v53  ;;  %v6912_v53 = vld [vmem:[#allocation104_spill] sm:$0xff] }
0x13c9   :  { %2683 = vmatprep.subr.bf16.mxu0 %v6874_v7  ;;  %v6913_v7 = vld [vmem:[#allocation103_spill] sm:$0xff] }
0x13cc   :  { %2684 = vmatpush1.bf16.msra.mxu0 %v6875_v9  ;;  %v6914_v9 = vld [vmem:[#allocation105_spill] sm:$0xff] }
0x13cd   :  { %2755 = vmatprep.subr.bf16.mxu0 %v6876_v11  ;;  %v6915_v11 = vld [vmem:[#allocation106_spill] sm:$0xff] }
0x1462   :  { %v2604_v13 = vpop.f32.mrb[46].mxu0 }
0x1463   :  { %v2605_v44 = vadd.f32 %v6877_v15, %v2604_v13  ;;  %v3369_v51 = vpop.f32.mrb[47].mxu0  ;;  %v6916_v13 = vld [vmem:[#allocation108_spill] sm:$0xff] }
0x1464   :  { %v6918_v51 = vld [vmem:[#allocation109_spill] sm:$0xff] }
0x1465   :  { %v5715_v26 = vadd.f32 %v2605_v44, %v6878_v58  ;;  %v6917_v44 = vld [vmem:[#allocation107_spill] sm:$0xff]  ;;  %v6919_v58 = vld [vmem:[#allocation110_spill] sm:$0xff] }
0x1467   :  { %2985 = vst [vmem:[%s5828_s10 + $0x30] sm:$0xff] %v5715_v26  ;;  %v2611_v14 = vpack.c.bf16 %v5715_v26, %v5715_v26 }
0x1469   :  { %2645 = vmatmul.mubr.bf16.vlgmr.msra.gmra.mrb[64].mxu1 %v2611_v14  ;;  %2686 = vmatmul.mubr.bf16.vlgmr.msra.gmra.mrb[64].mxu0 %v2611_v14  ;;  %v6920_v14 = vld [vmem:[#allocation112_spill] sm:$0xff] }
0x146a   :  { %2746 = vmatprep.mubr.bf16.mxu1 %v2713_v29  ;;  %2787 = vmatprep.mubr.bf16.mxu0 %v2713_v29  ;;  %v6921_v29 = vld [vmem:[#allocation111_spill] sm:$0xff] }
0x146b   :  { %2715 = vmatpush1.bf16.msra.mxu1 %v6879_v8  ;;  %2756 = vmatpush1.bf16.msra.mxu0 %v6880_v36  ;;  %v6922_v8 = vld [vmem:[#allocation113_spill] sm:$0xff]  ;;  %v6923_v36 = vld [vmem:[#allocation114_spill] sm:$0xff] }
0x146c   :  { %2716 = vmatprep.subr.bf16.mxu1 %v6881_v0  ;;  %2757 = vmatprep.subr.bf16.mxu0 %v6882_v25  ;;  %v6924_v0 = vld [vmem:[#allocation116_spill] sm:$0xff]  ;;  %v6925_v25 = vld [vmem:[#allocation115_spill] sm:$0xff] }
0x146f   :  { %2717 = vmatpush1.bf16.msra.mxu1 %v6883_v32  ;;  %2758 = vmatpush1.bf16.msra.mxu0 %v6884_v61  ;;  %v6926_v32 = vld [vmem:[#allocation117_spill] sm:$0xff]  ;;  %v6927_v61 = vld [vmem:[#allocation118_spill] sm:$0xff] }
0x1470   :  { %2718 = vmatprep.subr.bf16.mxu1 %v6885_v60  ;;  %2759 = vmatprep.subr.bf16.mxu0 %v6886_v40  ;;  %v6928_v60 = vld [vmem:[#allocation120_spill] sm:$0xff]  ;;  %v6929_v40 = vld [vmem:[#allocation119_spill] sm:$0xff] }
0x1473   :  { %2719 = vmatpush1.bf16.msra.mxu1 %v6887_v17  ;;  %2760 = vmatpush1.bf16.msra.mxu0 %v6888_v16  ;;  %v6930_v17 = vld [vmem:[#allocation121_spill] sm:$0xff]  ;;  %v6931_v16 = vld [vmem:[#allocation122_spill] sm:$0xff] }
0x1474   :  { %2720 = vmatprep.subr.bf16.mxu1 %v6889_v55  ;;  %2761 = vmatprep.subr.bf16.mxu0 %v6890_v19  ;;  %v6932_v55 = vld [vmem:[#allocation124_spill] sm:$0xff]  ;;  %v6933_v19 = vld [vmem:[#allocation123_spill] sm:$0xff] }
0x1477   :  { %2721 = vmatpush1.bf16.msra.mxu1 %v6891_v20  ;;  %2762 = vmatpush1.bf16.msra.mxu0 %v6892_v21  ;;  %v6934_v20 = vld [vmem:[#allocation125_spill] sm:$0xff]  ;;  %v6935_v21 = vld [vmem:[#allocation126_spill] sm:$0xff] }
0x1478   :  { %2722 = vmatprep.subr.bf16.mxu1 %v6893_v22  ;;  %2763 = vmatprep.subr.bf16.mxu0 %v6894_v62  ;;  %v6936_v22 = vld [vmem:[#allocation128_spill] sm:$0xff]  ;;  %v6937_v62 = vld [vmem:[#allocation127_spill] sm:$0xff] }
0x147b   :  { %2723 = vmatpush1.bf16.msra.mxu1 %v6895_v12  ;;  %2764 = vmatpush1.bf16.msra.mxu0 %v6896_v23  ;;  %v6938_v12 = vld [vmem:[#allocation129_spill] sm:$0xff]  ;;  %v6939_v23 = vld [vmem:[#allocation130_spill] sm:$0xff] }
0x147c   :  { %2724 = vmatprep.subr.bf16.mxu1 %v6897_v48  ;;  %2765 = vmatprep.subr.bf16.mxu0 %v6898_v35  ;;  %v6940_v48 = vld [vmem:[#allocation131_spill] sm:$0xff] }
0x147f   :  { %2725 = vmatpush1.bf16.msra.mxu1 %v6899_v24  ;;  %2766 = vmatpush1.bf16.msra.mxu0 %v6900_v27  ;;  %v6941_v27 = vld [vmem:[#allocation63_spill] sm:$0xff] }
0x1480   :  { %2726 = vmatprep.subr.bf16.mxu1 %v6901_v28  ;;  %2767 = vmatprep.subr.bf16.mxu0 %v6902_v31 }
0x1483   :  { %2727 = vmatpush1.bf16.msra.mxu1 %v6903_v33  ;;  %2768 = vmatpush1.bf16.msra.mxu0 %v6904_v34 }
0x1484   :  { %2728 = vmatprep.subr.bf16.mxu1 %v6905_v37  ;;  %2769 = vmatprep.subr.bf16.mxu0 %v6906_v41 }
0x1487   :  { %2729 = vmatpush1.bf16.msra.mxu1 %v6907_v42  ;;  %2770 = vmatpush1.bf16.msra.mxu0 %v6908_v45 }
0x1488   :  { %2730 = vmatprep.subr.bf16.mxu1 %v6909_v47  ;;  %2771 = vmatprep.subr.bf16.mxu0 %v6910_v49 }
0x148b   :  { %2731 = vmatpush1.bf16.msra.mxu1 %v6911_v50  ;;  %2772 = vmatpush1.bf16.msra.mxu0 %v6912_v53 }
0x148c   :  { %2732 = vmatprep.subr.bf16.mxu1 %v6913_v7  ;;  %2773 = vmatprep.subr.bf16.mxu0 %v6914_v9 }
0x148f   :  { %2733 = vmatpush1.bf16.msra.mxu1 %v6915_v11  ;;  %2774 = vmatpush1.bf16.msra.mxu0 %v6916_v13 }
0x1490   :  { %2734 = vmatprep.subr.bf16.mxu1 %v6917_v44  ;;  %2775 = vmatprep.subr.bf16.mxu0 %v6918_v51 }
0x1493   :  { %2735 = vmatpush1.bf16.msra.mxu1 %v6919_v58  ;;  %2776 = vmatpush1.bf16.msra.mxu0 %v6920_v14 }
0x1494   :  { %2736 = vmatprep.subr.bf16.mxu1 %v6921_v29  ;;  %2777 = vmatprep.subr.bf16.mxu0 %v6922_v8 }
0x1497   :  { %2737 = vmatpush1.bf16.msra.mxu1 %v6923_v36  ;;  %2778 = vmatpush1.bf16.msra.mxu0 %v6924_v0 }
0x1498   :  { %2738 = vmatprep.subr.bf16.mxu1 %v6925_v25  ;;  %2779 = vmatprep.subr.bf16.mxu0 %v6926_v32 }
0x149b   :  { %2739 = vmatpush1.bf16.msra.mxu1 %v6927_v61  ;;  %2780 = vmatpush1.bf16.msra.mxu0 %v6928_v60 }
0x149c   :  { %2740 = vmatprep.subr.bf16.mxu1 %v6929_v40  ;;  %2781 = vmatprep.subr.bf16.mxu0 %v6930_v17 }
0x149f   :  { %2741 = vmatpush1.bf16.msra.mxu1 %v6931_v16  ;;  %2782 = vmatpush1.bf16.msra.mxu0 %v6932_v55 }
0x14a0   :  { %2742 = vmatprep.subr.bf16.mxu1 %v6933_v19  ;;  %2783 = vmatprep.subr.bf16.mxu0 %v6934_v20 }
0x14a3   :  { %2743 = vmatpush1.bf16.msra.mxu1 %v6935_v21  ;;  %2784 = vmatpush1.bf16.msra.mxu0 %v6936_v22 }
0x14a4   :  { %2744 = vmatprep.subr.bf16.mxu1 %v6937_v62  ;;  %2785 = vmatprep.subr.bf16.mxu0 %v6938_v12 }
0x14a7   :  { %2745 = vmatpush1.bf16.msra.mxu1 %v6939_v23  ;;  %2786 = vmatpush1.bf16.msra.mxu0 %v6940_v48 }
0x14a8   :  { %3573 = vmatprep.subr.bf16.mxu1 %v6309_v52 }
0x153c   :  { %v2646_v35 = vpop.f32.mrb[64].mxu1  ;;  %v2687_v24 = vpop.f32.mrb[64].mxu0 }
0x153d   :  { %v2647_v28 = vadd.f32 %v2646_v35, %v6941_v27  ;;  %v2648_v31 = vpop.f32.mrb[65].mxu1  ;;  %v2689_v33 = vpop.f32.mrb[65].mxu0  ;;  %v2688_v50 = vadd.f32 %v2687_v24, %v6312_v18 }
0x153e   :  { %v2649_v34 = vadd.f32 %v2648_v31, %v6311_v10  ;;  %v2650_v37 = vpop.f32.mrb[66].mxu1  ;;  %v2691_v41 = vpop.f32.mrb[66].mxu0  ;;  %v2690_v53 = vadd.f32 %v2689_v33, %v6313_v63 }
0x153f   :  { %v2694_v42 = vmul.f32 0.5, %v2647_v28  ;;  %v2651_v45 = vpop.f32.mrb[67].mxu1  ;;  %v2692_v47 = vpop.f32.mrb[67].mxu0 }
0x1540   :  { %v2698_v49 = vmul.f32 0.5, %v2649_v34  ;;  %v2703_v7 = vmul.f32 0.5, %v2690_v53 }
0x1541   :  { %3847 = vtanh.f32 %v2694_v42 }
0x1542   :  { %3849 = vtanh.f32 %v2698_v49 }
0x1543   :  { %3851 = vtanh.f32 %v2688_v50 }
0x1544   :  { %3853 = vtanh.f32 %v2703_v7 }
0x154b   :  { %v3848_v9 = vpop.eup %3847 }
0x154c   :  { %v3850_v11 = vpop.eup %3849  ;;  %v2696_v13 = vmul.f32 0.5, %v3848_v9 }
0x154d   :  { %v2700_v44 = vmul.f32 0.5, %v3850_v11  ;;  %v3852_v51 = vpop.eup %3851 }
0x154e   :  { %v2697_v10 = vadd.f32 0.5, %v2696_v13  ;;  %v3854_v36 = vpop.eup %3853 }
0x154f   :  { %v2701_v58 = vadd.f32 0.5, %v2700_v44  ;;  %v2705_v18 = vmul.f32 0.5, %v3854_v36 }
0x1550   :  { %v2708_v14 = vmul.f32 %v3852_v51, %v2697_v10 }
0x1551   :  { %v2707_v29 = vmul.f32 %v2701_v58, %v5614_v54  ;;  %v2706_v0 = vadd.f32 0.5, %v2705_v18 }
0x1553   :  { %v2709_v8 = vadd.f32 %v2708_v14, %v2707_v29 }
0x1555   :  { %3855 = vtanh.f32 %v2709_v8 }
0x155f   :  { %v3856_v25 = vpop.eup %3855 }
0x1560   :  { %v2711_v32 = vmul.f32 %v3856_v25, %v2706_v0 }
0x1562   :  { %v2712_v63 = vpack.c.bf16 %v2711_v32, %v2711_v32 }
0x1564   :  { %2747 = vmatmul.mubr.bf16.vlgmr.msra.gmra.mrb[68].mxu1 %v2712_v63  ;;  %2788 = vmatmul.mubr.bf16.vlgmr.msra.gmra.mrb[68].mxu0 %v2712_v63 }
0x1565   :  { %3575 = vmatpush3.bf16.msra.mxu1 %v4526_v30  ;;  %3402 = vmatprep.mubr.msk.f32.mxu1 %vm3907_vm0, %v6315_v43 }
0x1566   :  { %3576 = vmatprep.subr.bf16.mxu1 %v6309_v52 }
0x1569   :  { %3578 = vmatpush3.bf16.msra.mxu1 %v4534_v59 }
0x156a   :  { %3579 = vmatprep.subr.bf16.mxu1 %v6309_v52 }
0x156d   :  { %3581 = vmatpush3.bf16.msra.mxu1 %v4544_v1 }
0x156e   :  { %3582 = vmatprep.subr.bf16.mxu1 %v6309_v52 }
0x1571   :  { %3584 = vmatpush3.bf16.msra.mxu1 %v4552_v2 }
0x1572   :  { %3585 = vmatprep.subr.bf16.mxu1 %v6309_v52 }
0x1575   :  { %3587 = vmatpush3.bf16.msra.mxu1 %v4560_v3 }
0x1576   :  { %3588 = vmatprep.subr.bf16.mxu1 %v6309_v52 }
0x1579   :  { %3590 = vmatpush3.bf16.msra.mxu1 %v4568_v4 }
0x157a   :  { %3591 = vmatprep.subr.bf16.mxu1 %v6309_v52 }
0x157d   :  { %3593 = vmatpush3.bf16.msra.mxu1 %v4576_v5 }
0x157e   :  { %3594 = vmatprep.subr.bf16.mxu1 %v6309_v52 }
0x1581   :  { %3596 = vmatpush3.bf16.msra.mxu1 %v4584_v6 }
0x1637   :  { %v2748_v30 = vpop.f32.mrb[68].mxu1  ;;  %v2789_v59 = vpop.f32.mrb[68].mxu0 }
0x1638   :  { %v2749_v1 = vadd.f32 %v2748_v30, %v6848_v39  ;;  %v2750_v2 = vpop.f32.mrb[69].mxu1  ;;  %v2791_v43 = vpop.f32.mrb[69].mxu0  ;;  %v2790_v5 = vadd.f32 %v2789_v59, %v6317_v56 }
0x1639   :  { %v2751_v3 = vadd.f32 %v2750_v2, %v4280_v46  ;;  %v2752_v54 = vpop.f32.mrb[70].mxu1  ;;  %v2793_v61 = vpop.f32.mrb[70].mxu0  ;;  %v2792_v6 = vadd.f32 %v2791_v43, %v6318_v38 }
0x163a   :  { %v2796_v60 = vmul.f32 0.5, %v2749_v1  ;;  %v2753_v4 = vpop.f32.mrb[71].mxu1  ;;  %v2794_v40 = vpop.f32.mrb[71].mxu0 }
0x163b   :  { %v2800_v17 = vmul.f32 0.5, %v2751_v3  ;;  %v2805_v52 = vmul.f32 0.5, %v2792_v6 }
0x163c   :  { %3857 = vtanh.f32 %v2796_v60 }
0x163d   :  { %3859 = vtanh.f32 %v2800_v17 }
0x163e   :  { %3861 = vtanh.f32 %v2790_v5 }
0x163f   :  { %3863 = vtanh.f32 %v2805_v52 }
0x1646   :  { %v3858_v16 = vpop.eup %3857 }
0x1647   :  { %v3860_v39 = vpop.eup %3859  ;;  %v2798_v55 = vmul.f32 0.5, %v3858_v16 }
0x1648   :  { %v2802_v19 = vmul.f32 0.5, %v3860_v39  ;;  %v3862_v20 = vpop.eup %3861 }
0x1649   :  { %v2799_v46 = vadd.f32 0.5, %v2798_v55  ;;  %v3864_v23 = vpop.eup %3863 }
0x164a   :  { %v2803_v21 = vadd.f32 0.5, %v2802_v19  ;;  %v2807_v56 = vmul.f32 0.5, %v3864_v23 }
0x164b   :  { %v2810_v22 = vmul.f32 %v3862_v20, %v2799_v46 }
0x164c   :  { %v2809_v62 = vmul.f32 %v2803_v21, %v5677_v57  ;;  %v2808_v48 = vadd.f32 0.5, %v2807_v56 }
0x164e   :  { %v2811_v12 = vadd.f32 %v2810_v22, %v2809_v62 }
0x1650   :  { %3865 = vtanh.f32 %v2811_v12 }
0x165a   :  { %v3866_v35 = vpop.eup %3865 }
0x165b   :  { %v2813_v24 = vmul.f32 %v3866_v35, %v2808_v48 }
0x165d   :  { %3403 = vmatmul.mubr.f32.vlgmr.msra.gmra.mrb[54].mxu1 %v2813_v24 }
0x1730   :  { %v2880_v38 = vpop.f32.mrb[54].mxu1 }
0x1731   :  { %v2881_v27 = vadd.f32 %v6877_v15, %v2880_v38  ;;  %v3404_v28 = vpop.f32.mrb[55].mxu1 }
0x1733   :  { %v2884_v31 = vadd.f32 %v2881_v27, %v5715_v26 }
0x1735   :  { %2986 = vst [vmem:[%s5828_s10 + $0x38] sm:$0xff] %v2884_v31 }
0x1736   :  { %2891 = vsyncpa [#allocation6], 1 }
0x1737   :  { %2892 = vsyncmov [#allocation4] }
0x173a   :  { %s2893_s29 = vpop.sfrf %2892 }
0x173b   :  { %p2987_p8 = scmp.ne.s32.totalorder %s2893_s29, 0 }
0x173d   :  { %2897 = shalt.err (%p2987_p8)  }
0x173e   :  { %2899 = vsyncmov [#allocation4 + $0x1] }
0x1741   :  { %s2900_s30 = vpop.sfrf %2899 }
0x1742   :  { %p2988_p9 = scmp.ne.s32.totalorder %s2900_s30, 0 }
0x1744   :  { %2904 = shalt.err (%p2988_p9)  }

</bundles_post_ra>
